<compile_context>
chip_gen: v7x
topology: tpu7x:2x2x1
jax: 0.10.0
libtpu: 0.0.40
codegen_flags: <defaults>
</compile_context>

<pallas_src>
import math

import jax
import jax.numpy as jnp
from jax.experimental import pallas as pl
from jax.experimental.pallas import tpu as pltpu

# --- synthetic ChemBERTa config (small) --------------------------------------
VOCAB = 64
MAXPOS = 32
HIDDEN = 32
HEADS = 4
HEAD_DIM = HIDDEN // HEADS          # 8
FFN = 64
FFN_PAD = 128                       # FFN intermediate padded to a full lane tile
LAYERS = 2
NUM_TASKS = 3
PAD_TASKS = 128                     # classifier output padded to a full lane tile
LN_EPS = 1e-5


# --- in-kernel helpers --------------------------------------------------------
def _layernorm(x, g, b):
    mu = jnp.mean(x, axis=-1, keepdims=True)
    xc = x - mu
    var = jnp.mean(xc * xc, axis=-1, keepdims=True)
    return xc * jax.lax.rsqrt(var + LN_EPS) * g + b


def _gelu(x):
    # tanh-approx GELU (see TODO above); f32 on the VPU/EUP.
    c = math.sqrt(2.0 / math.pi)
    return 0.5 * x * (1.0 + jnp.tanh(c * (x + 0.044715 * x * x * x)))


def _mm(x, w):
    # MXU matmul: bf16 operands, f32 accumulation.
    return jnp.dot(x.astype(jnp.bfloat16), w, preferred_element_type=jnp.float32)


# --- fused forward kernel -------------------------------------------------------
def fused_forward_kernel(
    tok_ref, pos_ref,             # (B*S, 1) int32 token / RoBERTa position ids
    mask_ref,                     # (B, S)   f32   1 = real token, 0 = pad
    word_emb_ref, pos_emb_ref,    # (VOCAB, H) / (MAXPOS, H) f32 embedding tables
    emb_ln_g_ref, emb_ln_b_ref,   # (1, H) f32
    wqkv_ref, bqkv_ref,           # (L, 3*HEADS, H, Dh) bf16 / (L, 3*HEADS, 1, Dh) f32
    wo_ref, bo_ref,               # (L, HEADS, Dh, H)   bf16 / (L, 1, H)          f32
    ln1_g_ref, ln1_b_ref,         # (L, 1, H) f32
    w1_ref, b1_ref,               # (L, H, FFN_PAD) bf16 / (L, 1, FFN_PAD) f32
    w2_ref, b2_ref,               # (L, FFN_PAD, H) bf16 / (L, 1, H)       f32
    ln2_g_ref, ln2_b_ref,         # (L, 1, H) f32
    fc_w_ref, fc_b_ref,           # (H, PAD_TASKS) bf16 / (1, PAD_TASKS) f32
    out_ref,                      # (B, PAD_TASKS) f32
):
    B, S = mask_ref.shape
    BS = B * S
    scale = 1.0 / math.sqrt(HEAD_DIM)

    # ---- fused embedding lookup: one-hot selection on the MXU (tables are
    # tiny and VMEM-resident; avoids any in-kernel dynamic gather) -------------
    tok_oh = (tok_ref[...] ==
              jax.lax.broadcasted_iota(jnp.int32, (BS, VOCAB), 1)).astype(jnp.float32)
    pos_oh = (pos_ref[...] ==
              jax.lax.broadcasted_iota(jnp.int32, (BS, MAXPOS), 1)).astype(jnp.float32)
    h = (jnp.dot(tok_oh, word_emb_ref[...], preferred_element_type=jnp.float32)
         + jnp.dot(pos_oh, pos_emb_ref[...], preferred_element_type=jnp.float32))
    h = _layernorm(h, emb_ln_g_ref[...], emb_ln_b_ref[...])          # (BS, H) f32

    # ---- additive attention-mask bias over keys, materialized ONCE and reused
    # by every layer/head (JAX does not CSE broadcast_in_dim) ------------------
    bias = jnp.broadcast_to(((1.0 - mask_ref[...]) * (-1e9))[:, None, :],
                            (B, S, S))                               # (B, Sq, Sk)

    for l in range(LAYERS):
        # --- self-attention ----------------------------------------------------
        h_bf = h.astype(jnp.bfloat16)                 # single bf16 cast per layer
        attn = jnp.zeros((BS, HIDDEN), jnp.float32)
        for hh in range(HEADS):
            # Head extraction = free leading-dim ref index into head-major
            # weights; no unaligned lane slices of a fused qkv tensor.
            q = jnp.dot(h_bf, wqkv_ref[l, hh], preferred_element_type=jnp.float32)
            k = jnp.dot(h_bf, wqkv_ref[l, HEADS + hh], preferred_element_type=jnp.float32)
            v = jnp.dot(h_bf, wqkv_ref[l, 2 * HEADS + hh], preferred_element_type=jnp.float32)
            q = (q + bqkv_ref[l, hh]) * scale
            k = k + bqkv_ref[l, HEADS + hh]
            v = v + bqkv_ref[l, 2 * HEADS + hh]
            # batch over sequences with the standard 'bqd,bkd->bqk' pattern
            q3 = q.reshape(B, S, HEAD_DIM).astype(jnp.bfloat16)
            k3 = k.reshape(B, S, HEAD_DIM).astype(jnp.bfloat16)
            v3 = v.reshape(B, S, HEAD_DIM).astype(jnp.bfloat16)
            s = jnp.einsum('bqd,bkd->bqk', q3, k3,
                           preferred_element_type=jnp.float32)        # (B, S, S)
            s = s + bias
            s = s - jnp.max(s, axis=-1, keepdims=True)
            p = jnp.exp(s)
            p = p / jnp.sum(p, axis=-1, keepdims=True)                # exact softmax
            ctx = jnp.einsum('bqk,bkd->bqd', p.astype(jnp.bfloat16), v3,
                             preferred_element_type=jnp.float32)      # (B, S, Dh)
            # accumulate this head directly through its slice of the output
            # projection — replaces the lane-axis head concat with one extra
            # tiny MXU push (MXU has slack at <1% occupancy).
            attn = attn + jnp.dot(ctx.reshape(BS, HEAD_DIM).astype(jnp.bfloat16),
                                  wo_ref[l, hh], preferred_element_type=jnp.float32)
        attn = attn + bo_ref[l]
        h = _layernorm(attn + h, ln1_g_ref[l], ln1_b_ref[l])

        # --- feed-forward (intermediate padded to 128 lanes; padded w1 columns
        # and w2 rows are zero, so results are unchanged) ------------------------
        ff = _gelu(_mm(h, w1_ref[l]) + b1_ref[l])                     # (BS, FFN_PAD)
        ff = _mm(ff, w2_ref[l]) + b2_ref[l]                           # (BS, H)
        h = _layernorm(ff + h, ln2_g_ref[l], ln2_b_ref[l])

    # --- CLS pooling (single strided selection) + classifier (lane-dense store)
    cls = h.reshape(B, S, HIDDEN)[:, 0, :]                            # (B, H)
    out_ref[...] = _mm(cls, fc_w_ref[...]) + fc_b_ref[...]            # (B, PAD_TASKS)


# --- deterministic parameter init (synthetic, no checkpoint) -------------------
def init_params(key):
    keys = iter(jax.random.split(key, 8))

    def nrm(shape):
        return 0.02 * jax.random.normal(next(keys), shape, jnp.float32)

    # FFN / classifier weights zero-padded to full 128-lane tiles.
    w1 = jnp.zeros((LAYERS, HIDDEN, FFN_PAD), jnp.float32
                   ).at[:, :, :FFN].set(nrm((LAYERS, HIDDEN, FFN)))
    w2 = jnp.zeros((LAYERS, FFN_PAD, HIDDEN), jnp.float32
                   ).at[:, :FFN, :].set(nrm((LAYERS, FFN, HIDDEN)))
    fc_w = jnp.zeros((HIDDEN, PAD_TASKS), jnp.float32
                     ).at[:, :NUM_TASKS].set(nrm((HIDDEN, NUM_TASKS)))

    return {
        "word_emb": nrm((VOCAB, HIDDEN)),
        "pos_emb": nrm((MAXPOS, HIDDEN)),
        "emb_ln_g": jnp.ones((1, HIDDEN), jnp.float32),
        "emb_ln_b": jnp.zeros((1, HIDDEN), jnp.float32),
        # head-major projection weights: (layer, [q*H | k*H | v*H], HIDDEN, Dh)
        "wqkv": nrm((LAYERS, 3 * HEADS, HIDDEN, HEAD_DIM)).astype(jnp.bfloat16),
        "bqkv": jnp.zeros((LAYERS, 3 * HEADS, 1, HEAD_DIM), jnp.float32),
        "wo": nrm((LAYERS, HEADS, HEAD_DIM, HIDDEN)).astype(jnp.bfloat16),
        "bo": jnp.zeros((LAYERS, 1, HIDDEN), jnp.float32),
        "ln1_g": jnp.ones((LAYERS, 1, HIDDEN), jnp.float32),
        "ln1_b": jnp.zeros((LAYERS, 1, HIDDEN), jnp.float32),
        "w1": w1.astype(jnp.bfloat16),
        "b1": jnp.zeros((LAYERS, 1, FFN_PAD), jnp.float32),
        "w2": w2.astype(jnp.bfloat16),
        "b2": jnp.zeros((LAYERS, 1, HIDDEN), jnp.float32),
        "ln2_g": jnp.ones((LAYERS, 1, HIDDEN), jnp.float32),
        "ln2_b": jnp.zeros((LAYERS, 1, HIDDEN), jnp.float32),
        "fc_w": fc_w.astype(jnp.bfloat16),
        "fc_b": jnp.zeros((1, PAD_TASKS), jnp.float32),
    }


# --- forward pass (mirrors ChemBERTaClassifier.forward) ------------------------
@jax.jit
def chemberta_classifier_forward(params, token_ids, attn_mask):
    B, S = token_ids.shape

    # RoBERTa-style position ids: padding_idx(=1) + cumulative mask (trivial
    # integer math left in the wrapper); the embedding GATHER itself is fused
    # into the kernel as a one-hot MXU select.
    pos_ids = jnp.cumsum(attn_mask, axis=1) * attn_mask + 1
    tok_col = token_ids.reshape(B * S, 1).astype(jnp.int32)
    pos_col = pos_ids.reshape(B * S, 1).astype(jnp.int32)
    mask_f = attn_mask.astype(jnp.float32)

    # whole embedding + encoder + classifier in ONE pallas_call; every operand
    # is a full-array VMEM block (total footprint < 1 MiB, comfortably under
    # every generation's scoped VMEM default and v7x's 64 MiB physical VMEM).
    logits_padded = pl.pallas_call(
        fused_forward_kernel,
        out_shape=jax.ShapeDtypeStruct((B, PAD_TASKS), jnp.float32),
        compiler_params=pltpu.CompilerParams(
            vmem_limit_bytes=16 * 1024 * 1024),
    )(
        tok_col, pos_col, mask_f,
        params["word_emb"], params["pos_emb"],
        params["emb_ln_g"], params["emb_ln_b"],
        params["wqkv"], params["bqkv"],
        params["wo"], params["bo"],
        params["ln1_g"], params["ln1_b"],
        params["w1"], params["b1"],
        params["w2"], params["b2"],
        params["ln2_g"], params["ln2_b"],
        params["fc_w"], params["fc_b"],
    )
    return logits_padded[:, :NUM_TASKS]


if __name__ == "__main__":
    key = jax.random.PRNGKey(0)
    pkey, tkey = jax.random.split(key)
    params = init_params(pkey)

    B, S = 2, 8
    token_ids = jax.random.randint(tkey, (B, S), minval=0, maxval=VOCAB,
                                   dtype=jnp.int32)
    # second sequence has 2 padding positions (mimics tokenizer padding=True)
    attn_mask = jnp.array(
        [[1, 1, 1, 1, 1, 1, 1, 1],
         [1, 1, 1, 1, 1, 1, 0, 0]], dtype=jnp.int32)

    logits = chemberta_classifier_forward(params, token_ids, attn_mask)
    jax.block_until_ready(logits)
    assert logits.shape == (B, NUM_TASKS) and logits.dtype == jnp.float32
    print("KERNEL_OK")
</pallas_src>

<mosaic_0001>
module attributes {stable_mosaic.version = 11 : i64} {
  func.func @fused_forward_kernel(%arg0: memref<16x1xi32, #tpu.memory_space<vmem>>, %arg1: memref<16x1xi32, #tpu.memory_space<vmem>>, %arg2: memref<2x8xf32, #tpu.memory_space<vmem>>, %arg3: memref<64x32xf32, #tpu.memory_space<vmem>>, %arg4: memref<32x32xf32, #tpu.memory_space<vmem>>, %arg5: memref<1x32xf32, #tpu.memory_space<vmem>>, %arg6: memref<1x32xf32, #tpu.memory_space<vmem>>, %arg7: memref<2x12x32x8xbf16, #tpu.memory_space<vmem>>, %arg8: memref<2x12x1x8xf32, #tpu.memory_space<vmem>>, %arg9: memref<2x4x8x32xbf16, #tpu.memory_space<vmem>>, %arg10: memref<2x1x32xf32, #tpu.memory_space<vmem>>, %arg11: memref<2x1x32xf32, #tpu.memory_space<vmem>>, %arg12: memref<2x1x32xf32, #tpu.memory_space<vmem>>, %arg13: memref<2x32x128xbf16, #tpu.memory_space<vmem>>, %arg14: memref<2x1x128xf32, #tpu.memory_space<vmem>>, %arg15: memref<2x128x32xbf16, #tpu.memory_space<vmem>>, %arg16: memref<2x1x32xf32, #tpu.memory_space<vmem>>, %arg17: memref<2x1x32xf32, #tpu.memory_space<vmem>>, %arg18: memref<2x1x32xf32, #tpu.memory_space<vmem>>, %arg19: memref<32x128xbf16, #tpu.memory_space<vmem>>, %arg20: memref<1x128xf32, #tpu.memory_space<vmem>>, %arg21: memref<2x128xf32, #tpu.memory_space<vmem>>) attributes {dimension_semantics = [], scalar_prefetch = 0 : i64, scratch_operands = 0 : i64, tpu.core_type = #tpu.core_type<tc>} {
    %c0 = arith.constant 0 : index
    %c0_0 = arith.constant 0 : index
    %0 = vector.load %arg0[%c0, %c0_0] : memref<16x1xi32, #tpu.memory_space<vmem>>, vector<16x1xi32>
    %1 = tpu.iota {dimensions = array<i32: 1>} : vector<16x64xi32>
    %2 = vector.broadcast %0 : vector<16x1xi32> to vector<16x64xi32>
    %3 = arith.cmpi eq, %2, %1 : vector<16x64xi32>
    %4 = arith.extui %3 : vector<16x64xi1> to vector<16x64xi32>
    %5 = arith.sitofp %4 : vector<16x64xi32> to vector<16x64xf32>
    %c0_1 = arith.constant 0 : index
    %c0_2 = arith.constant 0 : index
    %6 = vector.load %arg1[%c0_1, %c0_2] : memref<16x1xi32, #tpu.memory_space<vmem>>, vector<16x1xi32>
    %7 = tpu.iota {dimensions = array<i32: 1>} : vector<16x32xi32>
    %8 = vector.broadcast %6 : vector<16x1xi32> to vector<16x32xi32>
    %9 = arith.cmpi eq, %8, %7 : vector<16x32xi32>
    %10 = arith.extui %9 : vector<16x32xi1> to vector<16x32xi32>
    %11 = arith.sitofp %10 : vector<16x32xi32> to vector<16x32xf32>
    %c0_3 = arith.constant 0 : index
    %c0_4 = arith.constant 0 : index
    %12 = vector.load %arg3[%c0_3, %c0_4] : memref<64x32xf32, #tpu.memory_space<vmem>>, vector<64x32xf32>
    %cst = arith.constant dense<0.000000e+00> : vector<16x32xf32>
    %13 = tpu.matmul %5, %12, %cst {dimension_numbers = #tpu.dot_dimension_numbers<[1], [0], [0], [1], [0, 0, 1, 1], [], []>} : vector<16x64xf32>, vector<64x32xf32>, vector<16x32xf32> -> vector<16x32xf32>
    %c0_5 = arith.constant 0 : index
    %c0_6 = arith.constant 0 : index
    %14 = vector.load %arg4[%c0_5, %c0_6] : memref<32x32xf32, #tpu.memory_space<vmem>>, vector<32x32xf32>
    %cst_7 = arith.constant dense<0.000000e+00> : vector<16x32xf32>
    %15 = tpu.matmul %11, %14, %cst_7 {dimension_numbers = #tpu.dot_dimension_numbers<[1], [0], [0], [1], [0, 0, 1, 1], [], []>} : vector<16x32xf32>, vector<32x32xf32>, vector<16x32xf32> -> vector<16x32xf32>
    %16 = arith.addf %13, %15 : vector<16x32xf32>
    %c0_8 = arith.constant 0 : index
    %c0_9 = arith.constant 0 : index
    %17 = vector.load %arg5[%c0_8, %c0_9] : memref<1x32xf32, #tpu.memory_space<vmem>>, vector<1x32xf32>
    %c0_10 = arith.constant 0 : index
    %c0_11 = arith.constant 0 : index
    %18 = vector.load %arg6[%c0_10, %c0_11] : memref<1x32xf32, #tpu.memory_space<vmem>>, vector<1x32xf32>
    %cst_12 = arith.constant dense<0.000000e+00> : vector<16xf32>
    %19 = vector.multi_reduction <add>, %16, %cst_12 [1] : vector<16x32xf32> to vector<16xf32>
    %20 = vector.shape_cast %19 : vector<16xf32> to vector<16x1xf32>
    %cst_13 = arith.constant 3.200000e+01 : f32
    %21 = vector.broadcast %cst_13 : f32 to vector<16x1xf32>
    %22 = arith.divf %20, %21 : vector<16x1xf32>
    %23 = vector.broadcast %22 : vector<16x1xf32> to vector<16x32xf32>
    %24 = arith.subf %16, %23 : vector<16x32xf32>
    %25 = arith.mulf %24, %24 : vector<16x32xf32>
    %cst_14 = arith.constant dense<0.000000e+00> : vector<16xf32>
    %26 = vector.multi_reduction <add>, %25, %cst_14 [1] : vector<16x32xf32> to vector<16xf32>
    %27 = vector.shape_cast %26 : vector<16xf32> to vector<16x1xf32>
    %cst_15 = arith.constant 3.200000e+01 : f32
    %28 = vector.broadcast %cst_15 : f32 to vector<16x1xf32>
    %29 = arith.divf %27, %28 : vector<16x1xf32>
    %cst_16 = arith.constant 9.99999974E-6 : f32
    %30 = vector.broadcast %cst_16 : f32 to vector<16x1xf32>
    %31 = arith.addf %29, %30 : vector<16x1xf32>
    %32 = math.rsqrt %31 : vector<16x1xf32>
    %33 = vector.broadcast %32 : vector<16x1xf32> to vector<16x32xf32>
    %34 = arith.mulf %24, %33 : vector<16x32xf32>
    %35 = vector.broadcast %17 : vector<1x32xf32> to vector<16x32xf32>
    %36 = arith.mulf %34, %35 : vector<16x32xf32>
    %37 = vector.broadcast %18 : vector<1x32xf32> to vector<16x32xf32>
    %38 = arith.addf %36, %37 : vector<16x32xf32>
    %c0_17 = arith.constant 0 : index
    %c0_18 = arith.constant 0 : index
    %39 = vector.load %arg2[%c0_17, %c0_18] : memref<2x8xf32, #tpu.memory_space<vmem>>, vector<2x8xf32>
    %cst_19 = arith.constant 1.000000e+00 : f32
    %40 = vector.broadcast %cst_19 : f32 to vector<2x8xf32>
    %41 = arith.subf %40, %39 : vector<2x8xf32>
    %cst_20 = arith.constant -1.000000e+09 : f32
    %42 = vector.broadcast %cst_20 : f32 to vector<2x8xf32>
    %43 = arith.mulf %41, %42 : vector<2x8xf32>
    %44 = vector.shape_cast %43 : vector<2x8xf32> to vector<2x1x8xf32>
    %45 = vector.shape_cast %44 : vector<2x1x8xf32> to vector<2x1x8xf32>
    %46 = vector.broadcast %45 : vector<2x1x8xf32> to vector<2x8x8xf32>
    %47 = arith.truncf %38 : vector<16x32xf32> to vector<16x32xbf16>
    %cst_21 = arith.constant 0.000000e+00 : f32
    %48 = vector.broadcast %cst_21 : f32 to vector<16x32xf32>
    %c0_22 = arith.constant 0 : index
    %c0_23 = arith.constant 0 : index
    %c0_24 = arith.constant 0 : index
    %c0_25 = arith.constant 0 : index
    %49 = vector.load %arg7[%c0_22, %c0_23, %c0_24, %c0_25] : memref<2x12x32x8xbf16, #tpu.memory_space<vmem>>, vector<1x1x32x8xbf16>
    %50 = vector.shape_cast %49 : vector<1x1x32x8xbf16> to vector<32x8xbf16>
    %cst_26 = arith.constant dense<0.000000e+00> : vector<16x8xf32>
    %51 = tpu.matmul %47, %50, %cst_26 {dimension_numbers = #tpu.dot_dimension_numbers<[1], [0], [0], [1], [0, 0, 1, 1], [], []>} : vector<16x32xbf16>, vector<32x8xbf16>, vector<16x8xf32> -> vector<16x8xf32>
    %c0_27 = arith.constant 0 : index
    %c4 = arith.constant 4 : index
    %c0_28 = arith.constant 0 : index
    %c0_29 = arith.constant 0 : index
    %52 = vector.load %arg7[%c0_27, %c4, %c0_28, %c0_29] : memref<2x12x32x8xbf16, #tpu.memory_space<vmem>>, vector<1x1x32x8xbf16>
    %53 = vector.shape_cast %52 : vector<1x1x32x8xbf16> to vector<32x8xbf16>
    %cst_30 = arith.constant dense<0.000000e+00> : vector<16x8xf32>
    %54 = tpu.matmul %47, %53, %cst_30 {dimension_numbers = #tpu.dot_dimension_numbers<[1], [0], [0], [1], [0, 0, 1, 1], [], []>} : vector<16x32xbf16>, vector<32x8xbf16>, vector<16x8xf32> -> vector<16x8xf32>
    %c0_31 = arith.constant 0 : index
    %c8 = arith.constant 8 : index
    %c0_32 = arith.constant 0 : index
    %c0_33 = arith.constant 0 : index
    %55 = vector.load %arg7[%c0_31, %c8, %c0_32, %c0_33] : memref<2x12x32x8xbf16, #tpu.memory_space<vmem>>, vector<1x1x32x8xbf16>
    %56 = vector.shape_cast %55 : vector<1x1x32x8xbf16> to vector<32x8xbf16>
    %cst_34 = arith.constant dense<0.000000e+00> : vector<16x8xf32>
    %57 = tpu.matmul %47, %56, %cst_34 {dimension_numbers = #tpu.dot_dimension_numbers<[1], [0], [0], [1], [0, 0, 1, 1], [], []>} : vector<16x32xbf16>, vector<32x8xbf16>, vector<16x8xf32> -> vector<16x8xf32>
    %c0_35 = arith.constant 0 : index
    %c0_36 = arith.constant 0 : index
    %c0_37 = arith.constant 0 : index
    %c0_38 = arith.constant 0 : index
    %58 = vector.load %arg8[%c0_35, %c0_36, %c0_37, %c0_38] : memref<2x12x1x8xf32, #tpu.memory_space<vmem>>, vector<1x1x1x8xf32>
    %59 = vector.shape_cast %58 : vector<1x1x1x8xf32> to vector<1x8xf32>
    %60 = vector.broadcast %59 : vector<1x8xf32> to vector<16x8xf32>
    %61 = arith.addf %51, %60 : vector<16x8xf32>
    %cst_39 = arith.constant 0.353553385 : f32
    %62 = vector.broadcast %cst_39 : f32 to vector<16x8xf32>
    %63 = arith.mulf %61, %62 : vector<16x8xf32>
    %c0_40 = arith.constant 0 : index
    %c4_41 = arith.constant 4 : index
    %c0_42 = arith.constant 0 : index
    %c0_43 = arith.constant 0 : index
    %64 = vector.load %arg8[%c0_40, %c4_41, %c0_42, %c0_43] : memref<2x12x1x8xf32, #tpu.memory_space<vmem>>, vector<1x1x1x8xf32>
    %65 = vector.shape_cast %64 : vector<1x1x1x8xf32> to vector<1x8xf32>
    %66 = vector.broadcast %65 : vector<1x8xf32> to vector<16x8xf32>
    %67 = arith.addf %54, %66 : vector<16x8xf32>
    %c0_44 = arith.constant 0 : index
    %c8_45 = arith.constant 8 : index
    %c0_46 = arith.constant 0 : index
    %c0_47 = arith.constant 0 : index
    %68 = vector.load %arg8[%c0_44, %c8_45, %c0_46, %c0_47] : memref<2x12x1x8xf32, #tpu.memory_space<vmem>>, vector<1x1x1x8xf32>
    %69 = vector.shape_cast %68 : vector<1x1x1x8xf32> to vector<1x8xf32>
    %70 = vector.broadcast %69 : vector<1x8xf32> to vector<16x8xf32>
    %71 = arith.addf %57, %70 : vector<16x8xf32>
    %72 = vector.shape_cast %63 : vector<16x8xf32> to vector<2x8x8xf32>
    %73 = arith.truncf %72 : vector<2x8x8xf32> to vector<2x8x8xbf16>
    %74 = vector.shape_cast %67 : vector<16x8xf32> to vector<2x8x8xf32>
    %75 = arith.truncf %74 : vector<2x8x8xf32> to vector<2x8x8xbf16>
    %76 = vector.shape_cast %71 : vector<16x8xf32> to vector<2x8x8xf32>
    %77 = arith.truncf %76 : vector<2x8x8xf32> to vector<2x8x8xbf16>
    "tpu.trace_start"() <{level = 10 : i32, message = "bqd,bkd->bqk"}> : () -> ()
    %cst_48 = arith.constant dense<0.000000e+00> : vector<2x8x8xf32>
    %78 = tpu.matmul %73, %75, %cst_48 {dimension_numbers = #tpu.dot_dimension_numbers<[2], [2], [1], [1], [0, 0, 0, 1, 1, 1], [0], [0]>} : vector<2x8x8xbf16>, vector<2x8x8xbf16>, vector<2x8x8xf32> -> vector<2x8x8xf32>
    "tpu.trace_stop"() : () -> ()
    %79 = arith.addf %78, %46 : vector<2x8x8xf32>
    %cst_49 = arith.constant dense<0xFF800000> : vector<2x8xf32>
    %80 = vector.multi_reduction <maximumf>, %79, %cst_49 [2] : vector<2x8x8xf32> to vector<2x8xf32>
    %81 = vector.shape_cast %80 : vector<2x8xf32> to vector<2x8x1xf32>
    %82 = vector.broadcast %81 : vector<2x8x1xf32> to vector<2x8x8xf32>
    %83 = arith.subf %79, %82 : vector<2x8x8xf32>
    %84 = math.exp %83 : vector<2x8x8xf32>
    %cst_50 = arith.constant dense<0.000000e+00> : vector<2x8xf32>
    %85 = vector.multi_reduction <add>, %84, %cst_50 [2] : vector<2x8x8xf32> to vector<2x8xf32>
    %86 = vector.shape_cast %85 : vector<2x8xf32> to vector<2x8x1xf32>
    %87 = vector.broadcast %86 : vector<2x8x1xf32> to vector<2x8x8xf32>
    %88 = arith.divf %84, %87 : vector<2x8x8xf32>
    %89 = arith.truncf %88 : vector<2x8x8xf32> to vector<2x8x8xbf16>
    "tpu.trace_start"() <{level = 10 : i32, message = "bqk,bkd->bqd"}> : () -> ()
    %cst_51 = arith.constant dense<0.000000e+00> : vector<2x8x8xf32>
    %90 = tpu.matmul %89, %77, %cst_51 {dimension_numbers = #tpu.dot_dimension_numbers<[2], [1], [1], [2], [0, 0, 0, 1, 1, 2], [0], [0]>} : vector<2x8x8xbf16>, vector<2x8x8xbf16>, vector<2x8x8xf32> -> vector<2x8x8xf32>
    "tpu.trace_stop"() : () -> ()
    %91 = vector.shape_cast %90 : vector<2x8x8xf32> to vector<16x8xf32>
    %92 = arith.truncf %91 : vector<16x8xf32> to vector<16x8xbf16>
    %c0_52 = arith.constant 0 : index
    %c0_53 = arith.constant 0 : index
    %c0_54 = arith.constant 0 : index
    %c0_55 = arith.constant 0 : index
    %93 = vector.load %arg9[%c0_52, %c0_53, %c0_54, %c0_55] : memref<2x4x8x32xbf16, #tpu.memory_space<vmem>>, vector<1x1x8x32xbf16>
    %94 = vector.shape_cast %93 : vector<1x1x8x32xbf16> to vector<8x32xbf16>
    %cst_56 = arith.constant dense<0.000000e+00> : vector<16x32xf32>
    %95 = tpu.matmul %92, %94, %cst_56 {dimension_numbers = #tpu.dot_dimension_numbers<[1], [0], [0], [1], [0, 0, 1, 1], [], []>} : vector<16x8xbf16>, vector<8x32xbf16>, vector<16x32xf32> -> vector<16x32xf32>
    %96 = arith.addf %48, %95 : vector<16x32xf32>
    %c0_57 = arith.constant 0 : index
    %c1 = arith.constant 1 : index
    %c0_58 = arith.constant 0 : index
    %c0_59 = arith.constant 0 : index
    %97 = vector.load %arg7[%c0_57, %c1, %c0_58, %c0_59] : memref<2x12x32x8xbf16, #tpu.memory_space<vmem>>, vector<1x1x32x8xbf16>
    %98 = vector.shape_cast %97 : vector<1x1x32x8xbf16> to vector<32x8xbf16>
    %cst_60 = arith.constant dense<0.000000e+00> : vector<16x8xf32>
    %99 = tpu.matmul %47, %98, %cst_60 {dimension_numbers = #tpu.dot_dimension_numbers<[1], [0], [0], [1], [0, 0, 1, 1], [], []>} : vector<16x32xbf16>, vector<32x8xbf16>, vector<16x8xf32> -> vector<16x8xf32>
    %c0_61 = arith.constant 0 : index
    %c5 = arith.constant 5 : index
    %c0_62 = arith.constant 0 : index
    %c0_63 = arith.constant 0 : index
    %100 = vector.load %arg7[%c0_61, %c5, %c0_62, %c0_63] : memref<2x12x32x8xbf16, #tpu.memory_space<vmem>>, vector<1x1x32x8xbf16>
    %101 = vector.shape_cast %100 : vector<1x1x32x8xbf16> to vector<32x8xbf16>
    %cst_64 = arith.constant dense<0.000000e+00> : vector<16x8xf32>
    %102 = tpu.matmul %47, %101, %cst_64 {dimension_numbers = #tpu.dot_dimension_numbers<[1], [0], [0], [1], [0, 0, 1, 1], [], []>} : vector<16x32xbf16>, vector<32x8xbf16>, vector<16x8xf32> -> vector<16x8xf32>
    %c0_65 = arith.constant 0 : index
    %c9 = arith.constant 9 : index
    %c0_66 = arith.constant 0 : index
    %c0_67 = arith.constant 0 : index
    %103 = vector.load %arg7[%c0_65, %c9, %c0_66, %c0_67] : memref<2x12x32x8xbf16, #tpu.memory_space<vmem>>, vector<1x1x32x8xbf16>
    %104 = vector.shape_cast %103 : vector<1x1x32x8xbf16> to vector<32x8xbf16>
    %cst_68 = arith.constant dense<0.000000e+00> : vector<16x8xf32>
    %105 = tpu.matmul %47, %104, %cst_68 {dimension_numbers = #tpu.dot_dimension_numbers<[1], [0], [0], [1], [0, 0, 1, 1], [], []>} : vector<16x32xbf16>, vector<32x8xbf16>, vector<16x8xf32> -> vector<16x8xf32>
    %c0_69 = arith.constant 0 : index
    %c1_70 = arith.constant 1 : index
    %c0_71 = arith.constant 0 : index
    %c0_72 = arith.constant 0 : index
    %106 = vector.load %arg8[%c0_69, %c1_70, %c0_71, %c0_72] : memref<2x12x1x8xf32, #tpu.memory_space<vmem>>, vector<1x1x1x8xf32>
    %107 = vector.shape_cast %106 : vector<1x1x1x8xf32> to vector<1x8xf32>
    %108 = vector.broadcast %107 : vector<1x8xf32> to vector<16x8xf32>
    %109 = arith.addf %99, %108 : vector<16x8xf32>
    %cst_73 = arith.constant 0.353553385 : f32
    %110 = vector.broadcast %cst_73 : f32 to vector<16x8xf32>
    %111 = arith.mulf %109, %110 : vector<16x8xf32>
    %c0_74 = arith.constant 0 : index
    %c5_75 = arith.constant 5 : index
    %c0_76 = arith.constant 0 : index
    %c0_77 = arith.constant 0 : index
    %112 = vector.load %arg8[%c0_74, %c5_75, %c0_76, %c0_77] : memref<2x12x1x8xf32, #tpu.memory_space<vmem>>, vector<1x1x1x8xf32>
    %113 = vector.shape_cast %112 : vector<1x1x1x8xf32> to vector<1x8xf32>
    %114 = vector.broadcast %113 : vector<1x8xf32> to vector<16x8xf32>
    %115 = arith.addf %102, %114 : vector<16x8xf32>
    %c0_78 = arith.constant 0 : index
    %c9_79 = arith.constant 9 : index
    %c0_80 = arith.constant 0 : index
    %c0_81 = arith.constant 0 : index
    %116 = vector.load %arg8[%c0_78, %c9_79, %c0_80, %c0_81] : memref<2x12x1x8xf32, #tpu.memory_space<vmem>>, vector<1x1x1x8xf32>
    %117 = vector.shape_cast %116 : vector<1x1x1x8xf32> to vector<1x8xf32>
    %118 = vector.broadcast %117 : vector<1x8xf32> to vector<16x8xf32>
    %119 = arith.addf %105, %118 : vector<16x8xf32>
    %120 = vector.shape_cast %111 : vector<16x8xf32> to vector<2x8x8xf32>
    %121 = arith.truncf %120 : vector<2x8x8xf32> to vector<2x8x8xbf16>
    %122 = vector.shape_cast %115 : vector<16x8xf32> to vector<2x8x8xf32>
    %123 = arith.truncf %122 : vector<2x8x8xf32> to vector<2x8x8xbf16>
    %124 = vector.shape_cast %119 : vector<16x8xf32> to vector<2x8x8xf32>
    %125 = arith.truncf %124 : vector<2x8x8xf32> to vector<2x8x8xbf16>
    "tpu.trace_start"() <{level = 10 : i32, message = "bqd,bkd->bqk"}> : () -> ()
    %cst_82 = arith.constant dense<0.000000e+00> : vector<2x8x8xf32>
    %126 = tpu.matmul %121, %123, %cst_82 {dimension_numbers = #tpu.dot_dimension_numbers<[2], [2], [1], [1], [0, 0, 0, 1, 1, 1], [0], [0]>} : vector<2x8x8xbf16>, vector<2x8x8xbf16>, vector<2x8x8xf32> -> vector<2x8x8xf32>
    "tpu.trace_stop"() : () -> ()
    %127 = arith.addf %126, %46 : vector<2x8x8xf32>
    %cst_83 = arith.constant dense<0xFF800000> : vector<2x8xf32>
    %128 = vector.multi_reduction <maximumf>, %127, %cst_83 [2] : vector<2x8x8xf32> to vector<2x8xf32>
    %129 = vector.shape_cast %128 : vector<2x8xf32> to vector<2x8x1xf32>
    %130 = vector.broadcast %129 : vector<2x8x1xf32> to vector<2x8x8xf32>
    %131 = arith.subf %127, %130 : vector<2x8x8xf32>
    %132 = math.exp %131 : vector<2x8x8xf32>
    %cst_84 = arith.constant dense<0.000000e+00> : vector<2x8xf32>
    %133 = vector.multi_reduction <add>, %132, %cst_84 [2] : vector<2x8x8xf32> to vector<2x8xf32>
    %134 = vector.shape_cast %133 : vector<2x8xf32> to vector<2x8x1xf32>
    %135 = vector.broadcast %134 : vector<2x8x1xf32> to vector<2x8x8xf32>
    %136 = arith.divf %132, %135 : vector<2x8x8xf32>
    %137 = arith.truncf %136 : vector<2x8x8xf32> to vector<2x8x8xbf16>
    "tpu.trace_start"() <{level = 10 : i32, message = "bqk,bkd->bqd"}> : () -> ()
    %cst_85 = arith.constant dense<0.000000e+00> : vector<2x8x8xf32>
    %138 = tpu.matmul %137, %125, %cst_85 {dimension_numbers = #tpu.dot_dimension_numbers<[2], [1], [1], [2], [0, 0, 0, 1, 1, 2], [0], [0]>} : vector<2x8x8xbf16>, vector<2x8x8xbf16>, vector<2x8x8xf32> -> vector<2x8x8xf32>
    "tpu.trace_stop"() : () -> ()
    %139 = vector.shape_cast %138 : vector<2x8x8xf32> to vector<16x8xf32>
    %140 = arith.truncf %139 : vector<16x8xf32> to vector<16x8xbf16>
    %c0_86 = arith.constant 0 : index
    %c1_87 = arith.constant 1 : index
    %c0_88 = arith.constant 0 : index
    %c0_89 = arith.constant 0 : index
    %141 = vector.load %arg9[%c0_86, %c1_87, %c0_88, %c0_89] : memref<2x4x8x32xbf16, #tpu.memory_space<vmem>>, vector<1x1x8x32xbf16>
    %142 = vector.shape_cast %141 : vector<1x1x8x32xbf16> to vector<8x32xbf16>
    %cst_90 = arith.constant dense<0.000000e+00> : vector<16x32xf32>
    %143 = tpu.matmul %140, %142, %cst_90 {dimension_numbers = #tpu.dot_dimension_numbers<[1], [0], [0], [1], [0, 0, 1, 1], [], []>} : vector<16x8xbf16>, vector<8x32xbf16>, vector<16x32xf32> -> vector<16x32xf32>
    %144 = arith.addf %96, %143 : vector<16x32xf32>
    %c0_91 = arith.constant 0 : index
    %c2 = arith.constant 2 : index
    %c0_92 = arith.constant 0 : index
    %c0_93 = arith.constant 0 : index
    %145 = vector.load %arg7[%c0_91, %c2, %c0_92, %c0_93] : memref<2x12x32x8xbf16, #tpu.memory_space<vmem>>, vector<1x1x32x8xbf16>
    %146 = vector.shape_cast %145 : vector<1x1x32x8xbf16> to vector<32x8xbf16>
    %cst_94 = arith.constant dense<0.000000e+00> : vector<16x8xf32>
    %147 = tpu.matmul %47, %146, %cst_94 {dimension_numbers = #tpu.dot_dimension_numbers<[1], [0], [0], [1], [0, 0, 1, 1], [], []>} : vector<16x32xbf16>, vector<32x8xbf16>, vector<16x8xf32> -> vector<16x8xf32>
    %c0_95 = arith.constant 0 : index
    %c6 = arith.constant 6 : index
    %c0_96 = arith.constant 0 : index
    %c0_97 = arith.constant 0 : index
    %148 = vector.load %arg7[%c0_95, %c6, %c0_96, %c0_97] : memref<2x12x32x8xbf16, #tpu.memory_space<vmem>>, vector<1x1x32x8xbf16>
    %149 = vector.shape_cast %148 : vector<1x1x32x8xbf16> to vector<32x8xbf16>
    %cst_98 = arith.constant dense<0.000000e+00> : vector<16x8xf32>
    %150 = tpu.matmul %47, %149, %cst_98 {dimension_numbers = #tpu.dot_dimension_numbers<[1], [0], [0], [1], [0, 0, 1, 1], [], []>} : vector<16x32xbf16>, vector<32x8xbf16>, vector<16x8xf32> -> vector<16x8xf32>
    %c0_99 = arith.constant 0 : index
    %c10 = arith.constant 10 : index
    %c0_100 = arith.constant 0 : index
    %c0_101 = arith.constant 0 : index
    %151 = vector.load %arg7[%c0_99, %c10, %c0_100, %c0_101] : memref<2x12x32x8xbf16, #tpu.memory_space<vmem>>, vector<1x1x32x8xbf16>
    %152 = vector.shape_cast %151 : vector<1x1x32x8xbf16> to vector<32x8xbf16>
    %cst_102 = arith.constant dense<0.000000e+00> : vector<16x8xf32>
    %153 = tpu.matmul %47, %152, %cst_102 {dimension_numbers = #tpu.dot_dimension_numbers<[1], [0], [0], [1], [0, 0, 1, 1], [], []>} : vector<16x32xbf16>, vector<32x8xbf16>, vector<16x8xf32> -> vector<16x8xf32>
    %c0_103 = arith.constant 0 : index
    %c2_104 = arith.constant 2 : index
    %c0_105 = arith.constant 0 : index
    %c0_106 = arith.constant 0 : index
    %154 = vector.load %arg8[%c0_103, %c2_104, %c0_105, %c0_106] : memref<2x12x1x8xf32, #tpu.memory_space<vmem>>, vector<1x1x1x8xf32>
    %155 = vector.shape_cast %154 : vector<1x1x1x8xf32> to vector<1x8xf32>
    %156 = vector.broadcast %155 : vector<1x8xf32> to vector<16x8xf32>
    %157 = arith.addf %147, %156 : vector<16x8xf32>
    %cst_107 = arith.constant 0.353553385 : f32
    %158 = vector.broadcast %cst_107 : f32 to vector<16x8xf32>
    %159 = arith.mulf %157, %158 : vector<16x8xf32>
    %c0_108 = arith.constant 0 : index
    %c6_109 = arith.constant 6 : index
    %c0_110 = arith.constant 0 : index
    %c0_111 = arith.constant 0 : index
    %160 = vector.load %arg8[%c0_108, %c6_109, %c0_110, %c0_111] : memref<2x12x1x8xf32, #tpu.memory_space<vmem>>, vector<1x1x1x8xf32>
    %161 = vector.shape_cast %160 : vector<1x1x1x8xf32> to vector<1x8xf32>
    %162 = vector.broadcast %161 : vector<1x8xf32> to vector<16x8xf32>
    %163 = arith.addf %150, %162 : vector<16x8xf32>
    %c0_112 = arith.constant 0 : index
    %c10_113 = arith.constant 10 : index
    %c0_114 = arith.constant 0 : index
    %c0_115 = arith.constant 0 : index
    %164 = vector.load %arg8[%c0_112, %c10_113, %c0_114, %c0_115] : memref<2x12x1x8xf32, #tpu.memory_space<vmem>>, vector<1x1x1x8xf32>
    %165 = vector.shape_cast %164 : vector<1x1x1x8xf32> to vector<1x8xf32>
    %166 = vector.broadcast %165 : vector<1x8xf32> to vector<16x8xf32>
    %167 = arith.addf %153, %166 : vector<16x8xf32>
    %168 = vector.shape_cast %159 : vector<16x8xf32> to vector<2x8x8xf32>
    %169 = arith.truncf %168 : vector<2x8x8xf32> to vector<2x8x8xbf16>
    %170 = vector.shape_cast %163 : vector<16x8xf32> to vector<2x8x8xf32>
    %171 = arith.truncf %170 : vector<2x8x8xf32> to vector<2x8x8xbf16>
    %172 = vector.shape_cast %167 : vector<16x8xf32> to vector<2x8x8xf32>
    %173 = arith.truncf %172 : vector<2x8x8xf32> to vector<2x8x8xbf16>
    "tpu.trace_start"() <{level = 10 : i32, message = "bqd,bkd->bqk"}> : () -> ()
    %cst_116 = arith.constant dense<0.000000e+00> : vector<2x8x8xf32>
    %174 = tpu.matmul %169, %171, %cst_116 {dimension_numbers = #tpu.dot_dimension_numbers<[2], [2], [1], [1], [0, 0, 0, 1, 1, 1], [0], [0]>} : vector<2x8x8xbf16>, vector<2x8x8xbf16>, vector<2x8x8xf32> -> vector<2x8x8xf32>
    "tpu.trace_stop"() : () -> ()
    %175 = arith.addf %174, %46 : vector<2x8x8xf32>
    %cst_117 = arith.constant dense<0xFF800000> : vector<2x8xf32>
    %176 = vector.multi_reduction <maximumf>, %175, %cst_117 [2] : vector<2x8x8xf32> to vector<2x8xf32>
    %177 = vector.shape_cast %176 : vector<2x8xf32> to vector<2x8x1xf32>
    %178 = vector.broadcast %177 : vector<2x8x1xf32> to vector<2x8x8xf32>
    %179 = arith.subf %175, %178 : vector<2x8x8xf32>
    %180 = math.exp %179 : vector<2x8x8xf32>
    %cst_118 = arith.constant dense<0.000000e+00> : vector<2x8xf32>
    %181 = vector.multi_reduction <add>, %180, %cst_118 [2] : vector<2x8x8xf32> to vector<2x8xf32>
    %182 = vector.shape_cast %181 : vector<2x8xf32> to vector<2x8x1xf32>
    %183 = vector.broadcast %182 : vector<2x8x1xf32> to vector<2x8x8xf32>
    %184 = arith.divf %180, %183 : vector<2x8x8xf32>
    %185 = arith.truncf %184 : vector<2x8x8xf32> to vector<2x8x8xbf16>
    "tpu.trace_start"() <{level = 10 : i32, message = "bqk,bkd->bqd"}> : () -> ()
    %cst_119 = arith.constant dense<0.000000e+00> : vector<2x8x8xf32>
    %186 = tpu.matmul %185, %173, %cst_119 {dimension_numbers = #tpu.dot_dimension_numbers<[2], [1], [1], [2], [0, 0, 0, 1, 1, 2], [0], [0]>} : vector<2x8x8xbf16>, vector<2x8x8xbf16>, vector<2x8x8xf32> -> vector<2x8x8xf32>
    "tpu.trace_stop"() : () -> ()
    %187 = vector.shape_cast %186 : vector<2x8x8xf32> to vector<16x8xf32>
    %188 = arith.truncf %187 : vector<16x8xf32> to vector<16x8xbf16>
    %c0_120 = arith.constant 0 : index
    %c2_121 = arith.constant 2 : index
    %c0_122 = arith.constant 0 : index
    %c0_123 = arith.constant 0 : index
    %189 = vector.load %arg9[%c0_120, %c2_121, %c0_122, %c0_123] : memref<2x4x8x32xbf16, #tpu.memory_space<vmem>>, vector<1x1x8x32xbf16>
    %190 = vector.shape_cast %189 : vector<1x1x8x32xbf16> to vector<8x32xbf16>
    %cst_124 = arith.constant dense<0.000000e+00> : vector<16x32xf32>
    %191 = tpu.matmul %188, %190, %cst_124 {dimension_numbers = #tpu.dot_dimension_numbers<[1], [0], [0], [1], [0, 0, 1, 1], [], []>} : vector<16x8xbf16>, vector<8x32xbf16>, vector<16x32xf32> -> vector<16x32xf32>
    %192 = arith.addf %144, %191 : vector<16x32xf32>
    %c0_125 = arith.constant 0 : index
    %c3 = arith.constant 3 : index
    %c0_126 = arith.constant 0 : index
    %c0_127 = arith.constant 0 : index
    %193 = vector.load %arg7[%c0_125, %c3, %c0_126, %c0_127] : memref<2x12x32x8xbf16, #tpu.memory_space<vmem>>, vector<1x1x32x8xbf16>
    %194 = vector.shape_cast %193 : vector<1x1x32x8xbf16> to vector<32x8xbf16>
    %cst_128 = arith.constant dense<0.000000e+00> : vector<16x8xf32>
    %195 = tpu.matmul %47, %194, %cst_128 {dimension_numbers = #tpu.dot_dimension_numbers<[1], [0], [0], [1], [0, 0, 1, 1], [], []>} : vector<16x32xbf16>, vector<32x8xbf16>, vector<16x8xf32> -> vector<16x8xf32>
    %c0_129 = arith.constant 0 : index
    %c7 = arith.constant 7 : index
    %c0_130 = arith.constant 0 : index
    %c0_131 = arith.constant 0 : index
    %196 = vector.load %arg7[%c0_129, %c7, %c0_130, %c0_131] : memref<2x12x32x8xbf16, #tpu.memory_space<vmem>>, vector<1x1x32x8xbf16>
    %197 = vector.shape_cast %196 : vector<1x1x32x8xbf16> to vector<32x8xbf16>
    %cst_132 = arith.constant dense<0.000000e+00> : vector<16x8xf32>
    %198 = tpu.matmul %47, %197, %cst_132 {dimension_numbers = #tpu.dot_dimension_numbers<[1], [0], [0], [1], [0, 0, 1, 1], [], []>} : vector<16x32xbf16>, vector<32x8xbf16>, vector<16x8xf32> -> vector<16x8xf32>
    %c0_133 = arith.constant 0 : index
    %c11 = arith.constant 11 : index
    %c0_134 = arith.constant 0 : index
    %c0_135 = arith.constant 0 : index
    %199 = vector.load %arg7[%c0_133, %c11, %c0_134, %c0_135] : memref<2x12x32x8xbf16, #tpu.memory_space<vmem>>, vector<1x1x32x8xbf16>
    %200 = vector.shape_cast %199 : vector<1x1x32x8xbf16> to vector<32x8xbf16>
    %cst_136 = arith.constant dense<0.000000e+00> : vector<16x8xf32>
    %201 = tpu.matmul %47, %200, %cst_136 {dimension_numbers = #tpu.dot_dimension_numbers<[1], [0], [0], [1], [0, 0, 1, 1], [], []>} : vector<16x32xbf16>, vector<32x8xbf16>, vector<16x8xf32> -> vector<16x8xf32>
    %c0_137 = arith.constant 0 : index
    %c3_138 = arith.constant 3 : index
    %c0_139 = arith.constant 0 : index
    %c0_140 = arith.constant 0 : index
    %202 = vector.load %arg8[%c0_137, %c3_138, %c0_139, %c0_140] : memref<2x12x1x8xf32, #tpu.memory_space<vmem>>, vector<1x1x1x8xf32>
    %203 = vector.shape_cast %202 : vector<1x1x1x8xf32> to vector<1x8xf32>
    %204 = vector.broadcast %203 : vector<1x8xf32> to vector<16x8xf32>
    %205 = arith.addf %195, %204 : vector<16x8xf32>
    %cst_141 = arith.constant 0.353553385 : f32
    %206 = vector.broadcast %cst_141 : f32 to vector<16x8xf32>
    %207 = arith.mulf %205, %206 : vector<16x8xf32>
    %c0_142 = arith.constant 0 : index
    %c7_143 = arith.constant 7 : index
    %c0_144 = arith.constant 0 : index
    %c0_145 = arith.constant 0 : index
    %208 = vector.load %arg8[%c0_142, %c7_143, %c0_144, %c0_145] : memref<2x12x1x8xf32, #tpu.memory_space<vmem>>, vector<1x1x1x8xf32>
    %209 = vector.shape_cast %208 : vector<1x1x1x8xf32> to vector<1x8xf32>
    %210 = vector.broadcast %209 : vector<1x8xf32> to vector<16x8xf32>
    %211 = arith.addf %198, %210 : vector<16x8xf32>
    %c0_146 = arith.constant 0 : index
    %c11_147 = arith.constant 11 : index
    %c0_148 = arith.constant 0 : index
    %c0_149 = arith.constant 0 : index
    %212 = vector.load %arg8[%c0_146, %c11_147, %c0_148, %c0_149] : memref<2x12x1x8xf32, #tpu.memory_space<vmem>>, vector<1x1x1x8xf32>
    %213 = vector.shape_cast %212 : vector<1x1x1x8xf32> to vector<1x8xf32>
    %214 = vector.broadcast %213 : vector<1x8xf32> to vector<16x8xf32>
    %215 = arith.addf %201, %214 : vector<16x8xf32>
    %216 = vector.shape_cast %207 : vector<16x8xf32> to vector<2x8x8xf32>
    %217 = arith.truncf %216 : vector<2x8x8xf32> to vector<2x8x8xbf16>
    %218 = vector.shape_cast %211 : vector<16x8xf32> to vector<2x8x8xf32>
    %219 = arith.truncf %218 : vector<2x8x8xf32> to vector<2x8x8xbf16>
    %220 = vector.shape_cast %215 : vector<16x8xf32> to vector<2x8x8xf32>
    %221 = arith.truncf %220 : vector<2x8x8xf32> to vector<2x8x8xbf16>
    "tpu.trace_start"() <{level = 10 : i32, message = "bqd,bkd->bqk"}> : () -> ()
    %cst_150 = arith.constant dense<0.000000e+00> : vector<2x8x8xf32>
    %222 = tpu.matmul %217, %219, %cst_150 {dimension_numbers = #tpu.dot_dimension_numbers<[2], [2], [1], [1], [0, 0, 0, 1, 1, 1], [0], [0]>} : vector<2x8x8xbf16>, vector<2x8x8xbf16>, vector<2x8x8xf32> -> vector<2x8x8xf32>
    "tpu.trace_stop"() : () -> ()
    %223 = arith.addf %222, %46 : vector<2x8x8xf32>
    %cst_151 = arith.constant dense<0xFF800000> : vector<2x8xf32>
    %224 = vector.multi_reduction <maximumf>, %223, %cst_151 [2] : vector<2x8x8xf32> to vector<2x8xf32>
    %225 = vector.shape_cast %224 : vector<2x8xf32> to vector<2x8x1xf32>
    %226 = vector.broadcast %225 : vector<2x8x1xf32> to vector<2x8x8xf32>
    %227 = arith.subf %223, %226 : vector<2x8x8xf32>
    %228 = math.exp %227 : vector<2x8x8xf32>
    %cst_152 = arith.constant dense<0.000000e+00> : vector<2x8xf32>
    %229 = vector.multi_reduction <add>, %228, %cst_152 [2] : vector<2x8x8xf32> to vector<2x8xf32>
    %230 = vector.shape_cast %229 : vector<2x8xf32> to vector<2x8x1xf32>
    %231 = vector.broadcast %230 : vector<2x8x1xf32> to vector<2x8x8xf32>
    %232 = arith.divf %228, %231 : vector<2x8x8xf32>
    %233 = arith.truncf %232 : vector<2x8x8xf32> to vector<2x8x8xbf16>
    "tpu.trace_start"() <{level = 10 : i32, message = "bqk,bkd->bqd"}> : () -> ()
    %cst_153 = arith.constant dense<0.000000e+00> : vector<2x8x8xf32>
    %234 = tpu.matmul %233, %221, %cst_153 {dimension_numbers = #tpu.dot_dimension_numbers<[2], [1], [1], [2], [0, 0, 0, 1, 1, 2], [0], [0]>} : vector<2x8x8xbf16>, vector<2x8x8xbf16>, vector<2x8x8xf32> -> vector<2x8x8xf32>
    "tpu.trace_stop"() : () -> ()
    %235 = vector.shape_cast %234 : vector<2x8x8xf32> to vector<16x8xf32>
    %236 = arith.truncf %235 : vector<16x8xf32> to vector<16x8xbf16>
    %c0_154 = arith.constant 0 : index
    %c3_155 = arith.constant 3 : index
    %c0_156 = arith.constant 0 : index
    %c0_157 = arith.constant 0 : index
    %237 = vector.load %arg9[%c0_154, %c3_155, %c0_156, %c0_157] : memref<2x4x8x32xbf16, #tpu.memory_space<vmem>>, vector<1x1x8x32xbf16>
    %238 = vector.shape_cast %237 : vector<1x1x8x32xbf16> to vector<8x32xbf16>
    %cst_158 = arith.constant dense<0.000000e+00> : vector<16x32xf32>
    %239 = tpu.matmul %236, %238, %cst_158 {dimension_numbers = #tpu.dot_dimension_numbers<[1], [0], [0], [1], [0, 0, 1, 1], [], []>} : vector<16x8xbf16>, vector<8x32xbf16>, vector<16x32xf32> -> vector<16x32xf32>
    %240 = arith.addf %192, %239 : vector<16x32xf32>
    %c0_159 = arith.constant 0 : index
    %c0_160 = arith.constant 0 : index
    %c0_161 = arith.constant 0 : index
    %241 = vector.load %arg10[%c0_159, %c0_160, %c0_161] : memref<2x1x32xf32, #tpu.memory_space<vmem>>, vector<1x1x32xf32>
    %242 = vector.shape_cast %241 : vector<1x1x32xf32> to vector<1x32xf32>
    %243 = vector.broadcast %242 : vector<1x32xf32> to vector<16x32xf32>
    %244 = arith.addf %240, %243 : vector<16x32xf32>
    %245 = arith.addf %244, %38 : vector<16x32xf32>
    %c0_162 = arith.constant 0 : index
    %c0_163 = arith.constant 0 : index
    %c0_164 = arith.constant 0 : index
    %246 = vector.load %arg11[%c0_162, %c0_163, %c0_164] : memref<2x1x32xf32, #tpu.memory_space<vmem>>, vector<1x1x32xf32>
    %247 = vector.shape_cast %246 : vector<1x1x32xf32> to vector<1x32xf32>
    %c0_165 = arith.constant 0 : index
    %c0_166 = arith.constant 0 : index
    %c0_167 = arith.constant 0 : index
    %248 = vector.load %arg12[%c0_165, %c0_166, %c0_167] : memref<2x1x32xf32, #tpu.memory_space<vmem>>, vector<1x1x32xf32>
    %249 = vector.shape_cast %248 : vector<1x1x32xf32> to vector<1x32xf32>
    %cst_168 = arith.constant dense<0.000000e+00> : vector<16xf32>
    %250 = vector.multi_reduction <add>, %245, %cst_168 [1] : vector<16x32xf32> to vector<16xf32>
    %251 = vector.shape_cast %250 : vector<16xf32> to vector<16x1xf32>
    %cst_169 = arith.constant 3.200000e+01 : f32
    %252 = vector.broadcast %cst_169 : f32 to vector<16x1xf32>
    %253 = arith.divf %251, %252 : vector<16x1xf32>
    %254 = vector.broadcast %253 : vector<16x1xf32> to vector<16x32xf32>
    %255 = arith.subf %245, %254 : vector<16x32xf32>
    %256 = arith.mulf %255, %255 : vector<16x32xf32>
    %cst_170 = arith.constant dense<0.000000e+00> : vector<16xf32>
    %257 = vector.multi_reduction <add>, %256, %cst_170 [1] : vector<16x32xf32> to vector<16xf32>
    %258 = vector.shape_cast %257 : vector<16xf32> to vector<16x1xf32>
    %cst_171 = arith.constant 3.200000e+01 : f32
    %259 = vector.broadcast %cst_171 : f32 to vector<16x1xf32>
    %260 = arith.divf %258, %259 : vector<16x1xf32>
    %cst_172 = arith.constant 9.99999974E-6 : f32
    %261 = vector.broadcast %cst_172 : f32 to vector<16x1xf32>
    %262 = arith.addf %260, %261 : vector<16x1xf32>
    %263 = math.rsqrt %262 : vector<16x1xf32>
    %264 = vector.broadcast %263 : vector<16x1xf32> to vector<16x32xf32>
    %265 = arith.mulf %255, %264 : vector<16x32xf32>
    %266 = vector.broadcast %247 : vector<1x32xf32> to vector<16x32xf32>
    %267 = arith.mulf %265, %266 : vector<16x32xf32>
    %268 = vector.broadcast %249 : vector<1x32xf32> to vector<16x32xf32>
    %269 = arith.addf %267, %268 : vector<16x32xf32>
    %c0_173 = arith.constant 0 : index
    %c0_174 = arith.constant 0 : index
    %c0_175 = arith.constant 0 : index
    %270 = vector.load %arg13[%c0_173, %c0_174, %c0_175] : memref<2x32x128xbf16, #tpu.memory_space<vmem>>, vector<1x32x128xbf16>
    %271 = vector.shape_cast %270 : vector<1x32x128xbf16> to vector<32x128xbf16>
    %272 = arith.truncf %269 : vector<16x32xf32> to vector<16x32xbf16>
    %cst_176 = arith.constant dense<0.000000e+00> : vector<16x128xf32>
    %273 = tpu.matmul %272, %271, %cst_176 {dimension_numbers = #tpu.dot_dimension_numbers<[1], [0], [0], [1], [0, 0, 1, 1], [], []>} : vector<16x32xbf16>, vector<32x128xbf16>, vector<16x128xf32> -> vector<16x128xf32>
    %c0_177 = arith.constant 0 : index
    %c0_178 = arith.constant 0 : index
    %c0_179 = arith.constant 0 : index
    %274 = vector.load %arg14[%c0_177, %c0_178, %c0_179] : memref<2x1x128xf32, #tpu.memory_space<vmem>>, vector<1x1x128xf32>
    %275 = vector.shape_cast %274 : vector<1x1x128xf32> to vector<1x128xf32>
    %276 = vector.broadcast %275 : vector<1x128xf32> to vector<16x128xf32>
    %277 = arith.addf %273, %276 : vector<16x128xf32>
    %cst_180 = arith.constant 5.000000e-01 : f32
    %278 = vector.broadcast %cst_180 : f32 to vector<16x128xf32>
    %279 = arith.mulf %278, %277 : vector<16x128xf32>
    %cst_181 = arith.constant 4.471500e-02 : f32
    %280 = vector.broadcast %cst_181 : f32 to vector<16x128xf32>
    %281 = arith.mulf %280, %277 : vector<16x128xf32>
    %282 = arith.mulf %281, %277 : vector<16x128xf32>
    %283 = arith.mulf %282, %277 : vector<16x128xf32>
    %284 = arith.addf %277, %283 : vector<16x128xf32>
    %cst_182 = arith.constant 0.797884583 : f32
    %285 = vector.broadcast %cst_182 : f32 to vector<16x128xf32>
    %286 = arith.mulf %285, %284 : vector<16x128xf32>
    %287 = math.tanh %286 : vector<16x128xf32>
    %cst_183 = arith.constant 1.000000e+00 : f32
    %288 = vector.broadcast %cst_183 : f32 to vector<16x128xf32>
    %289 = arith.addf %288, %287 : vector<16x128xf32>
    %290 = arith.mulf %279, %289 : vector<16x128xf32>
    %c0_184 = arith.constant 0 : index
    %c0_185 = arith.constant 0 : index
    %c0_186 = arith.constant 0 : index
    %291 = vector.load %arg15[%c0_184, %c0_185, %c0_186] : memref<2x128x32xbf16, #tpu.memory_space<vmem>>, vector<1x128x32xbf16>
    %292 = vector.shape_cast %291 : vector<1x128x32xbf16> to vector<128x32xbf16>
    %293 = arith.truncf %290 : vector<16x128xf32> to vector<16x128xbf16>
    %cst_187 = arith.constant dense<0.000000e+00> : vector<16x32xf32>
    %294 = tpu.matmul %293, %292, %cst_187 {dimension_numbers = #tpu.dot_dimension_numbers<[1], [0], [0], [1], [0, 0, 1, 1], [], []>} : vector<16x128xbf16>, vector<128x32xbf16>, vector<16x32xf32> -> vector<16x32xf32>
    %c0_188 = arith.constant 0 : index
    %c0_189 = arith.constant 0 : index
    %c0_190 = arith.constant 0 : index
    %295 = vector.load %arg16[%c0_188, %c0_189, %c0_190] : memref<2x1x32xf32, #tpu.memory_space<vmem>>, vector<1x1x32xf32>
    %296 = vector.shape_cast %295 : vector<1x1x32xf32> to vector<1x32xf32>
    %297 = vector.broadcast %296 : vector<1x32xf32> to vector<16x32xf32>
    %298 = arith.addf %294, %297 : vector<16x32xf32>
    %299 = arith.addf %298, %269 : vector<16x32xf32>
    %c0_191 = arith.constant 0 : index
    %c0_192 = arith.constant 0 : index
    %c0_193 = arith.constant 0 : index
    %300 = vector.load %arg17[%c0_191, %c0_192, %c0_193] : memref<2x1x32xf32, #tpu.memory_space<vmem>>, vector<1x1x32xf32>
    %301 = vector.shape_cast %300 : vector<1x1x32xf32> to vector<1x32xf32>
    %c0_194 = arith.constant 0 : index
    %c0_195 = arith.constant 0 : index
    %c0_196 = arith.constant 0 : index
    %302 = vector.load %arg18[%c0_194, %c0_195, %c0_196] : memref<2x1x32xf32, #tpu.memory_space<vmem>>, vector<1x1x32xf32>
    %303 = vector.shape_cast %302 : vector<1x1x32xf32> to vector<1x32xf32>
    %cst_197 = arith.constant dense<0.000000e+00> : vector<16xf32>
    %304 = vector.multi_reduction <add>, %299, %cst_197 [1] : vector<16x32xf32> to vector<16xf32>
    %305 = vector.shape_cast %304 : vector<16xf32> to vector<16x1xf32>
    %cst_198 = arith.constant 3.200000e+01 : f32
    %306 = vector.broadcast %cst_198 : f32 to vector<16x1xf32>
    %307 = arith.divf %305, %306 : vector<16x1xf32>
    %308 = vector.broadcast %307 : vector<16x1xf32> to vector<16x32xf32>
    %309 = arith.subf %299, %308 : vector<16x32xf32>
    %310 = arith.mulf %309, %309 : vector<16x32xf32>
    %cst_199 = arith.constant dense<0.000000e+00> : vector<16xf32>
    %311 = vector.multi_reduction <add>, %310, %cst_199 [1] : vector<16x32xf32> to vector<16xf32>
    %312 = vector.shape_cast %311 : vector<16xf32> to vector<16x1xf32>
    %cst_200 = arith.constant 3.200000e+01 : f32
    %313 = vector.broadcast %cst_200 : f32 to vector<16x1xf32>
    %314 = arith.divf %312, %313 : vector<16x1xf32>
    %cst_201 = arith.constant 9.99999974E-6 : f32
    %315 = vector.broadcast %cst_201 : f32 to vector<16x1xf32>
    %316 = arith.addf %314, %315 : vector<16x1xf32>
    %317 = math.rsqrt %316 : vector<16x1xf32>
    %318 = vector.broadcast %317 : vector<16x1xf32> to vector<16x32xf32>
    %319 = arith.mulf %309, %318 : vector<16x32xf32>
    %320 = vector.broadcast %301 : vector<1x32xf32> to vector<16x32xf32>
    %321 = arith.mulf %319, %320 : vector<16x32xf32>
    %322 = vector.broadcast %303 : vector<1x32xf32> to vector<16x32xf32>
    %323 = arith.addf %321, %322 : vector<16x32xf32>
    %324 = arith.truncf %323 : vector<16x32xf32> to vector<16x32xbf16>
    %cst_202 = arith.constant 0.000000e+00 : f32
    %325 = vector.broadcast %cst_202 : f32 to vector<16x32xf32>
    %c1_203 = arith.constant 1 : index
    %c0_204 = arith.constant 0 : index
    %c0_205 = arith.constant 0 : index
    %c0_206 = arith.constant 0 : index
    %326 = vector.load %arg7[%c1_203, %c0_204, %c0_205, %c0_206] : memref<2x12x32x8xbf16, #tpu.memory_space<vmem>>, vector<1x1x32x8xbf16>
    %327 = vector.shape_cast %326 : vector<1x1x32x8xbf16> to vector<32x8xbf16>
    %cst_207 = arith.constant dense<0.000000e+00> : vector<16x8xf32>
    %328 = tpu.matmul %324, %327, %cst_207 {dimension_numbers = #tpu.dot_dimension_numbers<[1], [0], [0], [1], [0, 0, 1, 1], [], []>} : vector<16x32xbf16>, vector<32x8xbf16>, vector<16x8xf32> -> vector<16x8xf32>
    %c1_208 = arith.constant 1 : index
    %c4_209 = arith.constant 4 : index
    %c0_210 = arith.constant 0 : index
    %c0_211 = arith.constant 0 : index
    %329 = vector.load %arg7[%c1_208, %c4_209, %c0_210, %c0_211] : memref<2x12x32x8xbf16, #tpu.memory_space<vmem>>, vector<1x1x32x8xbf16>
    %330 = vector.shape_cast %329 : vector<1x1x32x8xbf16> to vector<32x8xbf16>
    %cst_212 = arith.constant dense<0.000000e+00> : vector<16x8xf32>
    %331 = tpu.matmul %324, %330, %cst_212 {dimension_numbers = #tpu.dot_dimension_numbers<[1], [0], [0], [1], [0, 0, 1, 1], [], []>} : vector<16x32xbf16>, vector<32x8xbf16>, vector<16x8xf32> -> vector<16x8xf32>
    %c1_213 = arith.constant 1 : index
    %c8_214 = arith.constant 8 : index
    %c0_215 = arith.constant 0 : index
    %c0_216 = arith.constant 0 : index
    %332 = vector.load %arg7[%c1_213, %c8_214, %c0_215, %c0_216] : memref<2x12x32x8xbf16, #tpu.memory_space<vmem>>, vector<1x1x32x8xbf16>
    %333 = vector.shape_cast %332 : vector<1x1x32x8xbf16> to vector<32x8xbf16>
    %cst_217 = arith.constant dense<0.000000e+00> : vector<16x8xf32>
    %334 = tpu.matmul %324, %333, %cst_217 {dimension_numbers = #tpu.dot_dimension_numbers<[1], [0], [0], [1], [0, 0, 1, 1], [], []>} : vector<16x32xbf16>, vector<32x8xbf16>, vector<16x8xf32> -> vector<16x8xf32>
    %c1_218 = arith.constant 1 : index
    %c0_219 = arith.constant 0 : index
    %c0_220 = arith.constant 0 : index
    %c0_221 = arith.constant 0 : index
    %335 = vector.load %arg8[%c1_218, %c0_219, %c0_220, %c0_221] : memref<2x12x1x8xf32, #tpu.memory_space<vmem>>, vector<1x1x1x8xf32>
    %336 = vector.shape_cast %335 : vector<1x1x1x8xf32> to vector<1x8xf32>
    %337 = vector.broadcast %336 : vector<1x8xf32> to vector<16x8xf32>
    %338 = arith.addf %328, %337 : vector<16x8xf32>
    %cst_222 = arith.constant 0.353553385 : f32
    %339 = vector.broadcast %cst_222 : f32 to vector<16x8xf32>
    %340 = arith.mulf %338, %339 : vector<16x8xf32>
    %c1_223 = arith.constant 1 : index
    %c4_224 = arith.constant 4 : index
    %c0_225 = arith.constant 0 : index
    %c0_226 = arith.constant 0 : index
    %341 = vector.load %arg8[%c1_223, %c4_224, %c0_225, %c0_226] : memref<2x12x1x8xf32, #tpu.memory_space<vmem>>, vector<1x1x1x8xf32>
    %342 = vector.shape_cast %341 : vector<1x1x1x8xf32> to vector<1x8xf32>
    %343 = vector.broadcast %342 : vector<1x8xf32> to vector<16x8xf32>
    %344 = arith.addf %331, %343 : vector<16x8xf32>
    %c1_227 = arith.constant 1 : index
    %c8_228 = arith.constant 8 : index
    %c0_229 = arith.constant 0 : index
    %c0_230 = arith.constant 0 : index
    %345 = vector.load %arg8[%c1_227, %c8_228, %c0_229, %c0_230] : memref<2x12x1x8xf32, #tpu.memory_space<vmem>>, vector<1x1x1x8xf32>
    %346 = vector.shape_cast %345 : vector<1x1x1x8xf32> to vector<1x8xf32>
    %347 = vector.broadcast %346 : vector<1x8xf32> to vector<16x8xf32>
    %348 = arith.addf %334, %347 : vector<16x8xf32>
    %349 = vector.shape_cast %340 : vector<16x8xf32> to vector<2x8x8xf32>
    %350 = arith.truncf %349 : vector<2x8x8xf32> to vector<2x8x8xbf16>
    %351 = vector.shape_cast %344 : vector<16x8xf32> to vector<2x8x8xf32>
    %352 = arith.truncf %351 : vector<2x8x8xf32> to vector<2x8x8xbf16>
    %353 = vector.shape_cast %348 : vector<16x8xf32> to vector<2x8x8xf32>
    %354 = arith.truncf %353 : vector<2x8x8xf32> to vector<2x8x8xbf16>
    "tpu.trace_start"() <{level = 10 : i32, message = "bqd,bkd->bqk"}> : () -> ()
    %cst_231 = arith.constant dense<0.000000e+00> : vector<2x8x8xf32>
    %355 = tpu.matmul %350, %352, %cst_231 {dimension_numbers = #tpu.dot_dimension_numbers<[2], [2], [1], [1], [0, 0, 0, 1, 1, 1], [0], [0]>} : vector<2x8x8xbf16>, vector<2x8x8xbf16>, vector<2x8x8xf32> -> vector<2x8x8xf32>
    "tpu.trace_stop"() : () -> ()
    %356 = arith.addf %355, %46 : vector<2x8x8xf32>
    %cst_232 = arith.constant dense<0xFF800000> : vector<2x8xf32>
    %357 = vector.multi_reduction <maximumf>, %356, %cst_232 [2] : vector<2x8x8xf32> to vector<2x8xf32>
    %358 = vector.shape_cast %357 : vector<2x8xf32> to vector<2x8x1xf32>
    %359 = vector.broadcast %358 : vector<2x8x1xf32> to vector<2x8x8xf32>
    %360 = arith.subf %356, %359 : vector<2x8x8xf32>
    %361 = math.exp %360 : vector<2x8x8xf32>
    %cst_233 = arith.constant dense<0.000000e+00> : vector<2x8xf32>
    %362 = vector.multi_reduction <add>, %361, %cst_233 [2] : vector<2x8x8xf32> to vector<2x8xf32>
    %363 = vector.shape_cast %362 : vector<2x8xf32> to vector<2x8x1xf32>
    %364 = vector.broadcast %363 : vector<2x8x1xf32> to vector<2x8x8xf32>
    %365 = arith.divf %361, %364 : vector<2x8x8xf32>
    %366 = arith.truncf %365 : vector<2x8x8xf32> to vector<2x8x8xbf16>
    "tpu.trace_start"() <{level = 10 : i32, message = "bqk,bkd->bqd"}> : () -> ()
    %cst_234 = arith.constant dense<0.000000e+00> : vector<2x8x8xf32>
    %367 = tpu.matmul %366, %354, %cst_234 {dimension_numbers = #tpu.dot_dimension_numbers<[2], [1], [1], [2], [0, 0, 0, 1, 1, 2], [0], [0]>} : vector<2x8x8xbf16>, vector<2x8x8xbf16>, vector<2x8x8xf32> -> vector<2x8x8xf32>
    "tpu.trace_stop"() : () -> ()
    %368 = vector.shape_cast %367 : vector<2x8x8xf32> to vector<16x8xf32>
    %369 = arith.truncf %368 : vector<16x8xf32> to vector<16x8xbf16>
    %c1_235 = arith.constant 1 : index
    %c0_236 = arith.constant 0 : index
    %c0_237 = arith.constant 0 : index
    %c0_238 = arith.constant 0 : index
    %370 = vector.load %arg9[%c1_235, %c0_236, %c0_237, %c0_238] : memref<2x4x8x32xbf16, #tpu.memory_space<vmem>>, vector<1x1x8x32xbf16>
    %371 = vector.shape_cast %370 : vector<1x1x8x32xbf16> to vector<8x32xbf16>
    %cst_239 = arith.constant dense<0.000000e+00> : vector<16x32xf32>
    %372 = tpu.matmul %369, %371, %cst_239 {dimension_numbers = #tpu.dot_dimension_numbers<[1], [0], [0], [1], [0, 0, 1, 1], [], []>} : vector<16x8xbf16>, vector<8x32xbf16>, vector<16x32xf32> -> vector<16x32xf32>
    %373 = arith.addf %325, %372 : vector<16x32xf32>
    %c1_240 = arith.constant 1 : index
    %c1_241 = arith.constant 1 : index
    %c0_242 = arith.constant 0 : index
    %c0_243 = arith.constant 0 : index
    %374 = vector.load %arg7[%c1_240, %c1_241, %c0_242, %c0_243] : memref<2x12x32x8xbf16, #tpu.memory_space<vmem>>, vector<1x1x32x8xbf16>
    %375 = vector.shape_cast %374 : vector<1x1x32x8xbf16> to vector<32x8xbf16>
    %cst_244 = arith.constant dense<0.000000e+00> : vector<16x8xf32>
    %376 = tpu.matmul %324, %375, %cst_244 {dimension_numbers = #tpu.dot_dimension_numbers<[1], [0], [0], [1], [0, 0, 1, 1], [], []>} : vector<16x32xbf16>, vector<32x8xbf16>, vector<16x8xf32> -> vector<16x8xf32>
    %c1_245 = arith.constant 1 : index
    %c5_246 = arith.constant 5 : index
    %c0_247 = arith.constant 0 : index
    %c0_248 = arith.constant 0 : index
    %377 = vector.load %arg7[%c1_245, %c5_246, %c0_247, %c0_248] : memref<2x12x32x8xbf16, #tpu.memory_space<vmem>>, vector<1x1x32x8xbf16>
    %378 = vector.shape_cast %377 : vector<1x1x32x8xbf16> to vector<32x8xbf16>
    %cst_249 = arith.constant dense<0.000000e+00> : vector<16x8xf32>
    %379 = tpu.matmul %324, %378, %cst_249 {dimension_numbers = #tpu.dot_dimension_numbers<[1], [0], [0], [1], [0, 0, 1, 1], [], []>} : vector<16x32xbf16>, vector<32x8xbf16>, vector<16x8xf32> -> vector<16x8xf32>
    %c1_250 = arith.constant 1 : index
    %c9_251 = arith.constant 9 : index
    %c0_252 = arith.constant 0 : index
    %c0_253 = arith.constant 0 : index
    %380 = vector.load %arg7[%c1_250, %c9_251, %c0_252, %c0_253] : memref<2x12x32x8xbf16, #tpu.memory_space<vmem>>, vector<1x1x32x8xbf16>
    %381 = vector.shape_cast %380 : vector<1x1x32x8xbf16> to vector<32x8xbf16>
    %cst_254 = arith.constant dense<0.000000e+00> : vector<16x8xf32>
    %382 = tpu.matmul %324, %381, %cst_254 {dimension_numbers = #tpu.dot_dimension_numbers<[1], [0], [0], [1], [0, 0, 1, 1], [], []>} : vector<16x32xbf16>, vector<32x8xbf16>, vector<16x8xf32> -> vector<16x8xf32>
    %c1_255 = arith.constant 1 : index
    %c1_256 = arith.constant 1 : index
    %c0_257 = arith.constant 0 : index
    %c0_258 = arith.constant 0 : index
    %383 = vector.load %arg8[%c1_255, %c1_256, %c0_257, %c0_258] : memref<2x12x1x8xf32, #tpu.memory_space<vmem>>, vector<1x1x1x8xf32>
    %384 = vector.shape_cast %383 : vector<1x1x1x8xf32> to vector<1x8xf32>
    %385 = vector.broadcast %384 : vector<1x8xf32> to vector<16x8xf32>
    %386 = arith.addf %376, %385 : vector<16x8xf32>
    %cst_259 = arith.constant 0.353553385 : f32
    %387 = vector.broadcast %cst_259 : f32 to vector<16x8xf32>
    %388 = arith.mulf %386, %387 : vector<16x8xf32>
    %c1_260 = arith.constant 1 : index
    %c5_261 = arith.constant 5 : index
    %c0_262 = arith.constant 0 : index
    %c0_263 = arith.constant 0 : index
    %389 = vector.load %arg8[%c1_260, %c5_261, %c0_262, %c0_263] : memref<2x12x1x8xf32, #tpu.memory_space<vmem>>, vector<1x1x1x8xf32>
    %390 = vector.shape_cast %389 : vector<1x1x1x8xf32> to vector<1x8xf32>
    %391 = vector.broadcast %390 : vector<1x8xf32> to vector<16x8xf32>
    %392 = arith.addf %379, %391 : vector<16x8xf32>
    %c1_264 = arith.constant 1 : index
    %c9_265 = arith.constant 9 : index
    %c0_266 = arith.constant 0 : index
    %c0_267 = arith.constant 0 : index
    %393 = vector.load %arg8[%c1_264, %c9_265, %c0_266, %c0_267] : memref<2x12x1x8xf32, #tpu.memory_space<vmem>>, vector<1x1x1x8xf32>
    %394 = vector.shape_cast %393 : vector<1x1x1x8xf32> to vector<1x8xf32>
    %395 = vector.broadcast %394 : vector<1x8xf32> to vector<16x8xf32>
    %396 = arith.addf %382, %395 : vector<16x8xf32>
    %397 = vector.shape_cast %388 : vector<16x8xf32> to vector<2x8x8xf32>
    %398 = arith.truncf %397 : vector<2x8x8xf32> to vector<2x8x8xbf16>
    %399 = vector.shape_cast %392 : vector<16x8xf32> to vector<2x8x8xf32>
    %400 = arith.truncf %399 : vector<2x8x8xf32> to vector<2x8x8xbf16>
    %401 = vector.shape_cast %396 : vector<16x8xf32> to vector<2x8x8xf32>
    %402 = arith.truncf %401 : vector<2x8x8xf32> to vector<2x8x8xbf16>
    "tpu.trace_start"() <{level = 10 : i32, message = "bqd,bkd->bqk"}> : () -> ()
    %cst_268 = arith.constant dense<0.000000e+00> : vector<2x8x8xf32>
    %403 = tpu.matmul %398, %400, %cst_268 {dimension_numbers = #tpu.dot_dimension_numbers<[2], [2], [1], [1], [0, 0, 0, 1, 1, 1], [0], [0]>} : vector<2x8x8xbf16>, vector<2x8x8xbf16>, vector<2x8x8xf32> -> vector<2x8x8xf32>
    "tpu.trace_stop"() : () -> ()
    %404 = arith.addf %403, %46 : vector<2x8x8xf32>
    %cst_269 = arith.constant dense<0xFF800000> : vector<2x8xf32>
    %405 = vector.multi_reduction <maximumf>, %404, %cst_269 [2] : vector<2x8x8xf32> to vector<2x8xf32>
    %406 = vector.shape_cast %405 : vector<2x8xf32> to vector<2x8x1xf32>
    %407 = vector.broadcast %406 : vector<2x8x1xf32> to vector<2x8x8xf32>
    %408 = arith.subf %404, %407 : vector<2x8x8xf32>
    %409 = math.exp %408 : vector<2x8x8xf32>
    %cst_270 = arith.constant dense<0.000000e+00> : vector<2x8xf32>
    %410 = vector.multi_reduction <add>, %409, %cst_270 [2] : vector<2x8x8xf32> to vector<2x8xf32>
    %411 = vector.shape_cast %410 : vector<2x8xf32> to vector<2x8x1xf32>
    %412 = vector.broadcast %411 : vector<2x8x1xf32> to vector<2x8x8xf32>
    %413 = arith.divf %409, %412 : vector<2x8x8xf32>
    %414 = arith.truncf %413 : vector<2x8x8xf32> to vector<2x8x8xbf16>
    "tpu.trace_start"() <{level = 10 : i32, message = "bqk,bkd->bqd"}> : () -> ()
    %cst_271 = arith.constant dense<0.000000e+00> : vector<2x8x8xf32>
    %415 = tpu.matmul %414, %402, %cst_271 {dimension_numbers = #tpu.dot_dimension_numbers<[2], [1], [1], [2], [0, 0, 0, 1, 1, 2], [0], [0]>} : vector<2x8x8xbf16>, vector<2x8x8xbf16>, vector<2x8x8xf32> -> vector<2x8x8xf32>
    "tpu.trace_stop"() : () -> ()
    %416 = vector.shape_cast %415 : vector<2x8x8xf32> to vector<16x8xf32>
    %417 = arith.truncf %416 : vector<16x8xf32> to vector<16x8xbf16>
    %c1_272 = arith.constant 1 : index
    %c1_273 = arith.constant 1 : index
    %c0_274 = arith.constant 0 : index
    %c0_275 = arith.constant 0 : index
    %418 = vector.load %arg9[%c1_272, %c1_273, %c0_274, %c0_275] : memref<2x4x8x32xbf16, #tpu.memory_space<vmem>>, vector<1x1x8x32xbf16>
    %419 = vector.shape_cast %418 : vector<1x1x8x32xbf16> to vector<8x32xbf16>
    %cst_276 = arith.constant dense<0.000000e+00> : vector<16x32xf32>
    %420 = tpu.matmul %417, %419, %cst_276 {dimension_numbers = #tpu.dot_dimension_numbers<[1], [0], [0], [1], [0, 0, 1, 1], [], []>} : vector<16x8xbf16>, vector<8x32xbf16>, vector<16x32xf32> -> vector<16x32xf32>
    %421 = arith.addf %373, %420 : vector<16x32xf32>
    %c1_277 = arith.constant 1 : index
    %c2_278 = arith.constant 2 : index
    %c0_279 = arith.constant 0 : index
    %c0_280 = arith.constant 0 : index
    %422 = vector.load %arg7[%c1_277, %c2_278, %c0_279, %c0_280] : memref<2x12x32x8xbf16, #tpu.memory_space<vmem>>, vector<1x1x32x8xbf16>
    %423 = vector.shape_cast %422 : vector<1x1x32x8xbf16> to vector<32x8xbf16>
    %cst_281 = arith.constant dense<0.000000e+00> : vector<16x8xf32>
    %424 = tpu.matmul %324, %423, %cst_281 {dimension_numbers = #tpu.dot_dimension_numbers<[1], [0], [0], [1], [0, 0, 1, 1], [], []>} : vector<16x32xbf16>, vector<32x8xbf16>, vector<16x8xf32> -> vector<16x8xf32>
    %c1_282 = arith.constant 1 : index
    %c6_283 = arith.constant 6 : index
    %c0_284 = arith.constant 0 : index
    %c0_285 = arith.constant 0 : index
    %425 = vector.load %arg7[%c1_282, %c6_283, %c0_284, %c0_285] : memref<2x12x32x8xbf16, #tpu.memory_space<vmem>>, vector<1x1x32x8xbf16>
    %426 = vector.shape_cast %425 : vector<1x1x32x8xbf16> to vector<32x8xbf16>
    %cst_286 = arith.constant dense<0.000000e+00> : vector<16x8xf32>
    %427 = tpu.matmul %324, %426, %cst_286 {dimension_numbers = #tpu.dot_dimension_numbers<[1], [0], [0], [1], [0, 0, 1, 1], [], []>} : vector<16x32xbf16>, vector<32x8xbf16>, vector<16x8xf32> -> vector<16x8xf32>
    %c1_287 = arith.constant 1 : index
    %c10_288 = arith.constant 10 : index
    %c0_289 = arith.constant 0 : index
    %c0_290 = arith.constant 0 : index
    %428 = vector.load %arg7[%c1_287, %c10_288, %c0_289, %c0_290] : memref<2x12x32x8xbf16, #tpu.memory_space<vmem>>, vector<1x1x32x8xbf16>
    %429 = vector.shape_cast %428 : vector<1x1x32x8xbf16> to vector<32x8xbf16>
    %cst_291 = arith.constant dense<0.000000e+00> : vector<16x8xf32>
    %430 = tpu.matmul %324, %429, %cst_291 {dimension_numbers = #tpu.dot_dimension_numbers<[1], [0], [0], [1], [0, 0, 1, 1], [], []>} : vector<16x32xbf16>, vector<32x8xbf16>, vector<16x8xf32> -> vector<16x8xf32>
    %c1_292 = arith.constant 1 : index
    %c2_293 = arith.constant 2 : index
    %c0_294 = arith.constant 0 : index
    %c0_295 = arith.constant 0 : index
    %431 = vector.load %arg8[%c1_292, %c2_293, %c0_294, %c0_295] : memref<2x12x1x8xf32, #tpu.memory_space<vmem>>, vector<1x1x1x8xf32>
    %432 = vector.shape_cast %431 : vector<1x1x1x8xf32> to vector<1x8xf32>
    %433 = vector.broadcast %432 : vector<1x8xf32> to vector<16x8xf32>
    %434 = arith.addf %424, %433 : vector<16x8xf32>
    %cst_296 = arith.constant 0.353553385 : f32
    %435 = vector.broadcast %cst_296 : f32 to vector<16x8xf32>
    %436 = arith.mulf %434, %435 : vector<16x8xf32>
    %c1_297 = arith.constant 1 : index
    %c6_298 = arith.constant 6 : index
    %c0_299 = arith.constant 0 : index
    %c0_300 = arith.constant 0 : index
    %437 = vector.load %arg8[%c1_297, %c6_298, %c0_299, %c0_300] : memref<2x12x1x8xf32, #tpu.memory_space<vmem>>, vector<1x1x1x8xf32>
    %438 = vector.shape_cast %437 : vector<1x1x1x8xf32> to vector<1x8xf32>
    %439 = vector.broadcast %438 : vector<1x8xf32> to vector<16x8xf32>
    %440 = arith.addf %427, %439 : vector<16x8xf32>
    %c1_301 = arith.constant 1 : index
    %c10_302 = arith.constant 10 : index
    %c0_303 = arith.constant 0 : index
    %c0_304 = arith.constant 0 : index
    %441 = vector.load %arg8[%c1_301, %c10_302, %c0_303, %c0_304] : memref<2x12x1x8xf32, #tpu.memory_space<vmem>>, vector<1x1x1x8xf32>
    %442 = vector.shape_cast %441 : vector<1x1x1x8xf32> to vector<1x8xf32>
    %443 = vector.broadcast %442 : vector<1x8xf32> to vector<16x8xf32>
    %444 = arith.addf %430, %443 : vector<16x8xf32>
    %445 = vector.shape_cast %436 : vector<16x8xf32> to vector<2x8x8xf32>
    %446 = arith.truncf %445 : vector<2x8x8xf32> to vector<2x8x8xbf16>
    %447 = vector.shape_cast %440 : vector<16x8xf32> to vector<2x8x8xf32>
    %448 = arith.truncf %447 : vector<2x8x8xf32> to vector<2x8x8xbf16>
    %449 = vector.shape_cast %444 : vector<16x8xf32> to vector<2x8x8xf32>
    %450 = arith.truncf %449 : vector<2x8x8xf32> to vector<2x8x8xbf16>
    "tpu.trace_start"() <{level = 10 : i32, message = "bqd,bkd->bqk"}> : () -> ()
    %cst_305 = arith.constant dense<0.000000e+00> : vector<2x8x8xf32>
    %451 = tpu.matmul %446, %448, %cst_305 {dimension_numbers = #tpu.dot_dimension_numbers<[2], [2], [1], [1], [0, 0, 0, 1, 1, 1], [0], [0]>} : vector<2x8x8xbf16>, vector<2x8x8xbf16>, vector<2x8x8xf32> -> vector<2x8x8xf32>
    "tpu.trace_stop"() : () -> ()
    %452 = arith.addf %451, %46 : vector<2x8x8xf32>
    %cst_306 = arith.constant dense<0xFF800000> : vector<2x8xf32>
    %453 = vector.multi_reduction <maximumf>, %452, %cst_306 [2] : vector<2x8x8xf32> to vector<2x8xf32>
    %454 = vector.shape_cast %453 : vector<2x8xf32> to vector<2x8x1xf32>
    %455 = vector.broadcast %454 : vector<2x8x1xf32> to vector<2x8x8xf32>
    %456 = arith.subf %452, %455 : vector<2x8x8xf32>
    %457 = math.exp %456 : vector<2x8x8xf32>
    %cst_307 = arith.constant dense<0.000000e+00> : vector<2x8xf32>
    %458 = vector.multi_reduction <add>, %457, %cst_307 [2] : vector<2x8x8xf32> to vector<2x8xf32>
    %459 = vector.shape_cast %458 : vector<2x8xf32> to vector<2x8x1xf32>
    %460 = vector.broadcast %459 : vector<2x8x1xf32> to vector<2x8x8xf32>
    %461 = arith.divf %457, %460 : vector<2x8x8xf32>
    %462 = arith.truncf %461 : vector<2x8x8xf32> to vector<2x8x8xbf16>
    "tpu.trace_start"() <{level = 10 : i32, message = "bqk,bkd->bqd"}> : () -> ()
    %cst_308 = arith.constant dense<0.000000e+00> : vector<2x8x8xf32>
    %463 = tpu.matmul %462, %450, %cst_308 {dimension_numbers = #tpu.dot_dimension_numbers<[2], [1], [1], [2], [0, 0, 0, 1, 1, 2], [0], [0]>} : vector<2x8x8xbf16>, vector<2x8x8xbf16>, vector<2x8x8xf32> -> vector<2x8x8xf32>
    "tpu.trace_stop"() : () -> ()
    %464 = vector.shape_cast %463 : vector<2x8x8xf32> to vector<16x8xf32>
    %465 = arith.truncf %464 : vector<16x8xf32> to vector<16x8xbf16>
    %c1_309 = arith.constant 1 : index
    %c2_310 = arith.constant 2 : index
    %c0_311 = arith.constant 0 : index
    %c0_312 = arith.constant 0 : index
    %466 = vector.load %arg9[%c1_309, %c2_310, %c0_311, %c0_312] : memref<2x4x8x32xbf16, #tpu.memory_space<vmem>>, vector<1x1x8x32xbf16>
    %467 = vector.shape_cast %466 : vector<1x1x8x32xbf16> to vector<8x32xbf16>
    %cst_313 = arith.constant dense<0.000000e+00> : vector<16x32xf32>
    %468 = tpu.matmul %465, %467, %cst_313 {dimension_numbers = #tpu.dot_dimension_numbers<[1], [0], [0], [1], [0, 0, 1, 1], [], []>} : vector<16x8xbf16>, vector<8x32xbf16>, vector<16x32xf32> -> vector<16x32xf32>
    %469 = arith.addf %421, %468 : vector<16x32xf32>
    %c1_314 = arith.constant 1 : index
    %c3_315 = arith.constant 3 : index
    %c0_316 = arith.constant 0 : index
    %c0_317 = arith.constant 0 : index
    %470 = vector.load %arg7[%c1_314, %c3_315, %c0_316, %c0_317] : memref<2x12x32x8xbf16, #tpu.memory_space<vmem>>, vector<1x1x32x8xbf16>
    %471 = vector.shape_cast %470 : vector<1x1x32x8xbf16> to vector<32x8xbf16>
    %cst_318 = arith.constant dense<0.000000e+00> : vector<16x8xf32>
    %472 = tpu.matmul %324, %471, %cst_318 {dimension_numbers = #tpu.dot_dimension_numbers<[1], [0], [0], [1], [0, 0, 1, 1], [], []>} : vector<16x32xbf16>, vector<32x8xbf16>, vector<16x8xf32> -> vector<16x8xf32>
    %c1_319 = arith.constant 1 : index
    %c7_320 = arith.constant 7 : index
    %c0_321 = arith.constant 0 : index
    %c0_322 = arith.constant 0 : index
    %473 = vector.load %arg7[%c1_319, %c7_320, %c0_321, %c0_322] : memref<2x12x32x8xbf16, #tpu.memory_space<vmem>>, vector<1x1x32x8xbf16>
    %474 = vector.shape_cast %473 : vector<1x1x32x8xbf16> to vector<32x8xbf16>
    %cst_323 = arith.constant dense<0.000000e+00> : vector<16x8xf32>
    %475 = tpu.matmul %324, %474, %cst_323 {dimension_numbers = #tpu.dot_dimension_numbers<[1], [0], [0], [1], [0, 0, 1, 1], [], []>} : vector<16x32xbf16>, vector<32x8xbf16>, vector<16x8xf32> -> vector<16x8xf32>
    %c1_324 = arith.constant 1 : index
    %c11_325 = arith.constant 11 : index
    %c0_326 = arith.constant 0 : index
    %c0_327 = arith.constant 0 : index
    %476 = vector.load %arg7[%c1_324, %c11_325, %c0_326, %c0_327] : memref<2x12x32x8xbf16, #tpu.memory_space<vmem>>, vector<1x1x32x8xbf16>
    %477 = vector.shape_cast %476 : vector<1x1x32x8xbf16> to vector<32x8xbf16>
    %cst_328 = arith.constant dense<0.000000e+00> : vector<16x8xf32>
    %478 = tpu.matmul %324, %477, %cst_328 {dimension_numbers = #tpu.dot_dimension_numbers<[1], [0], [0], [1], [0, 0, 1, 1], [], []>} : vector<16x32xbf16>, vector<32x8xbf16>, vector<16x8xf32> -> vector<16x8xf32>
    %c1_329 = arith.constant 1 : index
    %c3_330 = arith.constant 3 : index
    %c0_331 = arith.constant 0 : index
    %c0_332 = arith.constant 0 : index
    %479 = vector.load %arg8[%c1_329, %c3_330, %c0_331, %c0_332] : memref<2x12x1x8xf32, #tpu.memory_space<vmem>>, vector<1x1x1x8xf32>
    %480 = vector.shape_cast %479 : vector<1x1x1x8xf32> to vector<1x8xf32>
    %481 = vector.broadcast %480 : vector<1x8xf32> to vector<16x8xf32>
    %482 = arith.addf %472, %481 : vector<16x8xf32>
    %cst_333 = arith.constant 0.353553385 : f32
    %483 = vector.broadcast %cst_333 : f32 to vector<16x8xf32>
    %484 = arith.mulf %482, %483 : vector<16x8xf32>
    %c1_334 = arith.constant 1 : index
    %c7_335 = arith.constant 7 : index
    %c0_336 = arith.constant 0 : index
    %c0_337 = arith.constant 0 : index
    %485 = vector.load %arg8[%c1_334, %c7_335, %c0_336, %c0_337] : memref<2x12x1x8xf32, #tpu.memory_space<vmem>>, vector<1x1x1x8xf32>
    %486 = vector.shape_cast %485 : vector<1x1x1x8xf32> to vector<1x8xf32>
    %487 = vector.broadcast %486 : vector<1x8xf32> to vector<16x8xf32>
    %488 = arith.addf %475, %487 : vector<16x8xf32>
    %c1_338 = arith.constant 1 : index
    %c11_339 = arith.constant 11 : index
    %c0_340 = arith.constant 0 : index
    %c0_341 = arith.constant 0 : index
    %489 = vector.load %arg8[%c1_338, %c11_339, %c0_340, %c0_341] : memref<2x12x1x8xf32, #tpu.memory_space<vmem>>, vector<1x1x1x8xf32>
    %490 = vector.shape_cast %489 : vector<1x1x1x8xf32> to vector<1x8xf32>
    %491 = vector.broadcast %490 : vector<1x8xf32> to vector<16x8xf32>
    %492 = arith.addf %478, %491 : vector<16x8xf32>
    %493 = vector.shape_cast %484 : vector<16x8xf32> to vector<2x8x8xf32>
    %494 = arith.truncf %493 : vector<2x8x8xf32> to vector<2x8x8xbf16>
    %495 = vector.shape_cast %488 : vector<16x8xf32> to vector<2x8x8xf32>
    %496 = arith.truncf %495 : vector<2x8x8xf32> to vector<2x8x8xbf16>
    %497 = vector.shape_cast %492 : vector<16x8xf32> to vector<2x8x8xf32>
    %498 = arith.truncf %497 : vector<2x8x8xf32> to vector<2x8x8xbf16>
    "tpu.trace_start"() <{level = 10 : i32, message = "bqd,bkd->bqk"}> : () -> ()
    %cst_342 = arith.constant dense<0.000000e+00> : vector<2x8x8xf32>
    %499 = tpu.matmul %494, %496, %cst_342 {dimension_numbers = #tpu.dot_dimension_numbers<[2], [2], [1], [1], [0, 0, 0, 1, 1, 1], [0], [0]>} : vector<2x8x8xbf16>, vector<2x8x8xbf16>, vector<2x8x8xf32> -> vector<2x8x8xf32>
    "tpu.trace_stop"() : () -> ()
    %500 = arith.addf %499, %46 : vector<2x8x8xf32>
    %cst_343 = arith.constant dense<0xFF800000> : vector<2x8xf32>
    %501 = vector.multi_reduction <maximumf>, %500, %cst_343 [2] : vector<2x8x8xf32> to vector<2x8xf32>
    %502 = vector.shape_cast %501 : vector<2x8xf32> to vector<2x8x1xf32>
    %503 = vector.broadcast %502 : vector<2x8x1xf32> to vector<2x8x8xf32>
    %504 = arith.subf %500, %503 : vector<2x8x8xf32>
    %505 = math.exp %504 : vector<2x8x8xf32>
    %cst_344 = arith.constant dense<0.000000e+00> : vector<2x8xf32>
    %506 = vector.multi_reduction <add>, %505, %cst_344 [2] : vector<2x8x8xf32> to vector<2x8xf32>
    %507 = vector.shape_cast %506 : vector<2x8xf32> to vector<2x8x1xf32>
    %508 = vector.broadcast %507 : vector<2x8x1xf32> to vector<2x8x8xf32>
    %509 = arith.divf %505, %508 : vector<2x8x8xf32>
    %510 = arith.truncf %509 : vector<2x8x8xf32> to vector<2x8x8xbf16>
    "tpu.trace_start"() <{level = 10 : i32, message = "bqk,bkd->bqd"}> : () -> ()
    %cst_345 = arith.constant dense<0.000000e+00> : vector<2x8x8xf32>
    %511 = tpu.matmul %510, %498, %cst_345 {dimension_numbers = #tpu.dot_dimension_numbers<[2], [1], [1], [2], [0, 0, 0, 1, 1, 2], [0], [0]>} : vector<2x8x8xbf16>, vector<2x8x8xbf16>, vector<2x8x8xf32> -> vector<2x8x8xf32>
    "tpu.trace_stop"() : () -> ()
    %512 = vector.shape_cast %511 : vector<2x8x8xf32> to vector<16x8xf32>
    %513 = arith.truncf %512 : vector<16x8xf32> to vector<16x8xbf16>
    %c1_346 = arith.constant 1 : index
    %c3_347 = arith.constant 3 : index
    %c0_348 = arith.constant 0 : index
    %c0_349 = arith.constant 0 : index
    %514 = vector.load %arg9[%c1_346, %c3_347, %c0_348, %c0_349] : memref<2x4x8x32xbf16, #tpu.memory_space<vmem>>, vector<1x1x8x32xbf16>
    %515 = vector.shape_cast %514 : vector<1x1x8x32xbf16> to vector<8x32xbf16>
    %cst_350 = arith.constant dense<0.000000e+00> : vector<16x32xf32>
    %516 = tpu.matmul %513, %515, %cst_350 {dimension_numbers = #tpu.dot_dimension_numbers<[1], [0], [0], [1], [0, 0, 1, 1], [], []>} : vector<16x8xbf16>, vector<8x32xbf16>, vector<16x32xf32> -> vector<16x32xf32>
    %517 = arith.addf %469, %516 : vector<16x32xf32>
    %c1_351 = arith.constant 1 : index
    %c0_352 = arith.constant 0 : index
    %c0_353 = arith.constant 0 : index
    %518 = vector.load %arg10[%c1_351, %c0_352, %c0_353] : memref<2x1x32xf32, #tpu.memory_space<vmem>>, vector<1x1x32xf32>
    %519 = vector.shape_cast %518 : vector<1x1x32xf32> to vector<1x32xf32>
    %520 = vector.broadcast %519 : vector<1x32xf32> to vector<16x32xf32>
    %521 = arith.addf %517, %520 : vector<16x32xf32>
    %522 = arith.addf %521, %323 : vector<16x32xf32>
    %c1_354 = arith.constant 1 : index
    %c0_355 = arith.constant 0 : index
    %c0_356 = arith.constant 0 : index
    %523 = vector.load %arg11[%c1_354, %c0_355, %c0_356] : memref<2x1x32xf32, #tpu.memory_space<vmem>>, vector<1x1x32xf32>
    %524 = vector.shape_cast %523 : vector<1x1x32xf32> to vector<1x32xf32>
    %c1_357 = arith.constant 1 : index
    %c0_358 = arith.constant 0 : index
    %c0_359 = arith.constant 0 : index
    %525 = vector.load %arg12[%c1_357, %c0_358, %c0_359] : memref<2x1x32xf32, #tpu.memory_space<vmem>>, vector<1x1x32xf32>
    %526 = vector.shape_cast %525 : vector<1x1x32xf32> to vector<1x32xf32>
    %cst_360 = arith.constant dense<0.000000e+00> : vector<16xf32>
    %527 = vector.multi_reduction <add>, %522, %cst_360 [1] : vector<16x32xf32> to vector<16xf32>
    %528 = vector.shape_cast %527 : vector<16xf32> to vector<16x1xf32>
    %cst_361 = arith.constant 3.200000e+01 : f32
    %529 = vector.broadcast %cst_361 : f32 to vector<16x1xf32>
    %530 = arith.divf %528, %529 : vector<16x1xf32>
    %531 = vector.broadcast %530 : vector<16x1xf32> to vector<16x32xf32>
    %532 = arith.subf %522, %531 : vector<16x32xf32>
    %533 = arith.mulf %532, %532 : vector<16x32xf32>
    %cst_362 = arith.constant dense<0.000000e+00> : vector<16xf32>
    %534 = vector.multi_reduction <add>, %533, %cst_362 [1] : vector<16x32xf32> to vector<16xf32>
    %535 = vector.shape_cast %534 : vector<16xf32> to vector<16x1xf32>
    %cst_363 = arith.constant 3.200000e+01 : f32
    %536 = vector.broadcast %cst_363 : f32 to vector<16x1xf32>
    %537 = arith.divf %535, %536 : vector<16x1xf32>
    %cst_364 = arith.constant 9.99999974E-6 : f32
    %538 = vector.broadcast %cst_364 : f32 to vector<16x1xf32>
    %539 = arith.addf %537, %538 : vector<16x1xf32>
    %540 = math.rsqrt %539 : vector<16x1xf32>
    %541 = vector.broadcast %540 : vector<16x1xf32> to vector<16x32xf32>
    %542 = arith.mulf %532, %541 : vector<16x32xf32>
    %543 = vector.broadcast %524 : vector<1x32xf32> to vector<16x32xf32>
    %544 = arith.mulf %542, %543 : vector<16x32xf32>
    %545 = vector.broadcast %526 : vector<1x32xf32> to vector<16x32xf32>
    %546 = arith.addf %544, %545 : vector<16x32xf32>
    %c1_365 = arith.constant 1 : index
    %c0_366 = arith.constant 0 : index
    %c0_367 = arith.constant 0 : index
    %547 = vector.load %arg13[%c1_365, %c0_366, %c0_367] : memref<2x32x128xbf16, #tpu.memory_space<vmem>>, vector<1x32x128xbf16>
    %548 = vector.shape_cast %547 : vector<1x32x128xbf16> to vector<32x128xbf16>
    %549 = arith.truncf %546 : vector<16x32xf32> to vector<16x32xbf16>
    %cst_368 = arith.constant dense<0.000000e+00> : vector<16x128xf32>
    %550 = tpu.matmul %549, %548, %cst_368 {dimension_numbers = #tpu.dot_dimension_numbers<[1], [0], [0], [1], [0, 0, 1, 1], [], []>} : vector<16x32xbf16>, vector<32x128xbf16>, vector<16x128xf32> -> vector<16x128xf32>
    %c1_369 = arith.constant 1 : index
    %c0_370 = arith.constant 0 : index
    %c0_371 = arith.constant 0 : index
    %551 = vector.load %arg14[%c1_369, %c0_370, %c0_371] : memref<2x1x128xf32, #tpu.memory_space<vmem>>, vector<1x1x128xf32>
    %552 = vector.shape_cast %551 : vector<1x1x128xf32> to vector<1x128xf32>
    %553 = vector.broadcast %552 : vector<1x128xf32> to vector<16x128xf32>
    %554 = arith.addf %550, %553 : vector<16x128xf32>
    %cst_372 = arith.constant 5.000000e-01 : f32
    %555 = vector.broadcast %cst_372 : f32 to vector<16x128xf32>
    %556 = arith.mulf %555, %554 : vector<16x128xf32>
    %cst_373 = arith.constant 4.471500e-02 : f32
    %557 = vector.broadcast %cst_373 : f32 to vector<16x128xf32>
    %558 = arith.mulf %557, %554 : vector<16x128xf32>
    %559 = arith.mulf %558, %554 : vector<16x128xf32>
    %560 = arith.mulf %559, %554 : vector<16x128xf32>
    %561 = arith.addf %554, %560 : vector<16x128xf32>
    %cst_374 = arith.constant 0.797884583 : f32
    %562 = vector.broadcast %cst_374 : f32 to vector<16x128xf32>
    %563 = arith.mulf %562, %561 : vector<16x128xf32>
    %564 = math.tanh %563 : vector<16x128xf32>
    %cst_375 = arith.constant 1.000000e+00 : f32
    %565 = vector.broadcast %cst_375 : f32 to vector<16x128xf32>
    %566 = arith.addf %565, %564 : vector<16x128xf32>
    %567 = arith.mulf %556, %566 : vector<16x128xf32>
    %c1_376 = arith.constant 1 : index
    %c0_377 = arith.constant 0 : index
    %c0_378 = arith.constant 0 : index
    %568 = vector.load %arg15[%c1_376, %c0_377, %c0_378] : memref<2x128x32xbf16, #tpu.memory_space<vmem>>, vector<1x128x32xbf16>
    %569 = vector.shape_cast %568 : vector<1x128x32xbf16> to vector<128x32xbf16>
    %570 = arith.truncf %567 : vector<16x128xf32> to vector<16x128xbf16>
    %cst_379 = arith.constant dense<0.000000e+00> : vector<16x32xf32>
    %571 = tpu.matmul %570, %569, %cst_379 {dimension_numbers = #tpu.dot_dimension_numbers<[1], [0], [0], [1], [0, 0, 1, 1], [], []>} : vector<16x128xbf16>, vector<128x32xbf16>, vector<16x32xf32> -> vector<16x32xf32>
    %c1_380 = arith.constant 1 : index
    %c0_381 = arith.constant 0 : index
    %c0_382 = arith.constant 0 : index
    %572 = vector.load %arg16[%c1_380, %c0_381, %c0_382] : memref<2x1x32xf32, #tpu.memory_space<vmem>>, vector<1x1x32xf32>
    %573 = vector.shape_cast %572 : vector<1x1x32xf32> to vector<1x32xf32>
    %574 = vector.broadcast %573 : vector<1x32xf32> to vector<16x32xf32>
    %575 = arith.addf %571, %574 : vector<16x32xf32>
    %576 = arith.addf %575, %546 : vector<16x32xf32>
    %c1_383 = arith.constant 1 : index
    %c0_384 = arith.constant 0 : index
    %c0_385 = arith.constant 0 : index
    %577 = vector.load %arg17[%c1_383, %c0_384, %c0_385] : memref<2x1x32xf32, #tpu.memory_space<vmem>>, vector<1x1x32xf32>
    %578 = vector.shape_cast %577 : vector<1x1x32xf32> to vector<1x32xf32>
    %c1_386 = arith.constant 1 : index
    %c0_387 = arith.constant 0 : index
    %c0_388 = arith.constant 0 : index
    %579 = vector.load %arg18[%c1_386, %c0_387, %c0_388] : memref<2x1x32xf32, #tpu.memory_space<vmem>>, vector<1x1x32xf32>
    %580 = vector.shape_cast %579 : vector<1x1x32xf32> to vector<1x32xf32>
    %cst_389 = arith.constant dense<0.000000e+00> : vector<16xf32>
    %581 = vector.multi_reduction <add>, %576, %cst_389 [1] : vector<16x32xf32> to vector<16xf32>
    %582 = vector.shape_cast %581 : vector<16xf32> to vector<16x1xf32>
    %cst_390 = arith.constant 3.200000e+01 : f32
    %583 = vector.broadcast %cst_390 : f32 to vector<16x1xf32>
    %584 = arith.divf %582, %583 : vector<16x1xf32>
    %585 = vector.broadcast %584 : vector<16x1xf32> to vector<16x32xf32>
    %586 = arith.subf %576, %585 : vector<16x32xf32>
    %587 = arith.mulf %586, %586 : vector<16x32xf32>
    %cst_391 = arith.constant dense<0.000000e+00> : vector<16xf32>
    %588 = vector.multi_reduction <add>, %587, %cst_391 [1] : vector<16x32xf32> to vector<16xf32>
    %589 = vector.shape_cast %588 : vector<16xf32> to vector<16x1xf32>
    %cst_392 = arith.constant 3.200000e+01 : f32
    %590 = vector.broadcast %cst_392 : f32 to vector<16x1xf32>
    %591 = arith.divf %589, %590 : vector<16x1xf32>
    %cst_393 = arith.constant 9.99999974E-6 : f32
    %592 = vector.broadcast %cst_393 : f32 to vector<16x1xf32>
    %593 = arith.addf %591, %592 : vector<16x1xf32>
    %594 = math.rsqrt %593 : vector<16x1xf32>
    %595 = vector.broadcast %594 : vector<16x1xf32> to vector<16x32xf32>
    %596 = arith.mulf %586, %595 : vector<16x32xf32>
    %597 = vector.broadcast %578 : vector<1x32xf32> to vector<16x32xf32>
    %598 = arith.mulf %596, %597 : vector<16x32xf32>
    %599 = vector.broadcast %580 : vector<1x32xf32> to vector<16x32xf32>
    %600 = arith.addf %598, %599 : vector<16x32xf32>
    %601 = vector.shape_cast %600 : vector<16x32xf32> to vector<2x8x32xf32>
    %602 = vector.extract_strided_slice %601 {offsets = [0, 0, 0], sizes = [2, 1, 32], strides = [1, 1, 1]} : vector<2x8x32xf32> to vector<2x1x32xf32>
    %603 = vector.shape_cast %602 : vector<2x1x32xf32> to vector<2x32xf32>
    %c0_394 = arith.constant 0 : index
    %c0_395 = arith.constant 0 : index
    %604 = vector.load %arg19[%c0_394, %c0_395] : memref<32x128xbf16, #tpu.memory_space<vmem>>, vector<32x128xbf16>
    %605 = arith.truncf %603 : vector<2x32xf32> to vector<2x32xbf16>
    %cst_396 = arith.constant dense<0.000000e+00> : vector<2x128xf32>
    %606 = tpu.matmul %605, %604, %cst_396 {dimension_numbers = #tpu.dot_dimension_numbers<[1], [0], [0], [1], [0, 0, 1, 1], [], []>} : vector<2x32xbf16>, vector<32x128xbf16>, vector<2x128xf32> -> vector<2x128xf32>
    %c0_397 = arith.constant 0 : index
    %c0_398 = arith.constant 0 : index
    %607 = vector.load %arg20[%c0_397, %c0_398] : memref<1x128xf32, #tpu.memory_space<vmem>>, vector<1x128xf32>
    %608 = vector.broadcast %607 : vector<1x128xf32> to vector<2x128xf32>
    %609 = arith.addf %606, %608 : vector<2x128xf32>
    %c0_399 = arith.constant 0 : index
    %c0_400 = arith.constant 0 : index
    %610 = vector.load %arg21[%c0_399, %c0_400] : memref<2x128xf32, #tpu.memory_space<vmem>>, vector<2x128xf32>
    tpu.vector_store %arg21[%c0_399, %c0_400], %609 {strides = array<i32>} : memref<2x128xf32, #tpu.memory_space<vmem>>, vector<2x128xf32>,
    return
  }
}

</mosaic_0001>

<bundles_post_ra>
// kernel: chemberta_classifier_forward.1
= control target key start
LH: loop header
LB: loop body
LE: loop exit
PB: predicated region body
PF: predicated region fallthrough
CT: control target
= control target key end

     0   :  { %s7133_s0 = inlined_call_operand.vmem [shape: s32[16,1], index: 0, kind: input, shape index: {}]   ;;  %s7134_s1 = inlined_call_operand.vmem [shape: s32[16,1], index: 1, kind: input, shape index: {}]   ;;  %s7135_s2 = inlined_call_operand.vmem [shape: f32[2,8], index: 2, kind: input, shape index: {}]   ;;  %s7136_s3 = inlined_call_operand.vmem [shape: f32[64,32], index: 3, kind: input, shape index: {}]   ;;  %s7137_s4 = inlined_call_operand.vmem [shape: f32[32,32], index: 4, kind: input, shape index: {}]   ;;  %s7138_s5 = inlined_call_operand.vmem [shape: f32[1,32], index: 5, kind: input, shape index: {}]   ;;  %s7139_s6 = inlined_call_operand.vmem [shape: f32[1,32], index: 6, kind: input, shape index: {}]   ;;  %s7140_s7 = inlined_call_operand.vmem [shape: bf16[2,12,32,8], index: 7, kind: input, shape index: {}]   ;;  %s7141_s8 = inlined_call_operand.vmem [shape: f32[2,12,1,8], index: 8, kind: input, shape index: {}]   ;;  %s7142_s9 = inlined_call_operand.vmem [shape: bf16[2,4,8,32], index: 9, kind: input, shape index: {}]   ;;  %s7143_s10 = inlined_call_operand.vmem [shape: f32[2,1,32], index: 10, kind: input, shape index: {}]   ;;  %s7144_s11 = inlined_call_operand.vmem [shape: f32[2,1,32], index: 11, kind: input, shape index: {}]   ;;  %s7145_s12 = inlined_call_operand.vmem [shape: f32[2,1,32], index: 12, kind: input, shape index: {}]   ;;  %s7146_s13 = inlined_call_operand.vmem [shape: bf16[2,32,128], index: 13, kind: input, shape index: {}]   ;;  %s7147_s14 = inlined_call_operand.vmem [shape: f32[2,1,128], index: 14, kind: input, shape index: {}]   ;;  %s7148_s15 = inlined_call_operand.vmem [shape: bf16[2,128,32], index: 15, kind: input, shape index: {}]   ;;  %s7149_s16 = inlined_call_operand.vmem [shape: f32[2,1,32], index: 16, kind: input, shape index: {}]   ;;  %s7150_s17 = inlined_call_operand.vmem [shape: f32[2,1,32], index: 17, kind: input, shape index: {}]   ;;  %s7151_s18 = inlined_call_operand.vmem [shape: f32[2,1,32], index: 18, kind: input, shape index: {}]   ;;  %s7152_s19 = inlined_call_operand.vmem [shape: bf16[32,128], index: 19, kind: input, shape index: {}]   ;;  %s7153_s20 = inlined_call_operand.vmem [shape: f32[1,128], index: 20, kind: input, shape index: {}]   ;;  %s7154_s21 = inlined_call_operand.hbm [shape: f32[2,128], index: 21, kind: output, shape index: {}]  }
   0x1   :  { %7160 = sst [smem:[#allocation5_spill]] %s7133_s0 }
   0x2   :  { %7161 = sst [smem:[#allocation6_spill]] %s7134_s1 }
   0x3   :  { %7162 = sst [smem:[#allocation7_spill]] %s7135_s2 }
   0x4   :  { %7163 = sst [smem:[#allocation8_spill]] %s7136_s3 }
   0x5   :  { %7164 = sst [smem:[#allocation9_spill]] %s7137_s4 }
   0x6   :  { %7165 = sst [smem:[#allocation10_spill]] %s7138_s5 }
   0x7   :  { %7166 = sst [smem:[#allocation11_spill]] %s7149_s16 }
   0x8   :  { %s7167_s26 = sld [smem:[#allocation6_spill]]  ;;  %s7168_s16 = sld [smem:[#allocation5_spill]]  ;;  %v6059_v2 = vmov 0   ;;  %v6060_v13 = vmov 0.0  }
   0x9   :  { %5871 = vset.pattern.permute.xlu0 %v6059_v2  ;;  %5872 = vset.pattern.permute.xlu1 %v6059_v2  ;;  %s7169_s0 = sld [smem:[#allocation9_spill]]  ;;  %s7170_s29 = sld [smem:[#allocation8_spill]] }
   0xa   :  { %5352 = vmatprep.subr.bf16.mxu1 %v6060_v13 }
   0xe   :  { %v86_v0 = vld [vmem:[%s7167_s26] sm:$0xff]  ;;  %v87_v5 = vld [vmem:[%s7167_s26 + $0x8] sm:$0xff] }
   0xf   :  { %v70_v1 = vld [vmem:[%s7168_s16] sm:$0xff]  ;;  %v109_v4 = vld [vmem:[%s7169_s0 + $0x8] sm:$0xff]  ;;  %89 = vperm.xlu0 %5871, %v86_v0   ;;  %v110_v7 = vld [vmem:[%s7169_s0 + $0x10] sm:$0xff] }
  0x10   :  { %v108_v3 = vld [vmem:[%s7169_s0] sm:$0xff]  ;;  %75 = vperm.xlu1 %5872, %v70_v1   ;;  %v111_v8 = vld [vmem:[%s7169_s0 + $0x18] sm:$0xff]  ;;  %v71_v9 = vld [vmem:[%s7168_s16 + $0x8] sm:$0xff] }
  0x11   :  { %v5840_v6 = vpack.c.bf16 %v109_v4, %v108_v3  ;;  %v5844_v10 = vpack.c.bf16 %v111_v8, %v110_v7  ;;  %v100_v11 = vld [vmem:[%s7170_s29] sm:$0xff]  ;;  %v101_v12 = vld [vmem:[%s7170_s29 + $0x8] sm:$0xff] }
  0x12   :  { %v5848_v14 = vpack.c.bf16 %v101_v12, %v100_v11 }
  0x13   :  { %5841 = vmatprep.subr.bf16.mxu0 %v5840_v6  ;;  %92 = vperm.xlu0 %5871, %v87_v5  }
  0x14   :  { %5843 = vmatpush3.bf16.msra.mxu0 %v5840_v6  ;;  %78 = vperm.xlu1 %5872, %v71_v9  }
  0x15   :  { %5845 = vmatprep.subr.bf16.mxu0 %v5844_v10 }
  0x18   :  { %5847 = vmatpush3.bf16.msra.mxu0 %v5844_v10 }
  0x19   :  { %5849 = vmatprep.subr.bf16.mxu0 %v5848_v14 }
  0x1a   :  { %26 = vsyncpa [#allocation3], 0  ;;  %v72_v15 = vlaneseq  ;;  %vm112_vm0 = vcmask 261120   ;;  %v102_v20 = vld [vmem:[%s7170_s29 + $0x10] sm:$0xff]  ;;  %v103_v21 = vld [vmem:[%s7170_s29 + $0x18] sm:$0xff]  ;;  %vm194_vm4 = vcmask 523264  }
  0x1b   :  { %v5852_v23 = vpack.c.bf16 %v103_v21, %v102_v20  ;;  %v104_v26 = vld [vmem:[%s7170_s29 + $0x20] sm:$0xff]  ;;  %v105_v27 = vld [vmem:[%s7170_s29 + $0x28] sm:$0xff]  ;;  %v106_v29 = vld [vmem:[%s7170_s29 + $0x30] sm:$0xff]  ;;  %vm6061_vm6 = vmmov 0   ;;  %s7171_s1 = sld [smem:[#allocation10_spill]]  ;;  %vm565_vm7 = vcmask 64512  }
  0x1c   :  { %v73_v16 = vand.u32 127, %v72_v15  ;;  %v5856_v28 = vpack.c.bf16 %v105_v27, %v104_v26  ;;  %v107_v30 = vld [vmem:[%s7170_s29 + $0x38] sm:$0xff]  ;;  %v5873_v48 = vld [vmem:[%s7140_s7] sm:$0xff]   ;;  %v5875_v50 = vld [vmem:[%s7140_s7 + $0x8] sm:$0xff]   ;;  %5356 = vmatprep.mubr.msk.bf16.mxu1 %vm6061_vm6, %v6060_v13  ;;  %vm685_vm8 = vcmask 1043456   ;;  %s7172_s22 = sld [smem:[#allocation7_spill]] }
  0x1d   :  { %v5860_v31 = vpack.c.bf16 %v107_v30, %v106_v29  ;;  %v5874_v49 = vld [vmem:[%s7140_s7 + $0x40] sm:$0xff]   ;;  %v5876_v51 = vld [vmem:[%s7140_s7 + $0x48] sm:$0xff]   ;;  %s7173_s3 = sld [smem:[#allocation11_spill]]  ;;  %vm4711_vm9 = vcmask 1041409  }
  0x1e   :  { %5353 = vmatpush3.bf16.msra.mxu1 %v5874_v49  ;;  %v4793_v0 = vld [vmem:[%s7139_s6] ss:$0 sm:$0xff]  ;;  %v5878_v6 = vld [vmem:[%s7140_s7 + $0x88] sm:$0xff]   ;;  %v4807_v7 = vld [vmem:[%s7141_s8 + $0x4] ss:$0 sm:$0xff] }
  0x1f   :  { %5354 = vmatprep.subr.bf16.mxu1 %v6060_v13  ;;  %v5877_v4 = vld [vmem:[%s7140_s7 + $0x80] sm:$0xff]   ;;  %v4812_v26 = vld [vmem:[%s7141_s8 + $0x8] ss:$0 sm:$0xff] }
  0x20   :  { %v4802_v8 = vld [vmem:[%s7141_s8] ss:$0 sm:$0xff] }
  0x21   :  { %v4792_v60 = vld [vmem:[%s7171_s1] ss:$0 sm:$0xff] }
  0x22   :  { %5355 = vmatpush3.bf16.msra.mxu1 %v5876_v51 }
  0x23   :  { %5360 = vmatprep.subr.bf16.mxu1 %v6060_v13 }
  0x8e   :  { %v90_v17 = vpop.permute.xlu0 %89 }
  0x8f   :  { %vm94_vm1 = vcmp.eq.s32.totalorder %v90_v17, %v73_v16  ;;  %v76_v18 = vpop.permute.xlu1 %75 }
  0x90   :  { %v4786_v19 = vsel %vm94_vm1, 1.0, %v6060_v13  ;;  %vm80_vm2 = vcmp.eq.s32.totalorder %v76_v18, %v73_v16 }
  0x91   :  { %5322 = vmatprep.mubr.msk.f32.mxu0 %vm112_vm0, %v4786_v19  ;;  %v4784_v24 = vsel %vm80_vm2, 1.0, %v6060_v13 }
  0x92   :  { %v93_v22 = vpop.permute.xlu0 %92 }
  0x93   :  { %vm95_vm3 = vcmp.eq.s32.totalorder %v93_v22, %v73_v16  ;;  %v79_v32 = vpop.permute.xlu1 %78 }
  0x94   :  { %v4787_v25 = vsel %vm95_vm3, 1.0, %v6060_v13  ;;  %vm81_vm5 = vcmp.eq.s32.totalorder %v79_v32, %v73_v16 }
  0x95   :  { %5323 = vmatmul.mubr.msk.f32.vlgmr.msra.gmra.mrb[0].mxu0 %vm112_vm0, %v4787_v25  ;;  %v4785_v33 = vsel %vm81_vm5, 1.0, %v6060_v13 }
  0x96   :  { %5851 = vmatpush3.bf16.msra.mxu0 %v5848_v14  ;;  %5341 = vmatprep.mubr.msk.f32.mxu0 %vm194_vm4, %v4784_v24 }
  0x97   :  { %5853 = vmatprep.subr.bf16.mxu0 %v5852_v23 }
  0x9a   :  { %5855 = vmatpush3.bf16.msra.mxu0 %v5852_v23 }
  0x9b   :  { %5857 = vmatprep.subr.bf16.mxu0 %v5856_v28 }
  0x9e   :  { %5859 = vmatpush3.bf16.msra.mxu0 %v5856_v28 }
  0x9f   :  { %5861 = vmatprep.subr.bf16.mxu0 %v5860_v31 }
  0xa2   :  { %5863 = vmatpush3.bf16.msra.mxu0 %v5860_v31 }
  0xa3   :  { %5344 = vmatprep.subr.bf16.mxu0 %v6060_v13 }
  0xa5   :  { %5342 = vmatmul.mubr.msk.f32.vlgmr.msra.gmra.mrb[0].mxu0 %vm194_vm4, %v4785_v33 }
  0xa6   :  { %5345 = vmatpush3.bf16.msra.mxu0 %v5873_v48  ;;  %5348 = vmatprep.mubr.msk.bf16.mxu0 %vm6061_vm6, %v6060_v13 }
  0xa7   :  { %5346 = vmatprep.subr.bf16.mxu0 %v6060_v13 }
  0xaa   :  { %5347 = vmatpush3.bf16.msra.mxu0 %v5875_v50 }
  0xab   :  { %5368 = vmatprep.subr.bf16.mxu0 %v6060_v13 }
 0x178   :  { %v5343_v34 = vpop.f32.mrb[0].mxu0 }
 0x179   :  { %v267_v35 = vpop.f32.mrb[1].mxu0  ;;  %v281_v36 = vsel %vm112_vm0, %v5343_v34, 0.0 }
 0x17a   :  { %282 = vadd.xlane.f32.xlu1 %v281_v36  ;;  %v278_v37 = vsel %vm112_vm0, %v267_v35, 0.0 }
 0x17b   :  { %279 = vadd.xlane.f32.xlu0 %v278_v37 }
 0x207   :  { %v283_v38 = vpop.xlane.xlu1 %282 }
 0x208   :  { %v286_v39 = vmul.f32 0.03125, %v283_v38  ;;  %v280_v40 = vpop.xlane.xlu0 %279 }
 0x209   :  { %v285_v41 = vmul.f32 0.03125, %v280_v40 }
 0x20a   :  { %v288_v42 = vsub.f32 %v5343_v34, %v286_v39 }
 0x20b   :  { %v287_v43 = vsub.f32 %v267_v35, %v285_v41 }
 0x20c   :  { %v290_v46 = vmul.f32 %v288_v42, %v288_v42 }
 0x20d   :  { %v289_v44 = vmul.f32 %v287_v43, %v287_v43 }
 0x20e   :  { %v294_v47 = vsel %vm112_vm0, %v290_v46, 0.0 }
 0x20f   :  { %v291_v45 = vsel %vm112_vm0, %v289_v44, 0.0  ;;  %v321_v44 = vld [vmem:[%s7172_s22] sm:$0x3] }
 0x210   :  { %292 = vadd.xlane.f32.xlu0 %v291_v45  ;;  %v322_v45 = vsub.f32 1.0, %v321_v44 }
 0x212   :  { %v323_v48 = vmul.f32 -1e+09, %v322_v45  ;;  %v4833_v45 = vld [vmem:[%s7141_s8 + $0x1] ss:$0 sm:$0xff] }
 0x214   :  { %295 = vadd.xlane.f32.xlu0 %v294_v47  ;;  %v329_v47 = vshrl.u32 %v72_v15, 7 }
 0x29d   :  { %v293_v52 = vpop.xlane.xlu0 %292 }
 0x29e   :  { %v297_v53 = vmul.f32 0.03125, %v293_v52 }
 0x2a0   :  { %v299_v54 = vadd.f32 1e-05, %v297_v53  ;;  %v349_v53 = vsub.s32 0, %v329_v47 }
 0x2a1   :  { %v296_v55 = vpop.xlane.xlu0 %295 }
 0x2a2   :  { %5943 = vrsqrt.f32 %v299_v54  ;;  %v298_v56 = vmul.f32 0.03125, %v296_v55 }
 0x2a4   :  { %v300_v57 = vadd.f32 1e-05, %v298_v56 }
 0x2a6   :  { %5945 = vrsqrt.f32 %v300_v57 }
 0x2ac   :  { %v5944_v58 = vpop.eup %5943 }
 0x2ad   :  { %v303_v59 = vmul.f32 %v5944_v58, %v287_v43 }
 0x2af   :  { %v311_v62 = vmul.f32 %v4792_v60, %v303_v59 }
 0x2b0   :  { %v5946_v61 = vpop.eup %5945 }
 0x2b1   :  { %v304_v63 = vmul.f32 %v5946_v61, %v288_v42  ;;  %v6263_v2 = vadd.f32 %v4793_v0, %v311_v62  ;;  %v6062_v42 = vmov 1966171168  }
 0x2b2   :  { %v326_v43 = vunpack.c.l.s4 %v6062_v42 }
 0x2b3   :  { %v312_v1 = vmul.f32 %v4792_v60, %v304_v63 }
 0x2b4   :  { %v327_v46 = vunpack.c.0.s8 %v326_v43  ;;  %v4838_v43 = vld [vmem:[%s7141_s8 + $0x5] ss:$0 sm:$0xff] }
 0x2b5   :  { %v6265_v3 = vadd.f32 %v4793_v0, %v312_v1 }
 0x2b6   :  { %v330_v49 = vsub.s32 %v327_v46, %v329_v47 }
 0x2b7   :  { %v6272_v5 = vpack.c.bf16 %v6265_v3, %v6263_v2 }
 0x2b8   :  { %v331_v50 = vrot.slane %v323_v48, %v330_v49 }
 0x2b9   :  { %5349 = vmatmul.mubr.msk.bf16.vlgmr.msra.gmra.mrb[4].mxu0 %vm112_vm0, %v6272_v5  ;;  %5357 = vmatmul.mubr.msk.bf16.vlgmr.msra.gmra.mrb[0].mxu1 %vm112_vm0, %v6272_v5 }
 0x2ba   :  { %5361 = vmatpush3.bf16.msra.mxu1 %v5877_v4  ;;  %5364 = vmatprep.mubr.msk.bf16.mxu1 %vm6061_vm6, %v6060_v13  ;;  %v332_v51 = vcombine.high %v331_v50, %v331_v50  ;;  %v339_v52 = vrot.slane %v331_v50, %v330_v49 }
 0x2bb   :  { %5362 = vmatprep.subr.bf16.mxu1 %v6060_v13  ;;  %5370 = vmatprep.mubr.msk.bf16.mxu0 %vm6061_vm6, %v6060_v13 }
 0x2bc   :  { %v346_v54 = vrot.slane %v332_v51, %v330_v49  ;;  %v6318_v55 = vrot.slane %v339_v52, %v349_v53 }
 0x2be   :  { %5363 = vmatpush3.bf16.msra.mxu1 %v5878_v6  ;;  %v6320_v56 = vrot.slane %v346_v54, %v349_v53 }
 0x2bf   :  { %5374 = vmatprep.subr.bf16.mxu1 %v6060_v13 }
 0x2c1   :  { %5365 = vmatmul.mubr.msk.bf16.vlgmr.msra.gmra.mrb[4].mxu1 %vm112_vm0, %v6272_v5 }
 0x2c2   :  { %5376 = vmatprep.mubr.msk.bf16.mxu1 %vm6061_vm6, %v6060_v13 }
 0x38c   :  { %v428_v9 = vpop.f32.mrb[4].mxu0  ;;  %v491_v10 = vpop.f32.mrb[0].mxu1 }
 0x38d   :  { %v492_v11 = vadd.f32 %v4807_v7, %v491_v10  ;;  %v5350_v12 = vpop.f32.mrb[5].mxu0  ;;  %v5358_v14 = vpop.f32.mrb[1].mxu1  ;;  %v429_v18 = vadd.f32 %v4802_v8, %v428_v9 }
 0x38e   :  { %v431_v16 = vpop.f32.mrb[6].mxu0  ;;  %v494_v17 = vpop.f32.mrb[2].mxu1 }
 0x38f   :  { %v561_v19 = vpack.c.bf16 %v492_v11, %v492_v11  ;;  %v495_v20 = vadd.f32 %v4807_v7, %v494_v17  ;;  %v5351_v21 = vpop.f32.mrb[7].mxu0  ;;  %v5359_v22 = vpop.f32.mrb[3].mxu1  ;;  %v432_v24 = vadd.f32 %v4802_v8, %v431_v16  ;;  %v435_v27 = vmul.f32 0.35355338, %v429_v18 }
 0x391   :  { %v570_v23 = vsel %vm565_vm7, %v561_v19, 0  ;;  %v562_v25 = vpack.c.bf16 %v495_v20, %v495_v20  ;;  %v436_v30 = vmul.f32 0.35355338, %v432_v24  ;;  %v559_v34 = vpack.c.bf16 %v435_v27, %v435_v27  ;;  %v5879_v24 = vld [vmem:[%s7140_s7 + $0x10] sm:$0xff]  }
 0x392   :  { %5369 = vmatpush3.bf16.xpose.msra.mxu0 %v570_v23  ;;  %v5880_v27 = vld [vmem:[%s7140_s7 + $0x50] sm:$0xff]  }
 0x393   :  { %v616_v28 = vsel %vm565_vm7, %v562_v25, 0  ;;  %5380 = vmatprep.subr.bf16.mxu0 %v6060_v13  ;;  %v560_v38 = vpack.c.bf16 %v436_v30, %v436_v30  ;;  %v5882_v30 = vld [vmem:[%s7140_s7 + $0x58] sm:$0xff]  }
 0x394   :  { %v552_v29 = vpop.f32.mrb[4].mxu1  ;;  %5375 = vmatpush3.bf16.xpose.msra.mxu1 %v616_v28 }
 0x395   :  { %v553_v31 = vadd.f32 %v4812_v26, %v552_v29  ;;  %v5366_v32 = vpop.f32.mrb[5].mxu1  ;;  %5386 = vmatprep.subr.bf16.mxu1 %v6060_v13  ;;  %v5881_v29 = vld [vmem:[%s7140_s7 + $0x18] sm:$0xff]  }
 0x396   :  { %v555_v33 = vpop.f32.mrb[6].mxu1  ;;  %v5884_v32 = vld [vmem:[%s7140_s7 + $0x98] sm:$0xff]  }
 0x397   :  { %v563_v35 = vpack.c.bf16 %v553_v31, %v553_v31  ;;  %v556_v36 = vadd.f32 %v4812_v26, %v555_v33  ;;  %v5367_v37 = vpop.f32.mrb[7].mxu1  ;;  %v5883_v31 = vld [vmem:[%s7140_s7 + $0x90] sm:$0xff]  }
 0x399   :  { %v687_v39 = vsel %vm685_vm8, %v563_v35, 0  ;;  %v564_v40 = vpack.c.bf16 %v556_v36, %v556_v36  ;;  %5371 = vmatmul.mubr.msk.bf16.vlgmr.msra.gmra.mrb[8].mxu0 %vm565_vm7, %v559_v34 }
 0x39a   :  { %5381 = vmatpush3.bf16.msra.mxu0 %v687_v39  ;;  %5382 = vmatprep.mubr.msk.bf16.mxu0 %vm6061_vm6, %v6060_v13 }
 0x39b   :  { %v733_v41 = vsel %vm685_vm8, %v564_v40, 0  ;;  %5377 = vmatmul.mubr.msk.bf16.vlgmr.msra.gmra.mrb[8].mxu1 %vm565_vm7, %v560_v38  ;;  %5392 = vmatprep.subr.bf16.mxu0 %v6060_v13 }
 0x39c   :  { %5387 = vmatpush3.bf16.msra.mxu1 %v733_v41  ;;  %5388 = vmatprep.mubr.msk.bf16.mxu1 %vm6061_vm6, %v6060_v13 }
 0x39d   :  { %5400 = vmatprep.subr.bf16.mxu1 %v6060_v13 }
 0x46c   :  { %v606_v57 = vpop.f32.mrb[8].mxu0 }
 0x46d   :  { %v607_v58 = vadd.f32 %v606_v57, %v6318_v55  ;;  %v5372_v59 = vpop.f32.mrb[9].mxu0 }
 0x46e   :  { %v609_v60 = vpop.f32.mrb[10].mxu0  ;;  %v652_v61 = vpop.f32.mrb[8].mxu1 }
 0x46f   :  { %v653_v62 = vadd.f32 %v652_v61, %v6320_v56  ;;  %v5373_v15 = vpop.f32.mrb[11].mxu0  ;;  %v5378_v63 = vpop.f32.mrb[9].mxu1  ;;  %v658_v0 = vsel %vm565_vm7, %v607_v58, -inf }
 0x470   :  { %v655_v1 = vpop.f32.mrb[10].mxu1  ;;  %659 = vmax.xlane.f32.xlu0 %v658_v0 }
 0x471   :  { %v5379_v4 = vpop.f32.mrb[11].mxu1  ;;  %v661_v6 = vsel %vm565_vm7, %v653_v62, -inf }
 0x472   :  { %662 = vmax.xlane.f32.xlu1 %v661_v6 }
 0x4fd   :  { %v660_v7 = vpop.xlane.xlu0 %659 }
 0x4fe   :  { %v664_v8 = vsub.f32 %v607_v58, %v660_v7  ;;  %v4843_v58 = vld [vmem:[%s7141_s8 + $0x9] ss:$0 sm:$0xff] }
 0x4ff   :  { %v663_v9 = vpop.xlane.xlu1 %662 }
 0x500   :  { %v666_v10 = vmul.f32 1.442695, %v664_v8  ;;  %v665_v11 = vsub.f32 %v653_v62, %v663_v9 }
 0x502   :  { %5947 = vpow2.f32 %v666_v10  ;;  %v668_v12 = vmul.f32 1.442695, %v665_v11 }
 0x504   :  { %5949 = vpow2.f32 %v668_v12 }
 0x50c   :  { %v5948_v14 = vpop.eup %5947 }
 0x50d   :  { %v670_v16 = vsel %vm565_vm7, %v5948_v14, 0.0 }
 0x50e   :  { %v5950_v17 = vpop.eup %5949  ;;  %671 = vadd.xlane.f32.xlu0 %v670_v16 }
 0x50f   :  { %v673_v18 = vsel %vm565_vm7, %v5950_v17, 0.0 }
 0x510   :  { %674 = vadd.xlane.f32.xlu1 %v673_v18 }
 0x59b   :  { %v672_v19 = vpop.xlane.xlu0 %671 }
 0x59c   :  { %5951 = vrcp.f32 %v672_v19 }
 0x59d   :  { %v675_v20 = vpop.xlane.xlu1 %674 }
 0x59e   :  { %5953 = vrcp.f32 %v675_v20 }
 0x5a6   :  { %v5952_v21 = vpop.eup %5951 }
 0x5a7   :  { %v677_v22 = vmul.f32 %v5952_v21, %v5948_v14 }
 0x5a8   :  { %v5954_v23 = vpop.eup %5953 }
 0x5a9   :  { %v679_v25 = vmul.f32 %v5954_v23, %v5950_v17  ;;  %v680_v26 = vpack.c.bf16 %v677_v22, %v677_v22 }
 0x5ab   :  { %5383 = vmatmul.mubr.msk.bf16.vlgmr.msra.gmra.mrb[12].mxu0 %vm565_vm7, %v680_v26  ;;  %v681_v28 = vpack.c.bf16 %v679_v25, %v679_v25 }
 0x5ac   :  { %5393 = vmatpush3.bf16.msra.mxu0 %v5879_v24  ;;  %5396 = vmatprep.mubr.msk.bf16.mxu0 %vm6061_vm6, %v6060_v13 }
 0x5ad   :  { %5389 = vmatmul.mubr.msk.bf16.vlgmr.msra.gmra.mrb[12].mxu1 %vm565_vm7, %v681_v28  ;;  %5394 = vmatprep.subr.bf16.mxu0 %v6060_v13 }
 0x5ae   :  { %5401 = vmatpush3.bf16.msra.mxu1 %v5880_v27  ;;  %5404 = vmatprep.mubr.msk.bf16.mxu1 %vm6061_vm6, %v6060_v13 }
 0x5af   :  { %5402 = vmatprep.subr.bf16.mxu1 %v6060_v13 }
 0x5b0   :  { %5395 = vmatpush3.bf16.msra.mxu0 %v5881_v29 }
 0x5b1   :  { %5408 = vmatprep.subr.bf16.mxu0 %v6060_v13 }
 0x5b2   :  { %5403 = vmatpush3.bf16.msra.mxu1 %v5882_v30 }
 0x5b3   :  { %5397 = vmatmul.mubr.msk.bf16.vlgmr.msra.gmra.mrb[16].mxu0 %vm112_vm0, %v6272_v5  ;;  %5416 = vmatprep.subr.bf16.mxu1 %v6060_v13 }
 0x5b4   :  { %5409 = vmatpush3.bf16.msra.mxu0 %v5883_v31  ;;  %5412 = vmatprep.mubr.msk.bf16.mxu0 %vm6061_vm6, %v6060_v13 }
 0x5b5   :  { %5405 = vmatmul.mubr.msk.bf16.vlgmr.msra.gmra.mrb[16].mxu1 %vm112_vm0, %v6272_v5  ;;  %5410 = vmatprep.subr.bf16.mxu0 %v6060_v13 }
 0x5b6   :  { %5418 = vmatprep.mubr.msk.bf16.mxu1 %vm6061_vm6, %v6060_v13 }
 0x5b8   :  { %5411 = vmatpush3.bf16.msra.mxu0 %v5884_v32 }
 0x5b9   :  { %5422 = vmatprep.subr.bf16.mxu0 %v6060_v13 }
 0x5bb   :  { %5413 = vmatmul.mubr.msk.bf16.vlgmr.msra.gmra.mrb[20].mxu0 %vm112_vm0, %v6272_v5 }
 0x5bc   :  { %5424 = vmatprep.mubr.msk.bf16.mxu0 %vm6061_vm6, %v6060_v13 }
 0x67e   :  { %v6370_v33 = vpop.f32.mrb[12].mxu0 }
 0x67f   :  { %v5384_v34 = vpop.f32.mrb[13].mxu0 }
 0x680   :  { %v726_v35 = vpop.f32.mrb[14].mxu0  ;;  %v6372_v36 = vpop.f32.mrb[12].mxu1 }
 0x681   :  { %v775_v37 = vpack.c.bf16 %v6372_v36, %v6370_v33  ;;  %v5385_v38 = vpop.f32.mrb[15].mxu0  ;;  %v5390_v39 = vpop.f32.mrb[13].mxu1 }
 0x682   :  { %v772_v40 = vpop.f32.mrb[14].mxu1 }
 0x683   :  { %v5391_v41 = vpop.f32.mrb[15].mxu1 }
 0x686   :  { %v846_v42 = vpop.f32.mrb[16].mxu0 }
 0x687   :  { %v5398_v44 = vpop.f32.mrb[17].mxu0  ;;  %v847_v52 = vadd.f32 %v4833_v45, %v846_v42 }
 0x688   :  { %v849_v46 = vpop.f32.mrb[18].mxu0  ;;  %v909_v47 = vpop.f32.mrb[16].mxu1 }
 0x689   :  { %v910_v48 = vadd.f32 %v4838_v43, %v909_v47  ;;  %v5399_v49 = vpop.f32.mrb[19].mxu0  ;;  %v5406_v50 = vpop.f32.mrb[17].mxu1  ;;  %v850_v59 = vadd.f32 %v4833_v45, %v849_v46  ;;  %v853_v15 = vmul.f32 0.35355338, %v847_v52  ;;  %v4851_v45 = vld [vmem:[%s7142_s9 + $0x4] sm:$0xf] }
 0x68a   :  { %v912_v51 = vpop.f32.mrb[18].mxu1 }
 0x68b   :  { %v979_v53 = vpack.c.bf16 %v910_v48, %v910_v48  ;;  %v913_v54 = vadd.f32 %v4838_v43, %v912_v51  ;;  %v5407_v57 = vpop.f32.mrb[19].mxu1  ;;  %v854_v6 = vmul.f32 0.35355338, %v850_v59  ;;  %v977_v10 = vpack.c.bf16 %v853_v15, %v853_v15  ;;  %v776_v48 = vld [vmem:[%s7142_s9] sm:$0xf] }
 0x68c   :  { %v1198_v51 = vsel %vm685_vm8, %v4851_v45, 0  ;;  %v5886_v57 = vld [vmem:[%s7140_s7 + $0x68] sm:$0xff]   ;;  %v5887_v59 = vld [vmem:[%s7140_s7 + $0x20] sm:$0xff]  }
 0x68d   :  { %v987_v60 = vsel %vm565_vm7, %v979_v53, 0  ;;  %v980_v61 = vpack.c.bf16 %v913_v54, %v913_v54  ;;  %v978_v12 = vpack.c.bf16 %v854_v6, %v854_v6  ;;  %v1245_v53 = vsel %vm685_vm8, %v776_v48, 0  ;;  %v5885_v54 = vld [vmem:[%s7140_s7 + $0x60] sm:$0xff]  }
 0x68e   :  { %v970_v62 = vpop.f32.mrb[20].mxu0  ;;  %5417 = vmatpush3.bf16.xpose.msra.mxu1 %v987_v60 }
 0x68f   :  { %v1033_v63 = vsel %vm565_vm7, %v980_v61, 0  ;;  %v971_v0 = vadd.f32 %v4843_v58, %v970_v62  ;;  %v5414_v1 = vpop.f32.mrb[21].mxu0  ;;  %5428 = vmatprep.subr.bf16.mxu1 %v6060_v13 }
 0x690   :  { %v973_v4 = vpop.f32.mrb[22].mxu0  ;;  %5423 = vmatpush3.bf16.xpose.msra.mxu0 %v1033_v63 }
 0x691   :  { %v981_v7 = vpack.c.bf16 %v971_v0, %v971_v0  ;;  %v974_v8 = vadd.f32 %v4843_v58, %v973_v4  ;;  %v5415_v9 = vpop.f32.mrb[23].mxu0  ;;  %5434 = vmatprep.subr.bf16.mxu0 %v6060_v13  ;;  %v5888_v0 = vld [vmem:[%s7140_s7 + $0x28] sm:$0xff]   ;;  %v5889_v4 = vld [vmem:[%s7140_s7 + $0xa0] sm:$0xff]  }
 0x692   :  { %v5890_v9 = vld [vmem:[%s7140_s7 + $0xa8] sm:$0xff]  }
 0x693   :  { %v982_v11 = vpack.c.bf16 %v974_v8, %v974_v8  ;;  %v1103_v14 = vsel %vm685_vm8, %v981_v7, 0 }
 0x695   :  { %5419 = vmatmul.mubr.msk.bf16.vlgmr.msra.gmra.mrb[20].mxu1 %vm565_vm7, %v977_v10  ;;  %v1149_v16 = vsel %vm685_vm8, %v982_v11, 0  ;;  %v4872_v10 = vld [vmem:[%s7141_s8 + $0x6] ss:$0 sm:$0xff] }
 0x696   :  { %5429 = vmatpush3.bf16.msra.mxu1 %v1103_v14  ;;  %5430 = vmatprep.mubr.msk.bf16.mxu1 %vm6061_vm6, %v6060_v13 }
 0x697   :  { %5425 = vmatmul.mubr.msk.bf16.vlgmr.msra.gmra.mrb[24].mxu0 %vm565_vm7, %v978_v12  ;;  %5440 = vmatprep.subr.bf16.mxu1 %v6060_v13 }
 0x698   :  { %5435 = vmatpush3.bf16.msra.mxu0 %v1149_v16  ;;  %5436 = vmatprep.mubr.msk.bf16.mxu0 %vm6061_vm6, %v6060_v13 }
 0x699   :  { %5446 = vmatprep.subr.bf16.mxu0 %v6060_v13 }
 0x768   :  { %v1023_v17 = vpop.f32.mrb[20].mxu1 }
 0x769   :  { %v1024_v18 = vadd.f32 %v1023_v17, %v6318_v55  ;;  %v5420_v19 = vpop.f32.mrb[21].mxu1 }
 0x76a   :  { %v1026_v20 = vpop.f32.mrb[22].mxu1  ;;  %v1069_v21 = vpop.f32.mrb[24].mxu0 }
 0x76b   :  { %v1070_v22 = vadd.f32 %v1069_v21, %v6320_v56  ;;  %v5421_v23 = vpop.f32.mrb[23].mxu1  ;;  %v5426_v24 = vpop.f32.mrb[25].mxu0  ;;  %v1075_v25 = vsel %vm565_vm7, %v1024_v18, -inf }
 0x76c   :  { %1076 = vmax.xlane.f32.xlu1 %v1075_v25  ;;  %v1072_v26 = vpop.f32.mrb[26].mxu0 }
 0x76d   :  { %v5427_v27 = vpop.f32.mrb[27].mxu0  ;;  %v1078_v28 = vsel %vm565_vm7, %v1070_v22, -inf }
 0x76e   :  { %1079 = vmax.xlane.f32.xlu0 %v1078_v28 }
 0x7f9   :  { %v1077_v29 = vpop.xlane.xlu1 %1076 }
 0x7fa   :  { %v1081_v30 = vsub.f32 %v1024_v18, %v1077_v29  ;;  %v4867_v29 = vld [vmem:[%s7141_s8 + $0x2] ss:$0 sm:$0xff] }
 0x7fb   :  { %v1080_v31 = vpop.xlane.xlu0 %1079 }
 0x7fc   :  { %v1083_v32 = vmul.f32 1.442695, %v1081_v30  ;;  %v1082_v34 = vsub.f32 %v1070_v22, %v1080_v31 }
 0x7fe   :  { %5955 = vpow2.f32 %v1083_v32  ;;  %v1085_v35 = vmul.f32 1.442695, %v1082_v34 }
 0x800   :  { %5957 = vpow2.f32 %v1085_v35 }
 0x808   :  { %v5956_v38 = vpop.eup %5955 }
 0x809   :  { %v1087_v39 = vsel %vm565_vm7, %v5956_v38, 0.0 }
 0x80a   :  { %v5958_v40 = vpop.eup %5957  ;;  %1088 = vadd.xlane.f32.xlu1 %v1087_v39 }
 0x80b   :  { %v1090_v41 = vsel %vm565_vm7, %v5958_v40, 0.0 }
 0x80c   :  { %1091 = vadd.xlane.f32.xlu0 %v1090_v41 }
 0x897   :  { %v1089_v42 = vpop.xlane.xlu1 %1088 }
 0x898   :  { %5959 = vrcp.f32 %v1089_v42  ;;  %v4877_v42 = vld [vmem:[%s7141_s8 + $0xa] ss:$0 sm:$0xff] }
 0x899   :  { %v1092_v43 = vpop.xlane.xlu0 %1091 }
 0x89a   :  { %5961 = vrcp.f32 %v1092_v43 }
 0x8a2   :  { %v5960_v44 = vpop.eup %5959 }
 0x8a3   :  { %v1094_v46 = vmul.f32 %v5960_v44, %v5956_v38 }
 0x8a4   :  { %v5962_v47 = vpop.eup %5961 }
 0x8a5   :  { %v1096_v49 = vmul.f32 %v5962_v47, %v5958_v40  ;;  %v1097_v50 = vpack.c.bf16 %v1094_v46, %v1094_v46 }
 0x8a7   :  { %5431 = vmatmul.mubr.msk.bf16.vlgmr.msra.gmra.mrb[24].mxu1 %vm565_vm7, %v1097_v50  ;;  %v1098_v52 = vpack.c.bf16 %v1096_v49, %v1096_v49 }
 0x8a8   :  { %5441 = vmatpush3.bf16.msra.mxu1 %v1198_v51  ;;  %5442 = vmatprep.mubr.msk.bf16.mxu1 %vm6061_vm6, %v6060_v13 }
 0x8a9   :  { %5437 = vmatmul.mubr.msk.bf16.vlgmr.msra.gmra.mrb[28].mxu0 %vm565_vm7, %v1098_v52  ;;  %5452 = vmatprep.subr.bf16.mxu1 %v6060_v13 }
 0x8aa   :  { %5447 = vmatpush3.bf16.msra.mxu0 %v1245_v53  ;;  %5448 = vmatprep.mubr.msk.bf16.mxu0 %vm6061_vm6, %v6060_v13 }
 0x8ab   :  { %5460 = vmatprep.subr.bf16.mxu0 %v6060_v13 }
 0x8b1   :  { %5449 = vmatmul.mubr.msk.bf16.vlgmr.msra.gmra.mrb[32].mxu0 %vm565_vm7, %v775_v37 }
 0x8b2   :  { %5461 = vmatpush3.bf16.msra.mxu0 %v5885_v54  ;;  %5464 = vmatprep.mubr.msk.bf16.mxu0 %vm6061_vm6, %v6060_v13 }
 0x8b3   :  { %5462 = vmatprep.subr.bf16.mxu0 %v6060_v13 }
 0x8b6   :  { %5463 = vmatpush3.bf16.msra.mxu0 %v5886_v57 }
 0x8b7   :  { %5476 = vmatprep.subr.bf16.mxu0 %v6060_v13 }
 0x8b9   :  { %5465 = vmatmul.mubr.msk.bf16.vlgmr.msra.gmra.mrb[36].mxu0 %vm112_vm0, %v6272_v5 }
 0x8ba   :  { %5478 = vmatprep.mubr.msk.bf16.mxu0 %vm6061_vm6, %v6060_v13 }
 0x97a   :  { %v1139_v33 = vpop.f32.mrb[24].mxu1 }
 0x97b   :  { %v5432_v36 = vpop.f32.mrb[25].mxu1 }
 0x97c   :  { %v1142_v37 = vpop.f32.mrb[26].mxu1  ;;  %v1185_v58 = vpop.f32.mrb[28].mxu0 }
 0x97d   :  { %v1191_v60 = vpack.c.bf16 %v1185_v58, %v1139_v33  ;;  %v5433_v61 = vpop.f32.mrb[27].mxu1  ;;  %v5438_v62 = vpop.f32.mrb[29].mxu0 }
 0x97e   :  { %v1188_v15 = vpop.f32.mrb[30].mxu0 }
 0x97f   :  { %v5439_v63 = vpop.f32.mrb[31].mxu0  ;;  %5443 = vmatmul.mubr.msk.bf16.vlgmr.msra.gmra.mrb[28].mxu1 %vm565_vm7, %v1191_v60 }
 0x980   :  { %5453 = vmatpush3.bf16.msra.mxu1 %v5887_v59  ;;  %5456 = vmatprep.mubr.msk.bf16.mxu1 %vm6061_vm6, %v6060_v13 }
 0x981   :  { %5454 = vmatprep.subr.bf16.mxu1 %v6060_v13 }
 0x984   :  { %5455 = vmatpush3.bf16.msra.mxu1 %v5888_v0  ;;  %v1281_v1 = vpop.f32.mrb[32].mxu0 }
 0x985   :  { %v5450_v6 = vpop.f32.mrb[33].mxu0  ;;  %5468 = vmatprep.subr.bf16.mxu1 %v6060_v13 }
 0x986   :  { %v1284_v7 = vpop.f32.mrb[34].mxu0 }
 0x987   :  { %v5451_v8 = vpop.f32.mrb[35].mxu0  ;;  %5457 = vmatmul.mubr.msk.bf16.vlgmr.msra.gmra.mrb[32].mxu1 %vm112_vm0, %v6272_v5 }
 0x988   :  { %5469 = vmatpush3.bf16.msra.mxu1 %v5889_v4  ;;  %5472 = vmatprep.mubr.msk.bf16.mxu1 %vm6061_vm6, %v6060_v13 }
 0x989   :  { %5470 = vmatprep.subr.bf16.mxu1 %v6060_v13 }
 0x98c   :  { %5471 = vmatpush3.bf16.msra.mxu1 %v5890_v9  ;;  %v1420_v11 = vpop.f32.mrb[36].mxu0 }
 0x98d   :  { %v1421_v12 = vadd.f32 %v4872_v10, %v1420_v11  ;;  %v5466_v14 = vpop.f32.mrb[37].mxu0  ;;  %5482 = vmatprep.subr.bf16.mxu1 %v6060_v13 }
 0x98e   :  { %v1423_v16 = vpop.f32.mrb[38].mxu0 }
 0x98f   :  { %v1490_v17 = vpack.c.bf16 %v1421_v12, %v1421_v12  ;;  %v1424_v18 = vadd.f32 %v4872_v10, %v1423_v16  ;;  %v5467_v19 = vpop.f32.mrb[39].mxu0  ;;  %5473 = vmatmul.mubr.msk.bf16.vlgmr.msra.gmra.mrb[36].mxu1 %vm112_vm0, %v6272_v5 }
 0x990   :  { %5484 = vmatprep.mubr.msk.bf16.mxu1 %vm6061_vm6, %v6060_v13 }
 0x991   :  { %v1498_v20 = vsel %vm565_vm7, %v1490_v17, 0  ;;  %v1491_v21 = vpack.c.bf16 %v1424_v18, %v1424_v18  ;;  %v4885_v18 = vld [vmem:[%s7142_s9 + $0x8] sm:$0xf] }
 0x992   :  { %5477 = vmatpush3.bf16.xpose.msra.mxu0 %v1498_v20 }
 0x993   :  { %v1544_v22 = vsel %vm565_vm7, %v1491_v21, 0  ;;  %5488 = vmatprep.subr.bf16.mxu0 %v6060_v13 }
 0x995   :  { %5483 = vmatpush3.bf16.xpose.msra.mxu1 %v1544_v22 }
 0x996   :  { %5494 = vmatprep.subr.bf16.mxu1 %v6060_v13 }
 0xa52   :  { %v1234_v23 = vpop.f32.mrb[28].mxu1 }
 0xa53   :  { %v6473_v24 = vadd.f32 %v1281_v1, %v1234_v23  ;;  %v5444_v25 = vpop.f32.mrb[29].mxu1  ;;  %v1709_v23 = vsel %vm685_vm8, %v4885_v18, 0 }
 0xa54   :  { %v1237_v26 = vpop.f32.mrb[30].mxu1  ;;  %v5891_v25 = vld [vmem:[%s7140_s7 + $0x30] sm:$0xff]  }
 0xa55   :  { %v6475_v27 = vadd.f32 %v1284_v7, %v1237_v26  ;;  %v5445_v28 = vpop.f32.mrb[31].mxu1 }
 0xa56   :  { %v5892_v28 = vld [vmem:[%s7140_s7 + $0x38] sm:$0xff]  }
 0xa5a   :  { %v1357_v30 = vpop.f32.mrb[32].mxu1 }
 0xa5b   :  { %v1358_v31 = vadd.f32 %v4867_v29, %v1357_v30  ;;  %v5458_v32 = vpop.f32.mrb[33].mxu1  ;;  %v5894_v30 = vld [vmem:[%s7140_s7 + $0xb8] sm:$0xff]  }
 0xa5c   :  { %v1360_v34 = vpop.f32.mrb[34].mxu1 }
 0xa5d   :  { %v1364_v35 = vmul.f32 0.35355338, %v1358_v31  ;;  %v1361_v38 = vadd.f32 %v4867_v29, %v1360_v34  ;;  %v5459_v39 = vpop.f32.mrb[35].mxu1  ;;  %v5893_v29 = vld [vmem:[%s7140_s7 + $0xb0] sm:$0xff]  }
 0xa5f   :  { %v1488_v40 = vpack.c.bf16 %v1364_v35, %v1364_v35  ;;  %v1365_v41 = vmul.f32 0.35355338, %v1361_v38  ;;  %v5895_v38 = vld [vmem:[%s7140_s7 + $0x70] sm:$0xff]  }
 0xa61   :  { %v1489_v43 = vpack.c.bf16 %v1365_v41, %v1365_v41  ;;  %5479 = vmatmul.mubr.msk.bf16.vlgmr.msra.gmra.mrb[40].mxu0 %vm565_vm7, %v1488_v40 }
 0xa62   :  { %v1481_v44 = vpop.f32.mrb[36].mxu1  ;;  %5490 = vmatprep.mubr.msk.bf16.mxu0 %vm6061_vm6, %v6060_v13 }
 0xa63   :  { %v1482_v45 = vadd.f32 %v4877_v42, %v1481_v44  ;;  %v5474_v46 = vpop.f32.mrb[37].mxu1  ;;  %5485 = vmatmul.mubr.msk.bf16.vlgmr.msra.gmra.mrb[40].mxu1 %vm565_vm7, %v1489_v43  ;;  %v5896_v44 = vld [vmem:[%s7140_s7 + $0x78] sm:$0xff]  }
 0xa64   :  { %v1484_v47 = vpop.f32.mrb[38].mxu1  ;;  %5496 = vmatprep.mubr.msk.bf16.mxu1 %vm6061_vm6, %v6060_v13 }
 0xa65   :  { %v1492_v48 = vpack.c.bf16 %v1482_v45, %v1482_v45  ;;  %v1485_v49 = vadd.f32 %v4877_v42, %v1484_v47  ;;  %v5475_v50 = vpop.f32.mrb[39].mxu1 }
 0xa67   :  { %v1614_v51 = vsel %vm685_vm8, %v1492_v48, 0  ;;  %v1493_v52 = vpack.c.bf16 %v1485_v49, %v1485_v49 }
 0xa68   :  { %5489 = vmatpush3.bf16.msra.mxu0 %v1614_v51 }
 0xa69   :  { %v1660_v53 = vsel %vm685_vm8, %v1493_v52, 0  ;;  %5500 = vmatprep.subr.bf16.mxu0 %v6060_v13 }
 0xa6a   :  { %5495 = vmatpush3.bf16.msra.mxu1 %v1660_v53 }
 0xa6b   :  { %5506 = vmatprep.subr.bf16.mxu1 %v6060_v13 }
 0xb34   :  { %v1534_v54 = vpop.f32.mrb[40].mxu0 }
 0xb35   :  { %v1535_v57 = vadd.f32 %v1534_v54, %v6318_v55  ;;  %v5480_v33 = vpop.f32.mrb[41].mxu0 }
 0xb36   :  { %v1537_v36 = vpop.f32.mrb[42].mxu0  ;;  %v1580_v37 = vpop.f32.mrb[40].mxu1 }
 0xb37   :  { %v1581_v58 = vadd.f32 %v1580_v37, %v6320_v56  ;;  %v5481_v59 = vpop.f32.mrb[43].mxu0  ;;  %v5486_v60 = vpop.f32.mrb[41].mxu1  ;;  %v1586_v61 = vsel %vm565_vm7, %v1535_v57, -inf }
 0xb38   :  { %v1583_v62 = vpop.f32.mrb[42].mxu1  ;;  %1587 = vmax.xlane.f32.xlu1 %v1586_v61 }
 0xb39   :  { %v5487_v15 = vpop.f32.mrb[43].mxu1  ;;  %v1589_v63 = vsel %vm565_vm7, %v1581_v58, -inf }
 0xb3a   :  { %1590 = vmax.xlane.f32.xlu0 %v1589_v63 }
 0xbc5   :  { %v1588_v0 = vpop.xlane.xlu1 %1587 }
 0xbc6   :  { %v1592_v1 = vsub.f32 %v1535_v57, %v1588_v0 }
 0xbc7   :  { %v1591_v4 = vpop.xlane.xlu0 %1590 }
 0xbc8   :  { %v1594_v6 = vmul.f32 1.442695, %v1592_v1  ;;  %v1593_v7 = vsub.f32 %v1581_v58, %v1591_v4  ;;  %v4900_v58 = vld [vmem:[%s7141_s8 + $0x3] ss:$0 sm:$0xff] }
 0xbca   :  { %5963 = vpow2.f32 %v1594_v6  ;;  %v1596_v8 = vmul.f32 1.442695, %v1593_v7 }
 0xbcc   :  { %5965 = vpow2.f32 %v1596_v8 }
 0xbd4   :  { %v5964_v9 = vpop.eup %5963 }
 0xbd5   :  { %v1598_v10 = vsel %vm565_vm7, %v5964_v9, 0.0 }
 0xbd6   :  { %v5966_v11 = vpop.eup %5965  ;;  %1599 = vadd.xlane.f32.xlu1 %v1598_v10 }
 0xbd7   :  { %v1601_v12 = vsel %vm565_vm7, %v5966_v11, 0.0 }
 0xbd8   :  { %1602 = vadd.xlane.f32.xlu0 %v1601_v12 }
 0xc63   :  { %v1600_v14 = vpop.xlane.xlu1 %1599 }
 0xc64   :  { %5967 = vrcp.f32 %v1600_v14 }
 0xc65   :  { %v1603_v16 = vpop.xlane.xlu0 %1602 }
 0xc66   :  { %5969 = vrcp.f32 %v1603_v16 }
 0xc6e   :  { %v5968_v17 = vpop.eup %5967 }
 0xc6f   :  { %v1605_v19 = vmul.f32 %v5968_v17, %v5964_v9 }
 0xc70   :  { %v5970_v20 = vpop.eup %5969 }
 0xc71   :  { %v1607_v21 = vmul.f32 %v5970_v20, %v5966_v11  ;;  %v1608_v22 = vpack.c.bf16 %v1605_v19, %v1605_v19 }
 0xc73   :  { %5491 = vmatmul.mubr.msk.bf16.vlgmr.msra.gmra.mrb[44].mxu0 %vm565_vm7, %v1608_v22  ;;  %v1609_v26 = vpack.c.bf16 %v1607_v21, %v1607_v21 }
 0xc74   :  { %5501 = vmatpush3.bf16.msra.mxu0 %v1709_v23  ;;  %5502 = vmatprep.mubr.msk.bf16.mxu0 %vm6061_vm6, %v6060_v13 }
 0xc75   :  { %5497 = vmatmul.mubr.msk.bf16.vlgmr.msra.gmra.mrb[44].mxu1 %vm565_vm7, %v1609_v26  ;;  %5514 = vmatprep.subr.bf16.mxu0 %v6060_v13 }
 0xc76   :  { %5507 = vmatpush3.bf16.msra.mxu1 %v5891_v25  ;;  %5510 = vmatprep.mubr.msk.bf16.mxu1 %vm6061_vm6, %v6060_v13 }
 0xc77   :  { %5508 = vmatprep.subr.bf16.mxu1 %v6060_v13 }
 0xc7a   :  { %5509 = vmatpush3.bf16.msra.mxu1 %v5892_v28 }
 0xc7b   :  { %5522 = vmatprep.subr.bf16.mxu1 %v6060_v13 }
 0xc7d   :  { %5511 = vmatmul.mubr.msk.bf16.vlgmr.msra.gmra.mrb[48].mxu1 %vm112_vm0, %v6272_v5 }
 0xc7e   :  { %5523 = vmatpush3.bf16.msra.mxu1 %v5893_v29  ;;  %5526 = vmatprep.mubr.msk.bf16.mxu1 %vm6061_vm6, %v6060_v13 }
 0xc7f   :  { %5524 = vmatprep.subr.bf16.mxu1 %v6060_v13 }
 0xc82   :  { %5525 = vmatpush3.bf16.msra.mxu1 %v5894_v30 }
 0xc83   :  { %5536 = vmatprep.subr.bf16.mxu1 %v6060_v13 }
 0xc85   :  { %5527 = vmatmul.mubr.msk.bf16.vlgmr.msra.gmra.mrb[52].mxu1 %vm112_vm0, %v6272_v5 }
 0xc86   :  { %5538 = vmatprep.mubr.msk.bf16.mxu1 %vm6061_vm6, %v6060_v13 }
 0xd46   :  { %v1650_v31 = vpop.f32.mrb[44].mxu0 }
 0xd47   :  { %v5492_v32 = vpop.f32.mrb[45].mxu0 }
 0xd48   :  { %v1653_v34 = vpop.f32.mrb[46].mxu0  ;;  %v1696_v35 = vpop.f32.mrb[44].mxu1 }
 0xd49   :  { %v1702_v39 = vpack.c.bf16 %v1696_v35, %v1650_v31  ;;  %v5493_v40 = vpop.f32.mrb[47].mxu0  ;;  %v5498_v41 = vpop.f32.mrb[45].mxu1 }
 0xd4a   :  { %v1699_v42 = vpop.f32.mrb[46].mxu1 }
 0xd4b   :  { %v5499_v43 = vpop.f32.mrb[47].mxu1  ;;  %5503 = vmatmul.mubr.msk.bf16.vlgmr.msra.gmra.mrb[48].mxu0 %vm565_vm7, %v1702_v39 }
 0xd4c   :  { %5515 = vmatpush3.bf16.msra.mxu0 %v5895_v38  ;;  %5518 = vmatprep.mubr.msk.bf16.mxu0 %vm6061_vm6, %v6060_v13 }
 0xd4d   :  { %5516 = vmatprep.subr.bf16.mxu0 %v6060_v13 }
 0xd50   :  { %v1823_v45 = vpop.f32.mrb[48].mxu1  ;;  %5517 = vmatpush3.bf16.msra.mxu0 %v5896_v44 }
 0xd51   :  { %v5512_v46 = vpop.f32.mrb[49].mxu1  ;;  %5530 = vmatprep.subr.bf16.mxu0 %v6060_v13  ;;  %v1824_v15 = vadd.f32 %v4900_v58, %v1823_v45 }
 0xd52   :  { %v1826_v47 = vpop.f32.mrb[50].mxu1 }
 0xd53   :  { %v5513_v48 = vpop.f32.mrb[51].mxu1  ;;  %5519 = vmatmul.mubr.msk.bf16.vlgmr.msra.gmra.mrb[52].mxu0 %vm112_vm0, %v6272_v5  ;;  %v4905_v5 = vld [vmem:[%s7141_s8 + $0x7] ss:$0 sm:$0xff]  ;;  %v1827_v1 = vadd.f32 %v4900_v58, %v1826_v47  ;;  %v1830_v8 = vmul.f32 0.35355338, %v1824_v15 }
 0xd54   :  { %5532 = vmatprep.mubr.msk.bf16.mxu0 %vm6061_vm6, %v6060_v13 }
 0xd55   :  { %v1831_v11 = vmul.f32 0.35355338, %v1827_v1  ;;  %v1954_v14 = vpack.c.bf16 %v1830_v8, %v1830_v8 }
 0xd57   :  { %v1955_v17 = vpack.c.bf16 %v1831_v11, %v1831_v11 }
 0xd58   :  { %v1947_v49 = vpop.f32.mrb[52].mxu1 }
 0xd59   :  { %v5528_v50 = vpop.f32.mrb[53].mxu1 }
 0xd5a   :  { %v1950_v51 = vpop.f32.mrb[54].mxu1  ;;  %v4918_v50 = vld [vmem:[%s7142_s9 + $0xc] sm:$0xf] }
 0xd5b   :  { %v5529_v52 = vpop.f32.mrb[55].mxu1 }
 0xe1e   :  { %v1745_v53 = vpop.f32.mrb[48].mxu0 }
 0xe1f   :  { %v6550_v54 = vadd.f32 %v1745_v53, %v6473_v24  ;;  %v5504_v57 = vpop.f32.mrb[49].mxu0  ;;  %v4910_v24 = vld [vmem:[%s7141_s8 + $0xb] ss:$0 sm:$0xff] }
 0xe20   :  { %v1748_v33 = vpop.f32.mrb[50].mxu0  ;;  %v1948_v4 = vadd.f32 %v4910_v24, %v1947_v49  ;;  %v1951_v9 = vadd.f32 %v4910_v24, %v1950_v51 }
 0xe21   :  { %v6553_v36 = vadd.f32 %v1748_v33, %v6475_v27  ;;  %v5505_v37 = vpop.f32.mrb[51].mxu0  ;;  %v2175_v33 = vsel %vm685_vm8, %v4918_v50, 0  ;;  %v5902_v50 = vld [vmem:[%s7148_s15 + $0x18] sm:$0xff]  }
 0xe22   :  { %v1958_v12 = vpack.c.bf16 %v1948_v4, %v1948_v4  ;;  %v1959_v16 = vpack.c.bf16 %v1951_v9, %v1951_v9 }
 0xe24   :  { %v2080_v18 = vsel %vm685_vm8, %v1958_v12, 0  ;;  %v2126_v19 = vsel %vm685_vm8, %v1959_v16, 0 }
 0xe26   :  { %v1886_v59 = vpop.f32.mrb[52].mxu0 }
 0xe27   :  { %v1887_v60 = vadd.f32 %v4905_v5, %v1886_v59  ;;  %v5520_v61 = vpop.f32.mrb[53].mxu0 }
 0xe28   :  { %v1889_v62 = vpop.f32.mrb[54].mxu0 }
 0xe29   :  { %v1956_v27 = vpack.c.bf16 %v1887_v60, %v1887_v60  ;;  %v1890_v63 = vadd.f32 %v4905_v5, %v1889_v62  ;;  %v5521_v0 = vpop.f32.mrb[55].mxu0 }
 0xe2a   :  { %v4920_v0 = vld [vmem:[%s7143_s10] ss:$0 sm:$0xff] }
 0xe2b   :  { %v1964_v6 = vsel %vm565_vm7, %v1956_v27, 0  ;;  %v1957_v7 = vpack.c.bf16 %v1890_v63, %v1890_v63 }
 0xe2c   :  { %5531 = vmatpush3.bf16.xpose.msra.mxu0 %v1964_v6 }
 0xe2d   :  { %v2010_v10 = vsel %vm565_vm7, %v1957_v7, 0  ;;  %5542 = vmatprep.subr.bf16.mxu0 %v6060_v13 }
 0xe2e   :  { %5537 = vmatpush3.bf16.xpose.msra.mxu1 %v2010_v10 }
 0xe2f   :  { %5548 = vmatprep.subr.bf16.mxu1 %v6060_v13 }
 0xe33   :  { %5533 = vmatmul.mubr.msk.bf16.vlgmr.msra.gmra.mrb[56].mxu0 %vm565_vm7, %v1954_v14 }
 0xe34   :  { %5543 = vmatpush3.bf16.msra.mxu0 %v2080_v18  ;;  %5544 = vmatprep.mubr.msk.bf16.mxu0 %vm6061_vm6, %v6060_v13 }
 0xe35   :  { %5539 = vmatmul.mubr.msk.bf16.vlgmr.msra.gmra.mrb[56].mxu1 %vm565_vm7, %v1955_v17  ;;  %5554 = vmatprep.subr.bf16.mxu0 %v6060_v13 }
 0xe36   :  { %5549 = vmatpush3.bf16.msra.mxu1 %v2126_v19  ;;  %5550 = vmatprep.mubr.msk.bf16.mxu1 %vm6061_vm6, %v6060_v13 }
 0xe37   :  { %5560 = vmatprep.subr.bf16.mxu1 %v6060_v13 }
 0xf06   :  { %v2000_v20 = vpop.f32.mrb[56].mxu0 }
 0xf07   :  { %v2001_v21 = vadd.f32 %v2000_v20, %v6318_v55  ;;  %v5534_v22 = vpop.f32.mrb[57].mxu0 }
 0xf08   :  { %v2003_v23 = vpop.f32.mrb[58].mxu0  ;;  %v2046_v25 = vpop.f32.mrb[56].mxu1 }
 0xf09   :  { %v2047_v26 = vadd.f32 %v2046_v25, %v6320_v56  ;;  %v5535_v28 = vpop.f32.mrb[59].mxu0  ;;  %v5540_v29 = vpop.f32.mrb[57].mxu1  ;;  %v2052_v30 = vsel %vm565_vm7, %v2001_v21, -inf  ;;  %v5898_v25 = vld [vmem:[%s7146_s13 + $0x8] sm:$0xff]  }
 0xf0a   :  { %v2049_v31 = vpop.f32.mrb[58].mxu1  ;;  %2053 = vmax.xlane.f32.xlu1 %v2052_v30 }
 0xf0b   :  { %v5541_v32 = vpop.f32.mrb[59].mxu1  ;;  %v2055_v34 = vsel %vm565_vm7, %v2047_v26, -inf }
 0xf0c   :  { %2056 = vmax.xlane.f32.xlu0 %v2055_v34 }
 0xf97   :  { %v2054_v35 = vpop.xlane.xlu1 %2053 }
 0xf98   :  { %v2058_v38 = vsub.f32 %v2001_v21, %v2054_v35  ;;  %v4921_v35 = vld [vmem:[%s7144_s11] ss:$0 sm:$0xff] }
 0xf99   :  { %v2057_v39 = vpop.xlane.xlu0 %2056 }
 0xf9a   :  { %v2060_v40 = vmul.f32 1.442695, %v2058_v38  ;;  %v2059_v41 = vsub.f32 %v2047_v26, %v2057_v39 }
 0xf9c   :  { %5971 = vpow2.f32 %v2060_v40  ;;  %v2062_v42 = vmul.f32 1.442695, %v2059_v41 }
 0xf9e   :  { %5973 = vpow2.f32 %v2062_v42  ;;  %v4922_v42 = vld [vmem:[%s7145_s12] ss:$0 sm:$0xff] }
 0xfa6   :  { %v5972_v43 = vpop.eup %5971 }
 0xfa7   :  { %v2064_v44 = vsel %vm565_vm7, %v5972_v43, 0.0 }
 0xfa8   :  { %v5974_v45 = vpop.eup %5973  ;;  %2065 = vadd.xlane.f32.xlu1 %v2064_v44 }
 0xfa9   :  { %v2067_v46 = vsel %vm565_vm7, %v5974_v45, 0.0 }
 0xfaa   :  { %2068 = vadd.xlane.f32.xlu0 %v2067_v46 }
0x1035   :  { %v2066_v47 = vpop.xlane.xlu1 %2065 }
0x1036   :  { %5975 = vrcp.f32 %v2066_v47  ;;  %v5899_v47 = vld [vmem:[%s7148_s15] sm:$0xff]  }
0x1037   :  { %v2069_v48 = vpop.xlane.xlu0 %2068 }
0x1038   :  { %5977 = vrcp.f32 %v2069_v48  ;;  %v5900_v48 = vld [vmem:[%s7148_s15 + $0x8] sm:$0xff]  }
0x1040   :  { %v5976_v49 = vpop.eup %5975 }
0x1041   :  { %v2071_v51 = vmul.f32 %v5976_v49, %v5972_v43  ;;  %v5901_v49 = vld [vmem:[%s7148_s15 + $0x10] sm:$0xff]  }
0x1042   :  { %v5978_v52 = vpop.eup %5977 }
0x1043   :  { %v2073_v53 = vmul.f32 %v5978_v52, %v5974_v45  ;;  %v2074_v57 = vpack.c.bf16 %v2071_v51, %v2071_v51  ;;  %v5903_v51 = vld [vmem:[%s7148_s15 + $0x20] sm:$0xff]   ;;  %v5904_v52 = vld [vmem:[%s7148_s15 + $0x28] sm:$0xff]  }
0x1045   :  { %5545 = vmatmul.mubr.msk.bf16.vlgmr.msra.gmra.mrb[60].mxu0 %vm565_vm7, %v2074_v57  ;;  %v2075_v37 = vpack.c.bf16 %v2073_v53, %v2073_v53  ;;  %v5905_v53 = vld [vmem:[%s7148_s15 + $0x30] sm:$0xff]   ;;  %v5906_v57 = vld [vmem:[%s7148_s15 + $0x38] sm:$0xff]  }
0x1046   :  { %5555 = vmatpush3.bf16.msra.mxu0 %v2175_v33  ;;  %5556 = vmatprep.mubr.msk.bf16.mxu0 %vm6061_vm6, %v6060_v13  ;;  %v4923_v33 = vld [vmem:[%s7147_s14] ss:$0 sm:$0xff] }
0x1047   :  { %5551 = vmatmul.mubr.msk.bf16.vlgmr.msra.gmra.mrb[60].mxu1 %vm565_vm7, %v2075_v37  ;;  %5568 = vmatprep.subr.bf16.mxu0 %v6060_v13 }
0x1048   :  { %5564 = vmatprep.mubr.msk.bf16.mxu1 %vm6061_vm6, %v6060_v13 }
0x1118   :  { %v2116_v5 = vpop.f32.mrb[60].mxu0 }
0x1119   :  { %v5546_v58 = vpop.f32.mrb[61].mxu0 }
0x111a   :  { %v2119_v59 = vpop.f32.mrb[62].mxu0  ;;  %v2162_v60 = vpop.f32.mrb[60].mxu1 }
0x111b   :  { %v2168_v61 = vpack.c.bf16 %v2162_v60, %v2116_v5  ;;  %v5547_v24 = vpop.f32.mrb[63].mxu0  ;;  %v5552_v62 = vpop.f32.mrb[61].mxu1 }
0x111c   :  { %v2165_v15 = vpop.f32.mrb[62].mxu1 }
0x111d   :  { %v5553_v27 = vpop.f32.mrb[63].mxu1  ;;  %5557 = vmatmul.mubr.msk.bf16.vlgmr.msra.gmra.mrb[64].mxu0 %vm565_vm7, %v2168_v61 }
0x111e   :  { %5584 = vmatprep.mubr.msk.bf16.mxu0 %vm6061_vm6, %v6060_v13  ;;  %5569 = vmatpush3.bf16.msra.mxu0 %v5899_v47 }
0x111f   :  { %5570 = vmatprep.subr.bf16.mxu0 %v6060_v13 }
0x1122   :  { %5571 = vmatpush3.bf16.msra.mxu0 %v5900_v48 }
0x1123   :  { %5572 = vmatprep.subr.bf16.mxu0 %v6060_v13 }
0x1126   :  { %5573 = vmatpush3.bf16.msra.mxu0 %v5901_v49 }
0x1127   :  { %5574 = vmatprep.subr.bf16.mxu0 %v6060_v13 }
0x112a   :  { %5575 = vmatpush3.bf16.msra.mxu0 %v5902_v50  ;;  %v4936_v50 = vld [vmem:[%s7150_s17] ss:$0 sm:$0xff] }
0x112b   :  { %5576 = vmatprep.subr.bf16.mxu0 %v6060_v13 }
0x112e   :  { %5577 = vmatpush3.bf16.msra.mxu0 %v5903_v51 }
0x112f   :  { %5578 = vmatprep.subr.bf16.mxu0 %v6060_v13 }
0x1132   :  { %5579 = vmatpush3.bf16.msra.mxu0 %v5904_v52 }
0x1133   :  { %5580 = vmatprep.subr.bf16.mxu0 %v6060_v13 }
0x1136   :  { %5581 = vmatpush3.bf16.msra.mxu0 %v5905_v53 }
0x1137   :  { %5582 = vmatprep.subr.bf16.mxu0 %v6060_v13 }
0x113a   :  { %5583 = vmatpush3.bf16.msra.mxu0 %v5906_v57 }
0x113b   :  { %5618 = vmatprep.subr.bf16.mxu0 %v6060_v13 }
0x11f0   :  { %v2211_v63 = vpop.f32.mrb[64].mxu0 }
0x11f1   :  { %v2218_v1 = vadd.f32 %v2211_v63, %v6550_v54  ;;  %v5558_v4 = vpop.f32.mrb[65].mxu0 }
0x11f2   :  { %v2214_v6 = vpop.f32.mrb[66].mxu0 }
0x11f3   :  { %v2227_v7 = vadd.f32 %v4920_v0, %v2218_v1  ;;  %v2219_v8 = vadd.f32 %v2214_v6, %v6553_v36  ;;  %v5559_v9 = vpop.f32.mrb[67].mxu0 }
0x11f5   :  { %v2228_v10 = vadd.f32 %v4920_v0, %v2219_v8  ;;  %v2229_v11 = vadd.f32 %v2227_v7, %v6263_v2 }
0x11f7   :  { %v2233_v12 = vsel %vm112_vm0, %v2229_v11, 0.0  ;;  %v2230_v14 = vadd.f32 %v2228_v10, %v6265_v3  ;;  %v5897_v3 = vld [vmem:[%s7146_s13] sm:$0xff]  }
0x11f8   :  { %2234 = vadd.xlane.f32.xlu1 %v2233_v12  ;;  %5561 = vmatpush3.bf16.msra.mxu1 %v5897_v3 }
0x11f9   :  { %v2236_v16 = vsel %vm112_vm0, %v2230_v14, 0.0  ;;  %5562 = vmatprep.subr.bf16.mxu1 %v6060_v13 }
0x11fa   :  { %2237 = vadd.xlane.f32.xlu0 %v2236_v16 }
0x11fc   :  { %5563 = vmatpush3.bf16.msra.mxu1 %v5898_v25 }
0x11fd   :  { %5588 = vmatprep.subr.bf16.mxu1 %v6060_v13 }
0x1285   :  { %v2235_v17 = vpop.xlane.xlu1 %2234 }
0x1286   :  { %v2239_v18 = vmul.f32 0.03125, %v2235_v17 }
0x1287   :  { %v2238_v54 = vpop.xlane.xlu0 %2237 }
0x1288   :  { %v2241_v19 = vsub.f32 %v2229_v11, %v2239_v18  ;;  %v2240_v20 = vmul.f32 0.03125, %v2238_v54  ;;  %v4927_v54 = vld [vmem:[%s7173_s3] ss:$0 sm:$0xff] }
0x128a   :  { %v2242_v21 = vsub.f32 %v2230_v14, %v2240_v20  ;;  %v2243_v22 = vmul.f32 %v2241_v19, %v2241_v19 }
0x128c   :  { %v2245_v36 = vsel %vm112_vm0, %v2243_v22, 0.0  ;;  %v2244_v23 = vmul.f32 %v2242_v21, %v2242_v21 }
0x128d   :  { %2246 = vadd.xlane.f32.xlu1 %v2245_v36 }
0x128e   :  { %v2248_v2 = vsel %vm112_vm0, %v2244_v23, 0.0 }
0x128f   :  { %2249 = vadd.xlane.f32.xlu0 %v2248_v2 }
0x131a   :  { %v2247_v26 = vpop.xlane.xlu1 %2246 }
0x131b   :  { %v2251_v28 = vmul.f32 0.03125, %v2247_v26 }
0x131c   :  { %v2250_v29 = vpop.xlane.xlu0 %2249 }
0x131d   :  { %v2253_v30 = vadd.f32 1e-05, %v2251_v28  ;;  %v2252_v31 = vmul.f32 0.03125, %v2250_v29 }
0x131f   :  { %5979 = vrsqrt.f32 %v2253_v30  ;;  %v2254_v32 = vadd.f32 1e-05, %v2252_v31 }
0x1321   :  { %5981 = vrsqrt.f32 %v2254_v32 }
0x1329   :  { %v5980_v34 = vpop.eup %5979 }
0x132a   :  { %v2257_v38 = vmul.f32 %v5980_v34, %v2241_v19 }
0x132b   :  { %v5982_v39 = vpop.eup %5981 }
0x132c   :  { %v2265_v40 = vmul.f32 %v4921_v35, %v2257_v38  ;;  %v2258_v41 = vmul.f32 %v5982_v39, %v2242_v21 }
0x132e   :  { %v2266_v43 = vmul.f32 %v4921_v35, %v2258_v41  ;;  %v6623_v44 = vadd.f32 %v4922_v42, %v2265_v40  ;;  %v5907_v41 = vld [vmem:[%s7140_s7 + $0xc0] sm:$0xff]  }
0x1330   :  { %v6625_v45 = vadd.f32 %v4922_v42, %v2266_v43  ;;  %v5908_v42 = vld [vmem:[%s7140_s7 + $0xc8] sm:$0xff]  }
0x1332   :  { %v2279_v46 = vpack.c.bf16 %v6625_v45, %v6623_v44 }
0x1334   :  { %5565 = vmatmul.mubr.msk.bf16.vlgmr.msra.gmra.mrb[64].mxu1 %vm112_vm0, %v2279_v46 }
0x1335   :  { %5592 = vmatprep.mubr.msk.bf16.mxu1 %vm6061_vm6, %v6060_v13  ;;  %5589 = vmatpush3.bf16.msra.mxu1 %v5907_v41 }
0x1336   :  { %5590 = vmatprep.subr.bf16.mxu1 %v6060_v13 }
0x1339   :  { %5591 = vmatpush3.bf16.msra.mxu1 %v5908_v42 }
0x133a   :  { %5596 = vmatprep.subr.bf16.mxu1 %v6060_v13 }
0x1407   :  { %v2336_v37 = vpop.f32.mrb[64].mxu1 }
0x1408   :  { %v2337_v5 = vadd.f32 %v4923_v33, %v2336_v37  ;;  %v5566_v58 = vpop.f32.mrb[65].mxu1 }
0x1409   :  { %v2339_v59 = vpop.f32.mrb[66].mxu1 }
0x140a   :  { %v2345_v60 = vmul.f32 0.044715, %v2337_v5  ;;  %v2340_v61 = vadd.f32 %v4923_v33, %v2339_v59  ;;  %v5567_v24 = vpop.f32.mrb[67].mxu1  ;;  %v2343_v11 = vmul.f32 0.5, %v2337_v5  ;;  %v4937_v33 = vld [vmem:[%s7151_s18] ss:$0 sm:$0xff] }
0x140b   :  { %v5909_v59 = vld [vmem:[%s7140_s7 + $0x100] sm:$0xff]  }
0x140c   :  { %v2347_v62 = vmul.f32 %v2345_v60, %v2337_v5  ;;  %v2346_v15 = vmul.f32 0.044715, %v2340_v61  ;;  %v2344_v12 = vmul.f32 0.5, %v2340_v61  ;;  %v5911_v24 = vld [vmem:[%s7140_s7 + $0x140] sm:$0xff]  }
0x140e   :  { %v2349_v27 = vmul.f32 %v2347_v62, %v2337_v5  ;;  %v2348_v63 = vmul.f32 %v2346_v15, %v2340_v61  ;;  %v5912_v62 = vld [vmem:[%s7140_s7 + $0x148] sm:$0xff]  }
0x1410   :  { %v2351_v0 = vadd.f32 %v2349_v27, %v2337_v5  ;;  %v2350_v1 = vmul.f32 %v2348_v63, %v2340_v61 }
0x1412   :  { %v2353_v4 = vmul.f32 0.7978846, %v2351_v0  ;;  %v2352_v6 = vadd.f32 %v2350_v1, %v2340_v61  ;;  %v5910_v61 = vld [vmem:[%s7140_s7 + $0x108] sm:$0xff]   ;;  %v4956_v1 = vld [vmem:[%s7141_s8 + $0x10] ss:$0 sm:$0xff] }
0x1414   :  { %5983 = vtanh.f32 %v2353_v4  ;;  %v2354_v7 = vmul.f32 0.7978846, %v2352_v6  ;;  %v4951_v4 = vld [vmem:[%s7141_s8 + $0xc] ss:$0 sm:$0xff] }
0x1416   :  { %5985 = vtanh.f32 %v2354_v7 }
0x141e   :  { %v5984_v8 = vpop.eup %5983 }
0x141f   :  { %v2357_v9 = vadd.f32 1.0, %v5984_v8 }
0x1420   :  { %v5986_v10 = vpop.eup %5985 }
0x1421   :  { %v2358_v14 = vadd.f32 1.0, %v5986_v10  ;;  %v2359_v16 = vmul.f32 %v2357_v9, %v2343_v11 }
0x1423   :  { %v2360_v17 = vmul.f32 %v2358_v14, %v2344_v12 }
0x1425   :  { %v2377_v18 = vpack.c.bf16 %v2360_v17, %v2359_v16 }
0x1427   :  { %5585 = vmatmul.mubr.bf16.vlgmr.msra.gmra.mrb[68].mxu0 %v2377_v18 }
0x1428   :  { %5620 = vmatprep.mubr.msk.bf16.mxu0 %vm6061_vm6, %v6060_v13 }
0x14fa   :  { %v2467_v19 = vpop.f32.mrb[68].mxu0 }
0x14fb   :  { %v2468_v20 = vadd.f32 %v4927_v54, %v2467_v19  ;;  %v5586_v21 = vpop.f32.mrb[69].mxu0 }
0x14fc   :  { %v2470_v22 = vpop.f32.mrb[70].mxu0 }
0x14fd   :  { %v2471_v36 = vadd.f32 %v4927_v54, %v2470_v22  ;;  %v5587_v23 = vpop.f32.mrb[71].mxu0  ;;  %v2474_v2 = vadd.f32 %v2468_v20, %v6623_v44  ;;  %v4961_v54 = vld [vmem:[%s7141_s8 + $0x14] ss:$0 sm:$0xff] }
0x14ff   :  { %v2478_v3 = vsel %vm112_vm0, %v2474_v2, 0.0  ;;  %v2475_v25 = vadd.f32 %v2471_v36, %v6625_v45 }
0x1500   :  { %2479 = vadd.xlane.f32.xlu1 %v2478_v3 }
0x1501   :  { %v2481_v26 = vsel %vm112_vm0, %v2475_v25, 0.0 }
0x1502   :  { %2482 = vadd.xlane.f32.xlu0 %v2481_v26 }
0x158d   :  { %v2480_v28 = vpop.xlane.xlu1 %2479 }
0x158e   :  { %v2484_v29 = vmul.f32 0.03125, %v2480_v28 }
0x158f   :  { %v2483_v30 = vpop.xlane.xlu0 %2482 }
0x1590   :  { %v2486_v31 = vsub.f32 %v2474_v2, %v2484_v29  ;;  %v2485_v32 = vmul.f32 0.03125, %v2483_v30 }
0x1592   :  { %v2487_v34 = vsub.f32 %v2475_v25, %v2485_v32  ;;  %v2488_v35 = vmul.f32 %v2486_v31, %v2486_v31 }
0x1594   :  { %v2490_v38 = vsel %vm112_vm0, %v2488_v35, 0.0  ;;  %v2489_v39 = vmul.f32 %v2487_v34, %v2487_v34 }
0x1595   :  { %2491 = vadd.xlane.f32.xlu1 %v2490_v38 }
0x1596   :  { %v2493_v40 = vsel %vm112_vm0, %v2489_v39, 0.0 }
0x1597   :  { %2494 = vadd.xlane.f32.xlu0 %v2493_v40 }
0x1622   :  { %v2492_v43 = vpop.xlane.xlu1 %2491 }
0x1623   :  { %v2496_v44 = vmul.f32 0.03125, %v2492_v43 }
0x1624   :  { %v2495_v45 = vpop.xlane.xlu0 %2494 }
0x1625   :  { %v2498_v46 = vadd.f32 1e-05, %v2496_v44  ;;  %v2497_v47 = vmul.f32 0.03125, %v2495_v45 }
0x1627   :  { %5987 = vrsqrt.f32 %v2498_v46  ;;  %v2499_v48 = vadd.f32 1e-05, %v2497_v47 }
0x1629   :  { %5989 = vrsqrt.f32 %v2499_v48 }
0x1631   :  { %v5988_v49 = vpop.eup %5987 }
0x1632   :  { %v2502_v51 = vmul.f32 %v5988_v49, %v2486_v31 }
0x1633   :  { %v5990_v52 = vpop.eup %5989 }
0x1634   :  { %v2510_v53 = vmul.f32 %v4936_v50, %v2502_v51  ;;  %v2503_v57 = vmul.f32 %v5990_v52, %v2487_v34 }
0x1636   :  { %v2511_v37 = vmul.f32 %v4936_v50, %v2503_v57  ;;  %v6692_v5 = vadd.f32 %v4937_v33, %v2510_v53 }
0x1638   :  { %v6694_v58 = vadd.f32 %v4937_v33, %v2511_v37 }
0x163a   :  { %v6701_v60 = vpack.c.bf16 %v6694_v58, %v6692_v5 }
0x163c   :  { %5593 = vmatmul.mubr.msk.bf16.vlgmr.msra.gmra.mrb[68].mxu1 %vm112_vm0, %v6701_v60 }
0x163d   :  { %5597 = vmatpush3.bf16.msra.mxu1 %v5909_v59  ;;  %5600 = vmatprep.mubr.msk.bf16.mxu1 %vm6061_vm6, %v6060_v13 }
0x163e   :  { %5598 = vmatprep.subr.bf16.mxu1 %v6060_v13 }
0x1641   :  { %5599 = vmatpush3.bf16.msra.mxu1 %v5910_v61 }
0x1642   :  { %5604 = vmatprep.subr.bf16.mxu1 %v6060_v13 }
0x1644   :  { %5601 = vmatmul.mubr.msk.bf16.vlgmr.msra.gmra.mrb[72].mxu1 %vm112_vm0, %v6701_v60 }
0x1645   :  { %5605 = vmatpush3.bf16.msra.mxu1 %v5911_v24  ;;  %5608 = vmatprep.mubr.msk.bf16.mxu1 %vm6061_vm6, %v6060_v13 }
0x1646   :  { %5606 = vmatprep.subr.bf16.mxu1 %v6060_v13 }
0x1649   :  { %5607 = vmatpush3.bf16.msra.mxu1 %v5912_v62 }
0x164a   :  { %5612 = vmatprep.subr.bf16.mxu1 %v6060_v13 }
0x164c   :  { %5609 = vmatmul.mubr.msk.bf16.vlgmr.msra.gmra.mrb[76].mxu1 %vm112_vm0, %v6701_v60 }
0x164d   :  { %5614 = vmatprep.mubr.msk.bf16.mxu1 %vm6061_vm6, %v6060_v13 }
0x170f   :  { %v2593_v15 = vpop.f32.mrb[68].mxu1 }
0x1710   :  { %v5594_v27 = vpop.f32.mrb[69].mxu1  ;;  %v2594_v10 = vadd.f32 %v4951_v4, %v2593_v15 }
0x1711   :  { %v2596_v63 = vpop.f32.mrb[70].mxu1 }
0x1712   :  { %v5595_v0 = vpop.f32.mrb[71].mxu1  ;;  %v2597_v16 = vadd.f32 %v4951_v4, %v2596_v63  ;;  %v2600_v19 = vmul.f32 0.35355338, %v2594_v10  ;;  %v5913_v63 = vld [vmem:[%s7140_s7 + $0xd0] sm:$0xff]   ;;  %v5918_v10 = vld [vmem:[%s7140_s7 + $0x158] sm:$0xff]  }
0x1713   :  { %v5914_v4 = vld [vmem:[%s7140_s7 + $0x110] sm:$0xff]  }
0x1714   :  { %v2601_v22 = vmul.f32 0.35355338, %v2597_v16  ;;  %v2724_v3 = vpack.c.bf16 %v2600_v19, %v2600_v19 }
0x1716   :  { %v2725_v29 = vpack.c.bf16 %v2601_v22, %v2601_v22  ;;  %v4988_v22 = vld [vmem:[%s7141_s8 + $0x11] ss:$0 sm:$0xff] }
0x1717   :  { %v2656_v6 = vpop.f32.mrb[72].mxu1 }
0x1718   :  { %v2657_v7 = vadd.f32 %v4956_v1, %v2656_v6  ;;  %v5602_v8 = vpop.f32.mrb[73].mxu1 }
0x1719   :  { %v2659_v9 = vpop.f32.mrb[74].mxu1  ;;  %v5916_v8 = vld [vmem:[%s7140_s7 + $0x118] sm:$0xff]  }
0x171a   :  { %v2726_v11 = vpack.c.bf16 %v2657_v7, %v2657_v7  ;;  %v2660_v12 = vadd.f32 %v4956_v1, %v2659_v9  ;;  %v5603_v14 = vpop.f32.mrb[75].mxu1  ;;  %v5915_v7 = vld [vmem:[%s7140_s7 + $0xd8] sm:$0xff]   ;;  %v5917_v9 = vld [vmem:[%s7140_s7 + $0x150] sm:$0xff]  }
0x171c   :  { %v2734_v17 = vsel %vm565_vm7, %v2726_v11, 0  ;;  %v2727_v18 = vpack.c.bf16 %v2660_v12, %v2660_v12 }
0x171d   :  { %5613 = vmatpush3.bf16.xpose.msra.mxu1 %v2734_v17 }
0x171e   :  { %v2780_v20 = vsel %vm565_vm7, %v2727_v18, 0  ;;  %5624 = vmatprep.subr.bf16.mxu1 %v6060_v13 }
0x171f   :  { %v2717_v21 = vpop.f32.mrb[76].mxu1  ;;  %5619 = vmatpush3.bf16.xpose.msra.mxu0 %v2780_v20 }
0x1720   :  { %v2718_v36 = vadd.f32 %v4961_v54, %v2717_v21  ;;  %v5610_v23 = vpop.f32.mrb[77].mxu1  ;;  %5630 = vmatprep.subr.bf16.mxu0 %v6060_v13 }
0x1721   :  { %v2720_v2 = vpop.f32.mrb[78].mxu1  ;;  %v4983_v23 = vld [vmem:[%s7141_s8 + $0xd] ss:$0 sm:$0xff] }
0x1722   :  { %v2728_v25 = vpack.c.bf16 %v2718_v36, %v2718_v36  ;;  %v2721_v26 = vadd.f32 %v4961_v54, %v2720_v2  ;;  %v5611_v28 = vpop.f32.mrb[79].mxu1 }
0x1724   :  { %v2850_v30 = vsel %vm685_vm8, %v2728_v25, 0  ;;  %v2729_v31 = vpack.c.bf16 %v2721_v26, %v2721_v26  ;;  %5615 = vmatmul.mubr.msk.bf16.vlgmr.msra.gmra.mrb[80].mxu1 %vm565_vm7, %v2724_v3 }
0x1725   :  { %5625 = vmatpush3.bf16.msra.mxu1 %v2850_v30  ;;  %5626 = vmatprep.mubr.msk.bf16.mxu1 %vm6061_vm6, %v6060_v13 }
0x1726   :  { %v2896_v32 = vsel %vm685_vm8, %v2729_v31, 0  ;;  %5621 = vmatmul.mubr.msk.bf16.vlgmr.msra.gmra.mrb[72].mxu0 %vm565_vm7, %v2725_v29  ;;  %5636 = vmatprep.subr.bf16.mxu1 %v6060_v13 }
0x1727   :  { %5631 = vmatpush3.bf16.msra.mxu0 %v2896_v32  ;;  %5632 = vmatprep.mubr.msk.bf16.mxu0 %vm6061_vm6, %v6060_v13 }
0x1728   :  { %5644 = vmatprep.subr.bf16.mxu0 %v6060_v13 }
0x17f7   :  { %v2770_v34 = vpop.f32.mrb[80].mxu1 }
0x17f8   :  { %v2771_v35 = vadd.f32 %v2770_v34, %v6318_v55  ;;  %v5616_v38 = vpop.f32.mrb[81].mxu1 }
0x17f9   :  { %v2773_v39 = vpop.f32.mrb[82].mxu1  ;;  %v2816_v40 = vpop.f32.mrb[72].mxu0 }
0x17fa   :  { %v2817_v41 = vadd.f32 %v2816_v40, %v6320_v56  ;;  %v5617_v42 = vpop.f32.mrb[83].mxu1  ;;  %v5622_v43 = vpop.f32.mrb[73].mxu0  ;;  %v2822_v44 = vsel %vm565_vm7, %v2771_v35, -inf }
0x17fb   :  { %2823 = vmax.xlane.f32.xlu0 %v2822_v44  ;;  %v2819_v45 = vpop.f32.mrb[74].mxu0 }
0x17fc   :  { %v5623_v46 = vpop.f32.mrb[75].mxu0  ;;  %v2825_v47 = vsel %vm565_vm7, %v2817_v41, -inf }
0x17fd   :  { %2826 = vmax.xlane.f32.xlu1 %v2825_v47 }
0x1888   :  { %v2824_v48 = vpop.xlane.xlu0 %2823 }
0x1889   :  { %v2828_v49 = vsub.f32 %v2771_v35, %v2824_v48  ;;  %v4993_v35 = vld [vmem:[%s7141_s8 + $0x15] ss:$0 sm:$0xff] }
0x188a   :  { %v2827_v50 = vpop.xlane.xlu1 %2826 }
0x188b   :  { %v2830_v51 = vmul.f32 1.442695, %v2828_v49  ;;  %v2829_v52 = vsub.f32 %v2817_v41, %v2827_v50 }
0x188d   :  { %5991 = vpow2.f32 %v2830_v51  ;;  %v2832_v53 = vmul.f32 1.442695, %v2829_v52 }
0x188f   :  { %5993 = vpow2.f32 %v2832_v53 }
0x1897   :  { %v5992_v57 = vpop.eup %5991 }
0x1898   :  { %v2834_v33 = vsel %vm565_vm7, %v5992_v57, 0.0 }
0x1899   :  { %v5994_v37 = vpop.eup %5993  ;;  %2835 = vadd.xlane.f32.xlu0 %v2834_v33 }
0x189a   :  { %v2837_v59 = vsel %vm565_vm7, %v5994_v37, 0.0 }
0x189b   :  { %2838 = vadd.xlane.f32.xlu1 %v2837_v59 }
0x1926   :  { %v2836_v61 = vpop.xlane.xlu0 %2835 }
0x1927   :  { %5995 = vrcp.f32 %v2836_v61 }
0x1928   :  { %v2839_v24 = vpop.xlane.xlu1 %2838 }
0x1929   :  { %5997 = vrcp.f32 %v2839_v24 }
0x1931   :  { %v5996_v62 = vpop.eup %5995 }
0x1932   :  { %v2841_v15 = vmul.f32 %v5996_v62, %v5992_v57 }
0x1933   :  { %v5998_v27 = vpop.eup %5997 }
0x1934   :  { %v2843_v0 = vmul.f32 %v5998_v27, %v5994_v37  ;;  %v2844_v1 = vpack.c.bf16 %v2841_v15, %v2841_v15 }
0x1936   :  { %5627 = vmatmul.mubr.msk.bf16.vlgmr.msra.gmra.mrb[84].mxu1 %vm565_vm7, %v2844_v1  ;;  %v2845_v6 = vpack.c.bf16 %v2843_v0, %v2843_v0 }
0x1937   :  { %5637 = vmatpush3.bf16.msra.mxu1 %v5913_v63  ;;  %5640 = vmatprep.mubr.msk.bf16.mxu1 %vm6061_vm6, %v6060_v13 }
0x1938   :  { %5633 = vmatmul.mubr.msk.bf16.vlgmr.msra.gmra.mrb[76].mxu0 %vm565_vm7, %v2845_v6  ;;  %5638 = vmatprep.subr.bf16.mxu1 %v6060_v13 }
0x1939   :  { %5645 = vmatpush3.bf16.msra.mxu0 %v5914_v4  ;;  %5648 = vmatprep.mubr.msk.bf16.mxu0 %vm6061_vm6, %v6060_v13 }
0x193a   :  { %5646 = vmatprep.subr.bf16.mxu0 %v6060_v13 }
0x193b   :  { %5639 = vmatpush3.bf16.msra.mxu1 %v5915_v7 }
0x193c   :  { %5652 = vmatprep.subr.bf16.mxu1 %v6060_v13 }
0x193d   :  { %5647 = vmatpush3.bf16.msra.mxu0 %v5916_v8 }
0x193e   :  { %5641 = vmatmul.mubr.msk.bf16.vlgmr.msra.gmra.mrb[88].mxu1 %vm112_vm0, %v6701_v60  ;;  %5660 = vmatprep.subr.bf16.mxu0 %v6060_v13 }
0x193f   :  { %5653 = vmatpush3.bf16.msra.mxu1 %v5917_v9  ;;  %5656 = vmatprep.mubr.msk.bf16.mxu1 %vm6061_vm6, %v6060_v13 }
0x1940   :  { %5649 = vmatmul.mubr.msk.bf16.vlgmr.msra.gmra.mrb[80].mxu0 %vm112_vm0, %v6701_v60  ;;  %5654 = vmatprep.subr.bf16.mxu1 %v6060_v13 }
0x1941   :  { %5662 = vmatprep.mubr.msk.bf16.mxu0 %vm6061_vm6, %v6060_v13 }
0x1943   :  { %5655 = vmatpush3.bf16.msra.mxu1 %v5918_v10 }
0x1944   :  { %5666 = vmatprep.subr.bf16.mxu1 %v6060_v13 }
0x1946   :  { %5657 = vmatmul.mubr.msk.bf16.vlgmr.msra.gmra.mrb[92].mxu1 %vm112_vm0, %v6701_v60 }
0x1947   :  { %5668 = vmatprep.mubr.msk.bf16.mxu1 %vm6061_vm6, %v6060_v13 }
0x1a09   :  { %v6799_v11 = vpop.f32.mrb[84].mxu1 }
0x1a0a   :  { %v5628_v12 = vpop.f32.mrb[85].mxu1 }
0x1a0b   :  { %v2889_v14 = vpop.f32.mrb[86].mxu1  ;;  %v6801_v16 = vpop.f32.mrb[76].mxu0 }
0x1a0c   :  { %v2938_v17 = vpack.c.bf16 %v6801_v16, %v6799_v11  ;;  %v5629_v18 = vpop.f32.mrb[87].mxu1  ;;  %v5634_v54 = vpop.f32.mrb[77].mxu0 }
0x1a0d   :  { %v2935_v19 = vpop.f32.mrb[78].mxu0 }
0x1a0e   :  { %v5635_v20 = vpop.f32.mrb[79].mxu0 }
0x1a11   :  { %v3010_v21 = vpop.f32.mrb[88].mxu1 }
0x1a12   :  { %v5642_v36 = vpop.f32.mrb[89].mxu1  ;;  %v3011_v30 = vadd.f32 %v4983_v23, %v3010_v21 }
0x1a13   :  { %v3013_v2 = vpop.f32.mrb[90].mxu1  ;;  %v3073_v3 = vpop.f32.mrb[80].mxu0 }
0x1a14   :  { %v3074_v25 = vadd.f32 %v4988_v22, %v3073_v3  ;;  %v5643_v26 = vpop.f32.mrb[91].mxu1  ;;  %v5650_v28 = vpop.f32.mrb[81].mxu0  ;;  %v3014_v38 = vadd.f32 %v4983_v23, %v3013_v2  ;;  %v3017_v42 = vmul.f32 0.35355338, %v3011_v30  ;;  %v5001_v23 = vld [vmem:[%s7142_s9 + $0x14] sm:$0xf] }
0x1a15   :  { %v3076_v29 = vpop.f32.mrb[82].mxu0 }
0x1a16   :  { %v3143_v31 = vpack.c.bf16 %v3074_v25, %v3074_v25  ;;  %v3077_v32 = vadd.f32 %v4988_v22, %v3076_v29  ;;  %v5651_v34 = vpop.f32.mrb[83].mxu0  ;;  %v3018_v47 = vmul.f32 0.35355338, %v3014_v38  ;;  %v3141_v51 = vpack.c.bf16 %v3017_v42, %v3017_v42  ;;  %v4969_v25 = vld [vmem:[%s7142_s9 + $0x10] sm:$0xf]  ;;  %v5921_v38 = vld [vmem:[%s7140_s7 + $0xe0] sm:$0xff]  }
0x1a17   :  { %v3362_v29 = vsel %vm685_vm8, %v5001_v23, 0  ;;  %v5920_v34 = vld [vmem:[%s7140_s7 + $0x128] sm:$0xff]  }
0x1a18   :  { %v3151_v39 = vsel %vm565_vm7, %v3143_v31, 0  ;;  %v3144_v40 = vpack.c.bf16 %v3077_v32, %v3077_v32  ;;  %v3142_v53 = vpack.c.bf16 %v3018_v47, %v3018_v47  ;;  %v3409_v31 = vsel %vm685_vm8, %v4969_v25, 0  ;;  %v5919_v32 = vld [vmem:[%s7140_s7 + $0x120] sm:$0xff]  }
0x1a19   :  { %v3134_v41 = vpop.f32.mrb[92].mxu1  ;;  %5661 = vmatpush3.bf16.xpose.msra.mxu0 %v3151_v39 }
0x1a1a   :  { %v3197_v43 = vsel %vm565_vm7, %v3144_v40, 0  ;;  %v3135_v44 = vadd.f32 %v4993_v35, %v3134_v41  ;;  %v5658_v45 = vpop.f32.mrb[93].mxu1  ;;  %5672 = vmatprep.subr.bf16.mxu0 %v6060_v13 }
0x1a1b   :  { %v3137_v46 = vpop.f32.mrb[94].mxu1  ;;  %5667 = vmatpush3.bf16.xpose.msra.mxu1 %v3197_v43 }
0x1a1c   :  { %v3145_v48 = vpack.c.bf16 %v3135_v44, %v3135_v44  ;;  %v3138_v49 = vadd.f32 %v4993_v35, %v3137_v46  ;;  %v5659_v50 = vpop.f32.mrb[95].mxu1  ;;  %5678 = vmatprep.subr.bf16.mxu1 %v6060_v13  ;;  %v5922_v44 = vld [vmem:[%s7140_s7 + $0xe8] sm:$0xff]   ;;  %v5923_v46 = vld [vmem:[%s7140_s7 + $0x160] sm:$0xff]  }
0x1a1d   :  { %v5924_v50 = vld [vmem:[%s7140_s7 + $0x168] sm:$0xff]  }
0x1a1e   :  { %v3146_v52 = vpack.c.bf16 %v3138_v49, %v3138_v49  ;;  %v3267_v57 = vsel %vm685_vm8, %v3145_v48, 0 }
0x1a20   :  { %5663 = vmatmul.mubr.msk.bf16.vlgmr.msra.gmra.mrb[84].mxu0 %vm565_vm7, %v3141_v51  ;;  %v3313_v33 = vsel %vm685_vm8, %v3146_v52, 0  ;;  %v5022_v51 = vld [vmem:[%s7141_s8 + $0x12] ss:$0 sm:$0xff] }
0x1a21   :  { %5673 = vmatpush3.bf16.msra.mxu0 %v3267_v57  ;;  %5674 = vmatprep.mubr.msk.bf16.mxu0 %vm6061_vm6, %v6060_v13 }
0x1a22   :  { %5669 = vmatmul.mubr.msk.bf16.vlgmr.msra.gmra.mrb[96].mxu1 %vm565_vm7, %v3142_v53  ;;  %5684 = vmatprep.subr.bf16.mxu0 %v6060_v13 }
0x1a23   :  { %5679 = vmatpush3.bf16.msra.mxu1 %v3313_v33  ;;  %5680 = vmatprep.mubr.msk.bf16.mxu1 %vm6061_vm6, %v6060_v13 }
0x1a24   :  { %5690 = vmatprep.subr.bf16.mxu1 %v6060_v13 }
0x1af3   :  { %v3187_v37 = vpop.f32.mrb[84].mxu0 }
0x1af4   :  { %v3188_v59 = vadd.f32 %v3187_v37, %v6318_v55  ;;  %v5664_v61 = vpop.f32.mrb[85].mxu0 }
0x1af5   :  { %v3190_v24 = vpop.f32.mrb[86].mxu0  ;;  %v3233_v62 = vpop.f32.mrb[96].mxu1 }
0x1af6   :  { %v3234_v15 = vadd.f32 %v3233_v62, %v6320_v56  ;;  %v5665_v27 = vpop.f32.mrb[87].mxu0  ;;  %v5670_v63 = vpop.f32.mrb[97].mxu1  ;;  %v3239_v0 = vsel %vm565_vm7, %v3188_v59, -inf }
0x1af7   :  { %v3236_v1 = vpop.f32.mrb[98].mxu1  ;;  %3240 = vmax.xlane.f32.xlu1 %v3239_v0 }
0x1af8   :  { %v5671_v4 = vpop.f32.mrb[99].mxu1  ;;  %v3242_v6 = vsel %vm565_vm7, %v3234_v15, -inf }
0x1af9   :  { %3243 = vmax.xlane.f32.xlu0 %v3242_v6 }
0x1b84   :  { %v3241_v7 = vpop.xlane.xlu1 %3240 }
0x1b85   :  { %v3245_v8 = vsub.f32 %v3188_v59, %v3241_v7  ;;  %v5017_v7 = vld [vmem:[%s7141_s8 + $0xe] ss:$0 sm:$0xff] }
0x1b86   :  { %v3244_v9 = vpop.xlane.xlu0 %3243 }
0x1b87   :  { %v3247_v10 = vmul.f32 1.442695, %v3245_v8  ;;  %v3246_v12 = vsub.f32 %v3234_v15, %v3244_v9 }
0x1b89   :  { %5999 = vpow2.f32 %v3247_v10  ;;  %v3249_v14 = vmul.f32 1.442695, %v3246_v12 }
0x1b8b   :  { %6001 = vpow2.f32 %v3249_v14 }
0x1b93   :  { %v6000_v18 = vpop.eup %5999 }
0x1b94   :  { %v3251_v54 = vsel %vm565_vm7, %v6000_v18, 0.0 }
0x1b95   :  { %v6002_v19 = vpop.eup %6001  ;;  %3252 = vadd.xlane.f32.xlu1 %v3251_v54 }
0x1b96   :  { %v3254_v20 = vsel %vm565_vm7, %v6002_v19, 0.0 }
0x1b97   :  { %3255 = vadd.xlane.f32.xlu0 %v3254_v20 }
0x1c22   :  { %v3253_v21 = vpop.xlane.xlu1 %3252 }
0x1c23   :  { %6003 = vrcp.f32 %v3253_v21  ;;  %v5027_v21 = vld [vmem:[%s7141_s8 + $0x16] ss:$0 sm:$0xff] }
0x1c24   :  { %v3256_v22 = vpop.xlane.xlu0 %3255 }
0x1c25   :  { %6005 = vrcp.f32 %v3256_v22 }
0x1c2d   :  { %v6004_v36 = vpop.eup %6003 }
0x1c2e   :  { %v3258_v2 = vmul.f32 %v6004_v36, %v6000_v18 }
0x1c2f   :  { %v6006_v3 = vpop.eup %6005 }
0x1c30   :  { %v3260_v26 = vmul.f32 %v6006_v3, %v6002_v19  ;;  %v3261_v28 = vpack.c.bf16 %v3258_v2, %v3258_v2 }
0x1c32   :  { %5675 = vmatmul.mubr.msk.bf16.vlgmr.msra.gmra.mrb[88].mxu0 %vm565_vm7, %v3261_v28  ;;  %v3262_v30 = vpack.c.bf16 %v3260_v26, %v3260_v26 }
0x1c33   :  { %5685 = vmatpush3.bf16.msra.mxu0 %v3362_v29  ;;  %5686 = vmatprep.mubr.msk.bf16.mxu0 %vm6061_vm6, %v6060_v13 }
0x1c34   :  { %5681 = vmatmul.mubr.msk.bf16.vlgmr.msra.gmra.mrb[100].mxu1 %vm565_vm7, %v3262_v30  ;;  %5696 = vmatprep.subr.bf16.mxu0 %v6060_v13 }
0x1c35   :  { %5691 = vmatpush3.bf16.msra.mxu1 %v3409_v31  ;;  %5692 = vmatprep.mubr.msk.bf16.mxu1 %vm6061_vm6, %v6060_v13 }
0x1c36   :  { %5704 = vmatprep.subr.bf16.mxu1 %v6060_v13 }
0x1c3c   :  { %5693 = vmatmul.mubr.msk.bf16.vlgmr.msra.gmra.mrb[104].mxu1 %vm565_vm7, %v2938_v17 }
0x1c3d   :  { %5705 = vmatpush3.bf16.msra.mxu1 %v5919_v32  ;;  %5708 = vmatprep.mubr.msk.bf16.mxu1 %vm6061_vm6, %v6060_v13 }
0x1c3e   :  { %5706 = vmatprep.subr.bf16.mxu1 %v6060_v13 }
0x1c41   :  { %5707 = vmatpush3.bf16.msra.mxu1 %v5920_v34 }
0x1c42   :  { %5720 = vmatprep.subr.bf16.mxu1 %v6060_v13 }
0x1c44   :  { %5709 = vmatmul.mubr.msk.bf16.vlgmr.msra.gmra.mrb[108].mxu1 %vm112_vm0, %v6701_v60 }
0x1c45   :  { %5722 = vmatprep.mubr.msk.bf16.mxu1 %vm6061_vm6, %v6060_v13 }
0x1d05   :  { %v3303_v11 = vpop.f32.mrb[88].mxu0 }
0x1d06   :  { %v5676_v16 = vpop.f32.mrb[89].mxu0 }
0x1d07   :  { %v3306_v17 = vpop.f32.mrb[90].mxu0  ;;  %v3349_v35 = vpop.f32.mrb[100].mxu1 }
0x1d08   :  { %v3355_v39 = vpack.c.bf16 %v3349_v35, %v3303_v11  ;;  %v5677_v40 = vpop.f32.mrb[91].mxu0  ;;  %v5682_v41 = vpop.f32.mrb[101].mxu1 }
0x1d09   :  { %v3352_v42 = vpop.f32.mrb[102].mxu1 }
0x1d0a   :  { %v5683_v43 = vpop.f32.mrb[103].mxu1  ;;  %5687 = vmatmul.mubr.msk.bf16.vlgmr.msra.gmra.mrb[92].mxu0 %vm565_vm7, %v3355_v39 }
0x1d0b   :  { %5697 = vmatpush3.bf16.msra.mxu0 %v5921_v38  ;;  %5700 = vmatprep.mubr.msk.bf16.mxu0 %vm6061_vm6, %v6060_v13 }
0x1d0c   :  { %5698 = vmatprep.subr.bf16.mxu0 %v6060_v13 }
0x1d0f   :  { %5699 = vmatpush3.bf16.msra.mxu0 %v5922_v44  ;;  %v3445_v45 = vpop.f32.mrb[104].mxu1 }
0x1d10   :  { %v5694_v47 = vpop.f32.mrb[105].mxu1  ;;  %5712 = vmatprep.subr.bf16.mxu0 %v6060_v13 }
0x1d11   :  { %v3448_v48 = vpop.f32.mrb[106].mxu1 }
0x1d12   :  { %v5695_v49 = vpop.f32.mrb[107].mxu1  ;;  %5701 = vmatmul.mubr.msk.bf16.vlgmr.msra.gmra.mrb[96].mxu0 %vm112_vm0, %v6701_v60 }
0x1d13   :  { %5713 = vmatpush3.bf16.msra.mxu0 %v5923_v46  ;;  %5716 = vmatprep.mubr.msk.bf16.mxu0 %vm6061_vm6, %v6060_v13 }
0x1d14   :  { %5714 = vmatprep.subr.bf16.mxu0 %v6060_v13 }
0x1d17   :  { %5715 = vmatpush3.bf16.msra.mxu0 %v5924_v50  ;;  %v3584_v52 = vpop.f32.mrb[108].mxu1 }
0x1d18   :  { %v3585_v53 = vadd.f32 %v5022_v51, %v3584_v52  ;;  %v5710_v57 = vpop.f32.mrb[109].mxu1  ;;  %5726 = vmatprep.subr.bf16.mxu0 %v6060_v13 }
0x1d19   :  { %v3587_v33 = vpop.f32.mrb[110].mxu1 }
0x1d1a   :  { %v3654_v37 = vpack.c.bf16 %v3585_v53, %v3585_v53  ;;  %v3588_v59 = vadd.f32 %v5022_v51, %v3587_v33  ;;  %v5711_v61 = vpop.f32.mrb[111].mxu1  ;;  %5717 = vmatmul.mubr.msk.bf16.vlgmr.msra.gmra.mrb[100].mxu0 %vm112_vm0, %v6701_v60 }
0x1d1b   :  { %5728 = vmatprep.mubr.msk.bf16.mxu0 %vm6061_vm6, %v6060_v13 }
0x1d1c   :  { %v3662_v24 = vsel %vm565_vm7, %v3654_v37, 0  ;;  %v3655_v62 = vpack.c.bf16 %v3588_v59, %v3588_v59  ;;  %v5035_v59 = vld [vmem:[%s7142_s9 + $0x18] sm:$0xf] }
0x1d1d   :  { %5721 = vmatpush3.bf16.xpose.msra.mxu1 %v3662_v24 }
0x1d1e   :  { %v3708_v15 = vsel %vm565_vm7, %v3655_v62, 0  ;;  %5732 = vmatprep.subr.bf16.mxu1 %v6060_v13 }
0x1d20   :  { %5727 = vmatpush3.bf16.xpose.msra.mxu0 %v3708_v15 }
0x1d21   :  { %5738 = vmatprep.subr.bf16.mxu0 %v6060_v13 }
0x1ddd   :  { %v3398_v27 = vpop.f32.mrb[92].mxu0 }
0x1dde   :  { %v6902_v63 = vadd.f32 %v3445_v45, %v3398_v27  ;;  %v5688_v0 = vpop.f32.mrb[93].mxu0  ;;  %v3873_v27 = vsel %vm685_vm8, %v5035_v59, 0 }
0x1ddf   :  { %v3401_v1 = vpop.f32.mrb[94].mxu0  ;;  %v5925_v0 = vld [vmem:[%s7140_s7 + $0xf0] sm:$0xff]  }
0x1de0   :  { %v6904_v4 = vadd.f32 %v3448_v48, %v3401_v1  ;;  %v5689_v6 = vpop.f32.mrb[95].mxu0 }
0x1de1   :  { %v5926_v6 = vld [vmem:[%s7140_s7 + $0xf8] sm:$0xff]  }
0x1de5   :  { %v3521_v8 = vpop.f32.mrb[96].mxu0 }
0x1de6   :  { %v3522_v9 = vadd.f32 %v5017_v7, %v3521_v8  ;;  %v5702_v10 = vpop.f32.mrb[97].mxu0  ;;  %v5928_v8 = vld [vmem:[%s7140_s7 + $0x178] sm:$0xff]  }
0x1de7   :  { %v3524_v12 = vpop.f32.mrb[98].mxu0 }
0x1de8   :  { %v3528_v14 = vmul.f32 0.35355338, %v3522_v9  ;;  %v3525_v18 = vadd.f32 %v5017_v7, %v3524_v12  ;;  %v5703_v54 = vpop.f32.mrb[99].mxu0  ;;  %v5927_v7 = vld [vmem:[%s7140_s7 + $0x170] sm:$0xff]  }
0x1dea   :  { %v3652_v19 = vpack.c.bf16 %v3528_v14, %v3528_v14  ;;  %v3529_v20 = vmul.f32 0.35355338, %v3525_v18  ;;  %v5929_v18 = vld [vmem:[%s7140_s7 + $0x130] sm:$0xff]  }
0x1dec   :  { %v3653_v22 = vpack.c.bf16 %v3529_v20, %v3529_v20  ;;  %5723 = vmatmul.mubr.msk.bf16.vlgmr.msra.gmra.mrb[112].mxu1 %vm565_vm7, %v3652_v19 }
0x1ded   :  { %v3645_v36 = vpop.f32.mrb[100].mxu0  ;;  %5734 = vmatprep.mubr.msk.bf16.mxu1 %vm6061_vm6, %v6060_v13 }
0x1dee   :  { %v3646_v23 = vadd.f32 %v5027_v21, %v3645_v36  ;;  %v5718_v2 = vpop.f32.mrb[101].mxu0  ;;  %5729 = vmatmul.mubr.msk.bf16.vlgmr.msra.gmra.mrb[104].mxu0 %vm565_vm7, %v3653_v22  ;;  %v5930_v36 = vld [vmem:[%s7140_s7 + $0x138] sm:$0xff]  }
0x1def   :  { %v3648_v3 = vpop.f32.mrb[102].mxu0  ;;  %5740 = vmatprep.mubr.msk.bf16.mxu0 %vm6061_vm6, %v6060_v13 }
0x1df0   :  { %v3656_v25 = vpack.c.bf16 %v3646_v23, %v3646_v23  ;;  %v3649_v26 = vadd.f32 %v5027_v21, %v3648_v3  ;;  %v5719_v28 = vpop.f32.mrb[103].mxu0 }
0x1df2   :  { %v3778_v29 = vsel %vm685_vm8, %v3656_v25, 0  ;;  %v3657_v30 = vpack.c.bf16 %v3649_v26, %v3649_v26 }
0x1df3   :  { %5733 = vmatpush3.bf16.msra.mxu1 %v3778_v29 }
0x1df4   :  { %v3824_v31 = vsel %vm685_vm8, %v3657_v30, 0  ;;  %5744 = vmatprep.subr.bf16.mxu1 %v6060_v13 }
0x1df5   :  { %5739 = vmatpush3.bf16.msra.mxu0 %v3824_v31 }
0x1df6   :  { %5750 = vmatprep.subr.bf16.mxu0 %v6060_v13 }
0x1ebf   :  { %v3698_v32 = vpop.f32.mrb[112].mxu1 }
0x1ec0   :  { %v3699_v34 = vadd.f32 %v3698_v32, %v6318_v55  ;;  %v5724_v11 = vpop.f32.mrb[113].mxu1 }
0x1ec1   :  { %v3701_v16 = vpop.f32.mrb[114].mxu1  ;;  %v3744_v17 = vpop.f32.mrb[104].mxu0 }
0x1ec2   :  { %v3745_v35 = vadd.f32 %v3744_v17, %v6320_v56  ;;  %v5725_v38 = vpop.f32.mrb[115].mxu1  ;;  %v5730_v39 = vpop.f32.mrb[105].mxu0  ;;  %v3750_v40 = vsel %vm565_vm7, %v3699_v34, -inf }
0x1ec3   :  { %3751 = vmax.xlane.f32.xlu1 %v3750_v40  ;;  %v3747_v41 = vpop.f32.mrb[106].mxu0 }
0x1ec4   :  { %v5731_v42 = vpop.f32.mrb[107].mxu0  ;;  %v3753_v43 = vsel %vm565_vm7, %v3745_v35, -inf }
0x1ec5   :  { %3754 = vmax.xlane.f32.xlu0 %v3753_v43 }
0x1f50   :  { %v3752_v44 = vpop.xlane.xlu1 %3751 }
0x1f51   :  { %v3756_v45 = vsub.f32 %v3699_v34, %v3752_v44 }
0x1f52   :  { %v3755_v46 = vpop.xlane.xlu0 %3754 }
0x1f53   :  { %v3758_v47 = vmul.f32 1.442695, %v3756_v45  ;;  %v3757_v48 = vsub.f32 %v3745_v35, %v3755_v46  ;;  %v5050_v35 = vld [vmem:[%s7141_s8 + $0xf] ss:$0 sm:$0xff] }
0x1f55   :  { %6007 = vpow2.f32 %v3758_v47  ;;  %v3760_v49 = vmul.f32 1.442695, %v3757_v48 }
0x1f57   :  { %6009 = vpow2.f32 %v3760_v49 }
0x1f5f   :  { %v6008_v50 = vpop.eup %6007 }
0x1f60   :  { %v3762_v51 = vsel %vm565_vm7, %v6008_v50, 0.0 }
0x1f61   :  { %v6010_v52 = vpop.eup %6009  ;;  %3763 = vadd.xlane.f32.xlu1 %v3762_v51 }
0x1f62   :  { %v3765_v53 = vsel %vm565_vm7, %v6010_v52, 0.0 }
0x1f63   :  { %3766 = vadd.xlane.f32.xlu0 %v3765_v53 }
0x1fee   :  { %v3764_v57 = vpop.xlane.xlu1 %3763 }
0x1fef   :  { %6011 = vrcp.f32 %v3764_v57 }
0x1ff0   :  { %v3767_v33 = vpop.xlane.xlu0 %3766 }
0x1ff1   :  { %6013 = vrcp.f32 %v3767_v33 }
0x1ff9   :  { %v6012_v37 = vpop.eup %6011 }
0x1ffa   :  { %v3769_v61 = vmul.f32 %v6012_v37, %v6008_v50 }
0x1ffb   :  { %v6014_v24 = vpop.eup %6013 }
0x1ffc   :  { %v3771_v62 = vmul.f32 %v6014_v24, %v6010_v52  ;;  %v3772_v15 = vpack.c.bf16 %v3769_v61, %v3769_v61 }
0x1ffe   :  { %5735 = vmatmul.mubr.msk.bf16.vlgmr.msra.gmra.mrb[116].mxu1 %vm565_vm7, %v3772_v15  ;;  %v3773_v1 = vpack.c.bf16 %v3771_v62, %v3771_v62 }
0x1fff   :  { %5745 = vmatpush3.bf16.msra.mxu1 %v3873_v27  ;;  %5746 = vmatprep.mubr.msk.bf16.mxu1 %vm6061_vm6, %v6060_v13 }
0x2000   :  { %5741 = vmatmul.mubr.msk.bf16.vlgmr.msra.gmra.mrb[108].mxu0 %vm565_vm7, %v3773_v1  ;;  %5758 = vmatprep.subr.bf16.mxu1 %v6060_v13 }
0x2001   :  { %5751 = vmatpush3.bf16.msra.mxu0 %v5925_v0  ;;  %5754 = vmatprep.mubr.msk.bf16.mxu0 %vm6061_vm6, %v6060_v13 }
0x2002   :  { %5752 = vmatprep.subr.bf16.mxu0 %v6060_v13 }
0x2005   :  { %5753 = vmatpush3.bf16.msra.mxu0 %v5926_v6 }
0x2006   :  { %5766 = vmatprep.subr.bf16.mxu0 %v6060_v13 }
0x2008   :  { %5755 = vmatmul.mubr.msk.bf16.vlgmr.msra.gmra.mrb[112].mxu0 %vm112_vm0, %v6701_v60 }
0x2009   :  { %5767 = vmatpush3.bf16.msra.mxu0 %v5927_v7  ;;  %5770 = vmatprep.mubr.msk.bf16.mxu0 %vm6061_vm6, %v6060_v13 }
0x200a   :  { %5768 = vmatprep.subr.bf16.mxu0 %v6060_v13 }
0x200d   :  { %5769 = vmatpush3.bf16.msra.mxu0 %v5928_v8 }
0x200e   :  { %5780 = vmatprep.subr.bf16.mxu0 %v6060_v13 }
0x2010   :  { %5771 = vmatmul.mubr.msk.bf16.vlgmr.msra.gmra.mrb[116].mxu0 %vm112_vm0, %v6701_v60 }
0x2011   :  { %5782 = vmatprep.mubr.msk.bf16.mxu0 %vm6061_vm6, %v6060_v13 }
0x20d1   :  { %v3814_v9 = vpop.f32.mrb[116].mxu1 }
0x20d2   :  { %v5736_v10 = vpop.f32.mrb[117].mxu1 }
0x20d3   :  { %v3817_v12 = vpop.f32.mrb[118].mxu1  ;;  %v3860_v14 = vpop.f32.mrb[108].mxu0 }
0x20d4   :  { %v3866_v54 = vpack.c.bf16 %v3860_v14, %v3814_v9  ;;  %v5737_v19 = vpop.f32.mrb[119].mxu1  ;;  %v5742_v20 = vpop.f32.mrb[109].mxu0 }
0x20d5   :  { %v3863_v21 = vpop.f32.mrb[110].mxu0 }
0x20d6   :  { %v5743_v22 = vpop.f32.mrb[111].mxu0  ;;  %5747 = vmatmul.mubr.msk.bf16.vlgmr.msra.gmra.mrb[120].mxu1 %vm565_vm7, %v3866_v54 }
0x20d7   :  { %5759 = vmatpush3.bf16.msra.mxu1 %v5929_v18  ;;  %5762 = vmatprep.mubr.msk.bf16.mxu1 %vm6061_vm6, %v6060_v13 }
0x20d8   :  { %5760 = vmatprep.subr.bf16.mxu1 %v6060_v13 }
0x20db   :  { %v3987_v23 = vpop.f32.mrb[112].mxu0  ;;  %5761 = vmatpush3.bf16.msra.mxu1 %v5930_v36 }
0x20dc   :  { %v5756_v2 = vpop.f32.mrb[113].mxu0  ;;  %5774 = vmatprep.subr.bf16.mxu1 %v6060_v13  ;;  %v3988_v42 = vadd.f32 %v5050_v35, %v3987_v23 }
0x20dd   :  { %v3990_v3 = vpop.f32.mrb[114].mxu0 }
0x20de   :  { %v5757_v25 = vpop.f32.mrb[115].mxu0  ;;  %5763 = vmatmul.mubr.msk.bf16.vlgmr.msra.gmra.mrb[124].mxu1 %vm112_vm0, %v6701_v60  ;;  %v5055_v60 = vld [vmem:[%s7141_s8 + $0x13] ss:$0 sm:$0xff]  ;;  %v3991_v45 = vadd.f32 %v5050_v35, %v3990_v3  ;;  %v3994_v49 = vmul.f32 0.35355338, %v3988_v42 }
0x20df   :  { %5776 = vmatprep.mubr.msk.bf16.mxu1 %vm6061_vm6, %v6060_v13  ;;  %v5068_v25 = vld [vmem:[%s7142_s9 + $0x1c] sm:$0xf] }
0x20e0   :  { %v3995_v52 = vmul.f32 0.35355338, %v3991_v45  ;;  %v4118_v57 = vpack.c.bf16 %v3994_v49, %v3994_v49 }
0x20e2   :  { %v4119_v37 = vpack.c.bf16 %v3995_v52, %v3995_v52 }
0x20e3   :  { %v4111_v26 = vpop.f32.mrb[116].mxu0 }
0x20e4   :  { %v5772_v28 = vpop.f32.mrb[117].mxu0 }
0x20e5   :  { %v4114_v29 = vpop.f32.mrb[118].mxu0 }
0x20e6   :  { %v5773_v30 = vpop.f32.mrb[119].mxu0 }
0x21a9   :  { %v3909_v31 = vpop.f32.mrb[120].mxu1 }
0x21aa   :  { %v6979_v32 = vadd.f32 %v3909_v31, %v6902_v63  ;;  %v5748_v34 = vpop.f32.mrb[121].mxu1  ;;  %v5060_v63 = vld [vmem:[%s7141_s8 + $0x17] ss:$0 sm:$0xff]  ;;  %v4339_v31 = vsel %vm685_vm8, %v5068_v25, 0  ;;  %v5938_v25 = vld [vmem:[%s7148_s15 + $0x68] sm:$0xff]  }
0x21ab   :  { %v3912_v11 = vpop.f32.mrb[122].mxu1  ;;  %v4112_v46 = vadd.f32 %v5060_v63, %v4111_v26  ;;  %v4115_v50 = vadd.f32 %v5060_v63, %v4114_v29 }
0x21ac   :  { %v6982_v16 = vadd.f32 %v3912_v11, %v6904_v4  ;;  %v5749_v17 = vpop.f32.mrb[123].mxu1 }
0x21ad   :  { %v4122_v53 = vpack.c.bf16 %v4112_v46, %v4112_v46  ;;  %v4123_v33 = vpack.c.bf16 %v4115_v50, %v4115_v50 }
0x21af   :  { %v4244_v59 = vsel %vm685_vm8, %v4122_v53, 0  ;;  %v4290_v61 = vsel %vm685_vm8, %v4123_v33, 0 }
0x21b1   :  { %v4050_v38 = vpop.f32.mrb[124].mxu1 }
0x21b2   :  { %v4051_v39 = vadd.f32 %v5055_v60, %v4050_v38  ;;  %v5764_v40 = vpop.f32.mrb[125].mxu1 }
0x21b3   :  { %v4053_v41 = vpop.f32.mrb[126].mxu1 }
0x21b4   :  { %v4120_v4 = vpack.c.bf16 %v4051_v39, %v4051_v39  ;;  %v4054_v43 = vadd.f32 %v5055_v60, %v4053_v41  ;;  %v5765_v44 = vpop.f32.mrb[127].mxu1 }
0x21b6   :  { %v4128_v47 = vsel %vm565_vm7, %v4120_v4, 0  ;;  %v4121_v48 = vpack.c.bf16 %v4054_v43, %v4054_v43  ;;  %v5071_v4 = vld [vmem:[%s7143_s10 + $0x1] ss:$0 sm:$0xff] }
0x21b7   :  { %5775 = vmatpush3.bf16.xpose.msra.mxu1 %v4128_v47 }
0x21b8   :  { %v4174_v51 = vsel %vm565_vm7, %v4121_v48, 0  ;;  %5786 = vmatprep.subr.bf16.mxu1 %v6060_v13 }
0x21b9   :  { %5781 = vmatpush3.bf16.xpose.msra.mxu0 %v4174_v51 }
0x21ba   :  { %5792 = vmatprep.subr.bf16.mxu0 %v6060_v13 }
0x21be   :  { %5777 = vmatmul.mubr.msk.bf16.vlgmr.msra.gmra.mrb[128].mxu1 %vm565_vm7, %v4118_v57 }
0x21bf   :  { %5787 = vmatpush3.bf16.msra.mxu1 %v4244_v59  ;;  %5788 = vmatprep.mubr.msk.bf16.mxu1 %vm6061_vm6, %v6060_v13 }
0x21c0   :  { %5783 = vmatmul.mubr.msk.bf16.vlgmr.msra.gmra.mrb[120].mxu0 %vm565_vm7, %v4119_v37  ;;  %5798 = vmatprep.subr.bf16.mxu1 %v6060_v13 }
0x21c1   :  { %5793 = vmatpush3.bf16.msra.mxu0 %v4290_v61  ;;  %5794 = vmatprep.mubr.msk.bf16.mxu0 %vm6061_vm6, %v6060_v13 }
0x21c2   :  { %5804 = vmatprep.subr.bf16.mxu0 %v6060_v13 }
0x2291   :  { %v4164_v24 = vpop.f32.mrb[128].mxu1 }
0x2292   :  { %v4165_v62 = vadd.f32 %v4164_v24, %v6318_v55  ;;  %v5778_v15 = vpop.f32.mrb[129].mxu1 }
0x2293   :  { %v4167_v27 = vpop.f32.mrb[130].mxu1  ;;  %v4210_v0 = vpop.f32.mrb[120].mxu0  ;;  %v5932_v15 = vld [vmem:[%s7146_s13 + $0x18] sm:$0xff]  }
0x2294   :  { %v4211_v1 = vadd.f32 %v4210_v0, %v6320_v56  ;;  %v5779_v6 = vpop.f32.mrb[131].mxu1  ;;  %v5784_v7 = vpop.f32.mrb[121].mxu0  ;;  %v4216_v8 = vsel %vm565_vm7, %v4165_v62, -inf }
0x2295   :  { %4217 = vmax.xlane.f32.xlu1 %v4216_v8  ;;  %v4213_v9 = vpop.f32.mrb[122].mxu0 }
0x2296   :  { %v5785_v10 = vpop.f32.mrb[123].mxu0  ;;  %v4219_v12 = vsel %vm565_vm7, %v4211_v1, -inf }
0x2297   :  { %4220 = vmax.xlane.f32.xlu0 %v4219_v12  ;;  %v5074_v10 = vld [vmem:[%s7144_s11 + $0x1] ss:$0 sm:$0xff] }
0x2322   :  { %v4218_v14 = vpop.xlane.xlu1 %4217 }
0x2323   :  { %v4222_v18 = vsub.f32 %v4165_v62, %v4218_v14 }
0x2324   :  { %v4221_v54 = vpop.xlane.xlu0 %4220 }
0x2325   :  { %v4224_v19 = vmul.f32 1.442695, %v4222_v18  ;;  %v4223_v55 = vsub.f32 %v4211_v1, %v4221_v54 }
0x2327   :  { %6015 = vpow2.f32 %v4224_v19  ;;  %v4226_v20 = vmul.f32 1.442695, %v4223_v55  ;;  %v5075_v19 = vld [vmem:[%s7145_s12 + $0x1] ss:$0 sm:$0xff] }
0x2329   :  { %6017 = vpow2.f32 %v4226_v20 }
0x2331   :  { %v6016_v21 = vpop.eup %6015 }
0x2332   :  { %v4228_v56 = vsel %vm565_vm7, %v6016_v21, 0.0 }
0x2333   :  { %v6018_v22 = vpop.eup %6017  ;;  %4229 = vadd.xlane.f32.xlu1 %v4228_v56 }
0x2334   :  { %v4231_v36 = vsel %vm565_vm7, %v6018_v22, 0.0 }
0x2335   :  { %4232 = vadd.xlane.f32.xlu0 %v4231_v36  ;;  %v5934_v36 = vld [vmem:[%s7148_s15 + $0x48] sm:$0xff]  }
0x23c0   :  { %v4230_v23 = vpop.xlane.xlu1 %4229 }
0x23c1   :  { %6019 = vrcp.f32 %v4230_v23  ;;  %v5935_v23 = vld [vmem:[%s7148_s15 + $0x50] sm:$0xff]  }
0x23c2   :  { %v4233_v2 = vpop.xlane.xlu0 %4232 }
0x23c3   :  { %6021 = vrcp.f32 %v4233_v2  ;;  %v5936_v2 = vld [vmem:[%s7148_s15 + $0x58] sm:$0xff]  }
0x23cb   :  { %v6020_v3 = vpop.eup %6019 }
0x23cc   :  { %v4235_v26 = vmul.f32 %v6020_v3, %v6016_v21  ;;  %v5937_v3 = vld [vmem:[%s7148_s15 + $0x60] sm:$0xff]  }
0x23cd   :  { %v6022_v28 = vpop.eup %6021 }
0x23ce   :  { %v4237_v29 = vmul.f32 %v6022_v28, %v6018_v22  ;;  %v4238_v30 = vpack.c.bf16 %v4235_v26, %v4235_v26  ;;  %v5933_v22 = vld [vmem:[%s7148_s15 + $0x40] sm:$0xff]   ;;  %v5939_v26 = vld [vmem:[%s7148_s15 + $0x70] sm:$0xff]   ;;  %v5940_v28 = vld [vmem:[%s7148_s15 + $0x78] sm:$0xff]  }
0x23d0   :  { %5789 = vmatmul.mubr.msk.bf16.vlgmr.msra.gmra.mrb[132].mxu1 %vm565_vm7, %v4238_v30  ;;  %v4239_v34 = vpack.c.bf16 %v4237_v29, %v4237_v29  ;;  %v5081_v29 = vld [vmem:[%s7147_s14 + $0x1] ss:$0 sm:$0xff] }
0x23d1   :  { %5799 = vmatpush3.bf16.msra.mxu1 %v4339_v31  ;;  %5800 = vmatprep.mubr.msk.bf16.mxu1 %vm6061_vm6, %v6060_v13 }
0x23d2   :  { %5795 = vmatmul.mubr.msk.bf16.vlgmr.msra.gmra.mrb[124].mxu0 %vm565_vm7, %v4239_v34  ;;  %5812 = vmatprep.subr.bf16.mxu1 %v6060_v13 }
0x23d3   :  { %5808 = vmatprep.mubr.msk.bf16.mxu0 %vm6061_vm6, %v6060_v13 }
0x24a3   :  { %v4280_v11 = vpop.f32.mrb[132].mxu1 }
0x24a4   :  { %v5790_v17 = vpop.f32.mrb[133].mxu1 }
0x24a5   :  { %v4283_v60 = vpop.f32.mrb[134].mxu1  ;;  %v4326_v35 = vpop.f32.mrb[124].mxu0 }
0x24a6   :  { %v4332_v38 = vpack.c.bf16 %v4326_v35, %v4280_v11  ;;  %v5791_v39 = vpop.f32.mrb[135].mxu1  ;;  %v5796_v40 = vpop.f32.mrb[125].mxu0 }
0x24a7   :  { %v4329_v63 = vpop.f32.mrb[126].mxu0 }
0x24a8   :  { %v5797_v41 = vpop.f32.mrb[127].mxu0  ;;  %5801 = vmatmul.mubr.msk.bf16.vlgmr.msra.gmra.mrb[136].mxu1 %vm565_vm7, %v4332_v38 }
0x24a9   :  { %5828 = vmatprep.mubr.msk.bf16.mxu1 %vm6061_vm6, %v6060_v13  ;;  %5813 = vmatpush3.bf16.msra.mxu1 %v5933_v22 }
0x24aa   :  { %5814 = vmatprep.subr.bf16.mxu1 %v6060_v13 }
0x24ad   :  { %5815 = vmatpush3.bf16.msra.mxu1 %v5934_v36  ;;  %v5113_v36 = vld [vmem:[%s7150_s17 + $0x1] ss:$0 sm:$0xff] }
0x24ae   :  { %5816 = vmatprep.subr.bf16.mxu1 %v6060_v13 }
0x24b1   :  { %5817 = vmatpush3.bf16.msra.mxu1 %v5935_v23 }
0x24b2   :  { %5818 = vmatprep.subr.bf16.mxu1 %v6060_v13 }
0x24b5   :  { %5819 = vmatpush3.bf16.msra.mxu1 %v5936_v2 }
0x24b6   :  { %5820 = vmatprep.subr.bf16.mxu1 %v6060_v13 }
0x24b9   :  { %5821 = vmatpush3.bf16.msra.mxu1 %v5937_v3 }
0x24ba   :  { %5822 = vmatprep.subr.bf16.mxu1 %v6060_v13 }
0x24bd   :  { %5823 = vmatpush3.bf16.msra.mxu1 %v5938_v25 }
0x24be   :  { %5824 = vmatprep.subr.bf16.mxu1 %v6060_v13 }
0x24c1   :  { %5825 = vmatpush3.bf16.msra.mxu1 %v5939_v26 }
0x24c2   :  { %5826 = vmatprep.subr.bf16.mxu1 %v6060_v13 }
0x24c5   :  { %5827 = vmatpush3.bf16.msra.mxu1 %v5940_v28 }
0x257b   :  { %v4375_v42 = vpop.f32.mrb[136].mxu1 }
0x257c   :  { %v4382_v43 = vadd.f32 %v4375_v42, %v6979_v32  ;;  %v5802_v44 = vpop.f32.mrb[137].mxu1 }
0x257d   :  { %v4378_v45 = vpop.f32.mrb[138].mxu1 }
0x257e   :  { %v4392_v46 = vadd.f32 %v5071_v4, %v4382_v43  ;;  %v4383_v47 = vadd.f32 %v4378_v45, %v6982_v16  ;;  %v5803_v48 = vpop.f32.mrb[139].mxu1 }
0x2580   :  { %v4393_v49 = vadd.f32 %v5071_v4, %v4383_v47  ;;  %v4394_v50 = vadd.f32 %v4392_v46, %v6692_v5 }
0x2582   :  { %v4400_v51 = vsel %vm112_vm0, %v4394_v50, 0.0  ;;  %v4395_v52 = vadd.f32 %v4393_v49, %v6694_v58  ;;  %v5931_v58 = vld [vmem:[%s7146_s13 + $0x10] sm:$0xff]  }
0x2583   :  { %4401 = vadd.xlane.f32.xlu1 %v4400_v51  ;;  %5805 = vmatpush3.bf16.msra.mxu0 %v5931_v58 }
0x2584   :  { %v4403_v53 = vsel %vm112_vm0, %v4395_v52, 0.0  ;;  %5806 = vmatprep.subr.bf16.mxu0 %v6060_v13 }
0x2585   :  { %4404 = vadd.xlane.f32.xlu0 %v4403_v53 }
0x2587   :  { %5807 = vmatpush3.bf16.msra.mxu0 %v5932_v15 }
0x2588   :  { %5832 = vmatprep.subr.bf16.mxu0 %v6060_v13 }
0x2610   :  { %v4402_v57 = vpop.xlane.xlu1 %4401 }
0x2611   :  { %v4406_v33 = vmul.f32 0.03125, %v4402_v57  ;;  %v5102_v57 = vld [vmem:[%s7173_s3 + $0x1] ss:$0 sm:$0xff] }
0x2612   :  { %v4405_v32 = vpop.xlane.xlu0 %4404 }
0x2613   :  { %v4408_v37 = vsub.f32 %v4394_v50, %v4406_v33  ;;  %v4407_v59 = vmul.f32 0.03125, %v4405_v32 }
0x2615   :  { %v4409_v61 = vsub.f32 %v4395_v52, %v4407_v59  ;;  %v4410_v24 = vmul.f32 %v4408_v37, %v4408_v37 }
0x2617   :  { %v4412_v16 = vsel %vm112_vm0, %v4410_v24, 0.0  ;;  %v4411_v62 = vmul.f32 %v4409_v61, %v4409_v61 }
0x2618   :  { %4413 = vadd.xlane.f32.xlu1 %v4412_v16 }
0x2619   :  { %v4415_v5 = vsel %vm112_vm0, %v4411_v62, 0.0 }
0x261a   :  { %4416 = vadd.xlane.f32.xlu0 %v4415_v5 }
0x26a5   :  { %v4414_v27 = vpop.xlane.xlu1 %4413 }
0x26a6   :  { %v4418_v0 = vmul.f32 0.03125, %v4414_v27 }
0x26a7   :  { %v4417_v1 = vpop.xlane.xlu0 %4416 }
0x26a8   :  { %v4420_v6 = vadd.f32 1e-05, %v4418_v0  ;;  %v4419_v7 = vmul.f32 0.03125, %v4417_v1 }
0x26aa   :  { %6023 = vrsqrt.f32 %v4420_v6  ;;  %v4421_v8 = vadd.f32 1e-05, %v4419_v7 }
0x26ac   :  { %6025 = vrsqrt.f32 %v4421_v8 }
0x26b4   :  { %v6024_v9 = vpop.eup %6023 }
0x26b5   :  { %v4424_v12 = vmul.f32 %v6024_v9, %v4408_v37 }
0x26b6   :  { %v6026_v14 = vpop.eup %6025 }
0x26b7   :  { %v4432_v18 = vmul.f32 %v5074_v10, %v4424_v12  ;;  %v4425_v54 = vmul.f32 %v6026_v14, %v4409_v61  ;;  %v5941_v14 = vld [vmem:[%s7152_s19] sm:$0xff]  }
0x26b9   :  { %v4433_v55 = vmul.f32 %v5074_v10, %v4425_v54  ;;  %v7052_v20 = vadd.f32 %v5075_v19, %v4432_v18  ;;  %v5942_v18 = vld [vmem:[%s7152_s19 + $0x8] sm:$0xff]  }
0x26bb   :  { %v7054_v21 = vadd.f32 %v5075_v19, %v4433_v55 }
0x26bd   :  { %v4447_v56 = vpack.c.bf16 %v7054_v21, %v7052_v20 }
0x26bf   :  { %5809 = vmatmul.mubr.msk.bf16.vlgmr.msra.gmra.mrb[128].mxu0 %vm112_vm0, %v4447_v56 }
0x26c0   :  { %5836 = vmatprep.mubr.msk.bf16.mxu0 %vm6061_vm6, %v6060_v13  ;;  %5833 = vmatpush3.bf16.msra.mxu0 %v5941_v14 }
0x26c1   :  { %5834 = vmatprep.subr.bf16.mxu0 %v6060_v13  ;;  %v5114_v13 = vld [vmem:[%s7151_s18 + $0x1] ss:$0 sm:$0xff]  ;;  %s6063_s18 = smov [#allocation2]  }
0x26c2   :  { %s4776_s12 = sshll.u32 %s6063_s18, 4  ;;  %s4777_s12 = int_to_ptr.vmem [resolvable:$true] %s4776_s12 }
0x26c3   :  { %s6035_s1 = scalar_lea.vmem %s4777_s12, 32  ;;  %p6040_p1 = scmp.lt.s32.totalorder %s4777_s12, %s4777_s12 }
0x26c4   :  { %5835 = vmatpush3.bf16.msra.mxu0 %v5942_v18  ;;  %p6036_p0 = scmp.ne.s32.totalorder %s4777_s12, %s6035_s1  ;;  %p6041_p2 = scmp.lt.s32.totalorder %s6035_s1, %s6035_s1 }
0x26c6   :  { %p6042_p3 = por %p6041_p2, %p6040_p1 }
0x26c8   :  { %p6043_p4 = pnand %p6042_p3, %p6036_p0 }
0x2792   :  { %v4505_v30 = vpop.f32.mrb[128].mxu0 }
0x2793   :  { %v4506_v31 = vadd.f32 %v5081_v29, %v4505_v30  ;;  %v5810_v34 = vpop.f32.mrb[129].mxu0 }
0x2794   :  { %v4508_v11 = vpop.f32.mrb[130].mxu0 }
0x2795   :  { %v4514_v17 = vmul.f32 0.044715, %v4506_v31  ;;  %v4509_v60 = vadd.f32 %v5081_v29, %v4508_v11  ;;  %v5811_v35 = vpop.f32.mrb[131].mxu0  ;;  %v4512_v48 = vmul.f32 0.5, %v4506_v31 }
0x2797   :  { %v4516_v38 = vmul.f32 %v4514_v17, %v4506_v31  ;;  %v4515_v39 = vmul.f32 0.044715, %v4509_v60  ;;  %v4513_v49 = vmul.f32 0.5, %v4509_v60 }
0x2799   :  { %v4518_v40 = vmul.f32 %v4516_v38, %v4506_v31  ;;  %v4517_v63 = vmul.f32 %v4515_v39, %v4509_v60  ;;  %v5115_v38 = vld [vmem:[%s7153_s20] ss:$0 sm:$0xff] }
0x279b   :  { %v4520_v41 = vadd.f32 %v4518_v40, %v4506_v31  ;;  %v4519_v42 = vmul.f32 %v4517_v63, %v4509_v60 }
0x279d   :  { %v4522_v4 = vmul.f32 0.7978846, %v4520_v41  ;;  %v4521_v43 = vadd.f32 %v4519_v42, %v4509_v60 }
0x279f   :  { %6027 = vtanh.f32 %v4522_v4  ;;  %v4523_v44 = vmul.f32 0.7978846, %v4521_v43 }
0x27a1   :  { %6029 = vtanh.f32 %v4523_v44 }
0x27a9   :  { %v6028_v45 = vpop.eup %6027 }
0x27aa   :  { %v4526_v46 = vadd.f32 1.0, %v6028_v45 }
0x27ab   :  { %v6030_v47 = vpop.eup %6029 }
0x27ac   :  { %v4527_v50 = vadd.f32 1.0, %v6030_v47  ;;  %v4528_v51 = vmul.f32 %v4526_v46, %v4512_v48 }
0x27ae   :  { %v4529_v52 = vmul.f32 %v4527_v50, %v4513_v49 }
0x27b0   :  { %v4547_v53 = vpack.c.bf16 %v4529_v52, %v4528_v51 }
0x27b2   :  { %5829 = vmatmul.mubr.bf16.vlgmr.msra.gmra.mrb[140].mxu1 %v4547_v53 }
0x2885   :  { %v4638_v33 = vpop.f32.mrb[140].mxu1 }
0x2886   :  { %v4639_v32 = vadd.f32 %v5102_v57, %v4638_v33  ;;  %v5830_v37 = vpop.f32.mrb[141].mxu1 }
0x2887   :  { %v4641_v59 = vpop.f32.mrb[142].mxu1 }
0x2888   :  { %v4642_v61 = vadd.f32 %v5102_v57, %v4641_v59  ;;  %v5831_v24 = vpop.f32.mrb[143].mxu1  ;;  %v4645_v16 = vadd.f32 %v4639_v32, %v7052_v20 }
0x288a   :  { %v4651_v62 = vsel %vm112_vm0, %v4645_v16, 0.0  ;;  %v4646_v5 = vadd.f32 %v4642_v61, %v7054_v21 }
0x288b   :  { %4652 = vadd.xlane.f32.xlu0 %v4651_v62 }
0x288c   :  { %v4654_v58 = vsel %vm112_vm0, %v4646_v5, 0.0 }
0x288d   :  { %4655 = vadd.xlane.f32.xlu1 %v4654_v58 }
0x2918   :  { %v4653_v15 = vpop.xlane.xlu0 %4652 }
0x2919   :  { %v4657_v27 = vmul.f32 0.03125, %v4653_v15 }
0x291a   :  { %v4656_v0 = vpop.xlane.xlu1 %4655 }
0x291b   :  { %v4659_v1 = vsub.f32 %v4645_v16, %v4657_v27  ;;  %v4658_v6 = vmul.f32 0.03125, %v4656_v0 }
0x291d   :  { %v4660_v7 = vsub.f32 %v4646_v5, %v4658_v6  ;;  %v4661_v8 = vmul.f32 %v4659_v1, %v4659_v1 }
0x291f   :  { %v4663_v9 = vsel %vm112_vm0, %v4661_v8, 0.0  ;;  %v4662_v10 = vmul.f32 %v4660_v7, %v4660_v7 }
0x2920   :  { %4664 = vadd.xlane.f32.xlu0 %v4663_v9 }
0x2921   :  { %v4666_v12 = vsel %vm112_vm0, %v4662_v10, 0.0 }
0x2922   :  { %4667 = vadd.xlane.f32.xlu1 %v4666_v12 }
0x29ad   :  { %v4665_v54 = vpop.xlane.xlu0 %4664 }
0x29ae   :  { %v4669_v19 = vmul.f32 0.03125, %v4665_v54 }
0x29af   :  { %v4668_v55 = vpop.xlane.xlu1 %4667 }
0x29b0   :  { %v4671_v20 = vadd.f32 1e-05, %v4669_v19  ;;  %v4670_v21 = vmul.f32 0.03125, %v4668_v55 }
0x29b2   :  { %6031 = vrsqrt.f32 %v4671_v20  ;;  %v4672_v56 = vadd.f32 1e-05, %v4670_v21 }
0x29b4   :  { %6033 = vrsqrt.f32 %v4672_v56 }
0x29bc   :  { %v6032_v22 = vpop.eup %6031 }
0x29bd   :  { %v4675_v23 = vmul.f32 %v6032_v22, %v4659_v1 }
0x29be   :  { %v6034_v2 = vpop.eup %6033 }
0x29bf   :  { %v4683_v3 = vmul.f32 %v5113_v36, %v4675_v23  ;;  %v4676_v25 = vmul.f32 %v6034_v2, %v4660_v7 }
0x29c1   :  { %v4691_v26 = vadd.f32 %v5114_v13, %v4683_v3  ;;  %v4684_v28 = vmul.f32 %v5113_v36, %v4676_v25 }
0x29c3   :  { %v4692_v29 = vadd.f32 %v5114_v13, %v4684_v28  ;;  %v4697_v30 = vpack.c.bf16 %v4691_v26, %v4691_v26 }
0x29c5   :  { %v4698_v31 = vpack.c.bf16 %v4692_v29, %v4692_v29  ;;  %v4708_v11 = vunpack.c.l.b16 %v4697_v30 }
0x29c7   :  { %v4709_v34 = vunpack.c.l.b16 %v4698_v31 }
0x29c9   :  { %v4710_v17 = vrot.slane %v4709_v34, 7 }
0x29cb   :  { %v4712_v60 = vsel %vm4711_vm9, %v4710_v17, %v4708_v11 }
0x29cc   :  { %v4713_v35 = vpack.c.b16 %v4712_v60, %v4712_v60 }
0x29ce   :  { %5837 = vmatmul.mubr.msk.bf16.vlgmr.msra.gmra.mrb[132].mxu0 %vm112_vm0, %v4713_v35 }
0x2aa1   :  { %v4763_v39 = vpop.f32.mrb[132].mxu0 }
0x2aa2   :  { %v4764_v40 = vadd.f32 %v5115_v38, %v4763_v39  ;;  %v5838_v63 = vpop.f32.mrb[133].mxu0 }
0x2aa3   :  { %v4766_v41 = vpop.f32.mrb[134].mxu0 }
0x2aa4   :  { %4769 = vst [vmem:[#allocation2] sm:$0x3] %v4764_v40  ;;  %v5839_v42 = vpop.f32.mrb[135].mxu0 }
0x2aa5   :  { %6046 = shalt.err (!%p6043_p4)
}
0x2aa6   :  { %s6047_s20 = scalar_lea.hbm %s7154_s21, 32 }
0x2aa7   :  { %p6048_p5 = scmp.ne.s32.totalorder %s7154_s21, %s6047_s20  ;;  %p6051_p6 = scmp.lt.u32.totalorder %s6047_s20, %s7154_s21 }
0x2aa9   :  { %p6053_p7 = pnand %p6051_p6, %p6048_p5 }
0x2aab   :  { %6056 = shalt.err (!%p6053_p7)
}
0x2aac   :  { %4779 = dma.vmem_to_hbm [thread:$0]  %s4777_s12, 32, %s7154_s21, [#allocation3]  }
0x2aad   :  { %6057 = dma.done.wait [#allocation3], 32  }
0x2aae   :  { %6058 = vsyncadd [#allocation3], 4294967264 }
0x2aaf   :  { %4783 = vsyncpa [#allocation3], 1 }

</bundles_post_ra>
